<compile_context>
chip_gen: v7x
topology: tpu7x:2x2x1
jax: 0.10.0
libtpu: 0.0.40
codegen_flags: <defaults>
</compile_context>

<pallas_src>
import functools

import jax
import jax.numpy as jnp
from jax.experimental import pallas as pl
from jax.experimental.pallas import tpu as pltpu


def _round_up(n, m):
    return ((n + m - 1) // m) * m


# ----------------------------------------------------------------------------
# Fused Pallas kernel
# ----------------------------------------------------------------------------
def _make_fused_kernel(*, use_bottleneck, use_residual, nb_p, c_in_p, c_out_p,
                       conv_stages, L, L_pad, c_max, halo, staging_dtype):
    """conv_stages: list of (k, ci_p, co_p) for the k>1 conv chain."""
    n_1x1 = 1 if (use_bottleneck or use_residual) else 0
    n_w = n_1x1 + len(conv_stages)
    rhalo = halo + L_pad                       # start of the right halo
    f32 = jnp.float32

    def kernel(*refs):
        i = 0
        x_ref = refs[i]; i += 1
        w_refs = refs[i:i + n_w]; i += n_w
        shift_ref = None
        if use_residual:
            shift_ref = refs[i]; i += 1
        out_ref = refs[i]; i += 1
        pads = [refs[i], refs[i + 1]]; i += 2
        res_ref = refs[i] if use_residual else None

        # Zero ONLY the halo columns, once. Every stage fully rewrites the interior
        # [halo, halo+L_pad), so the halos stay zero for the whole kernel.
        zhalo = jnp.zeros((c_max, halo), staging_dtype)
        for pb in pads:
            pb[:, 0:halo] = zhalo
            pb[:, rhalo:rhalo + halo] = zhalo

        x = x_ref[0]                                          # (c_in_p, L_pad)

        # ---- stage 0: 1x1 conv(s); residual (BN scale pre-folded) fused in ----
        wi = 0
        if use_bottleneck:
            w0 = w_refs[wi][...]; wi += 1                     # (nb_p[+c_out_p], c_in_p)
            h0 = jnp.dot(w0, x, preferred_element_type=f32)
            if use_residual:
                r = h0[nb_p:, :] + shift_ref[...]             # BN shift, scale in w0
                res_ref[...] = jnp.maximum(r, 0.0)            # ReLU
                h0 = h0[0:nb_p, :]
            pads[0][0:nb_p, halo:rhalo] = h0.astype(staging_dtype)
        else:
            if use_residual:
                wr = w_refs[wi][...]; wi += 1                 # (c_out_p, c_in_p)
                r = jnp.dot(wr, x, preferred_element_type=f32) + shift_ref[...]
                res_ref[...] = jnp.maximum(r, 0.0)
            pads[0][0:c_in_p, halo:rhalo] = x.astype(staging_dtype)

        # Columns >= L of an intermediate stage output must read as zero for the
        # next stage ("same" zero padding applies to the true length L).
        need_mask = L < L_pad
        if need_mask:
            valid = jax.lax.broadcasted_iota(jnp.int32, (1, L_pad), 1) < L

        # ---- conv chain: per-tap accumulation straight from shifted pad slices ----
        cur = 0
        n_conv = len(conv_stages)
        for si, (k, ci, co) in enumerate(conv_stages):
            w_ref = w_refs[wi]; wi += 1                        # (k, co, ci)
            left = (k - 1) // 2
            base = halo - left
            src = pads[cur]
            acc = None
            for j in range(k):                                 # static unroll
                d = jnp.dot(w_ref[j], src[0:ci, base + j:base + j + L_pad],
                            preferred_element_type=f32)
                acc = d if acc is None else acc + d
            if si == n_conv - 1:
                if use_residual:
                    acc = acc + res_ref[...]
                out_ref[0] = acc.astype(out_ref.dtype)
            else:
                if need_mask:
                    acc = jnp.where(valid, acc, 0.0)
                pads[1 - cur][0:co, halo:rhalo] = acc.astype(staging_dtype)
                cur = 1 - cur

    return kernel


# ----------------------------------------------------------------------------
# Wrapper
# ----------------------------------------------------------------------------
def inception_block(x, params, *, use_bottleneck=True, use_residual=True, eps=1e-5):
    """Fused Pallas forward of InceptionBlock (stride=1, eval-mode BatchNorm)."""
    B, C_in, L = x.shape
    dt = x.dtype                       # staging dtype; accumulation is always f32
    HALO = 128

    w_convs = params["w_convs"]
    C_out = int(w_convs[-1].shape[0])
    C_in_p = _round_up(C_in, 8)
    C_out_p = _round_up(C_out, 8)
    L_pad = _round_up(L, 128)

    # Zero-pad input channels (sublane alignment) and length (lane-dense stores).
    x_p = jnp.pad(x, ((0, 0), (0, C_in_p - C_in), (0, L_pad - L)))

    inputs = [x_p]
    in_specs = [pl.BlockSpec((1, C_in_p, L_pad), lambda b: (b, 0, 0))]

    nb = nb_p = 0
    if use_bottleneck:
        wb = params["w_bottleneck"][:, :, 0]
        nb = int(wb.shape[0])
        nb_p = _round_up(nb, 8)
        wb_p = jnp.zeros((nb_p, C_in_p), dt).at[:nb, :C_in].set(wb.astype(dt))

    if use_residual:
        scale = params["bn_gamma"] / jnp.sqrt(params["bn_var"] + eps)
        shift = (params["bn_beta"] - params["bn_mean"] * scale).astype(jnp.float32)
        wr = params["w_res"][:, :, 0] * scale[:, None]        # fold BN scale into 1x1
        wr_p = jnp.zeros((C_out_p, C_in_p), dt).at[:C_out, :C_in].set(wr.astype(dt))
        shift_p = jnp.zeros((C_out_p, 1), jnp.float32).at[:C_out, 0].set(shift)

    if use_bottleneck:
        w0 = jnp.concatenate([wb_p, wr_p], axis=0) if use_residual else wb_p
        inputs.append(w0)
        in_specs.append(pl.BlockSpec(w0.shape, lambda b: (0, 0)))
    elif use_residual:
        inputs.append(wr_p)
        in_specs.append(pl.BlockSpec(wr_p.shape, lambda b: (0, 0)))

    conv_stages = []
    prev_p = nb_p if use_bottleneck else C_in_p
    for w in w_convs:
        co, ci, k = (int(s) for s in w.shape)
        co_p = _round_up(co, 8)
        w_p = jnp.zeros((k, co_p, prev_p), dt).at[:, :co, :ci].set(
            jnp.transpose(w, (2, 0, 1)).astype(dt))           # (k, co_p, ci_p)
        inputs.append(w_p)
        in_specs.append(pl.BlockSpec(w_p.shape, lambda b: (0, 0, 0)))
        conv_stages.append((k, prev_p, co_p))
        prev_p = co_p
    assert prev_p == C_out_p

    if use_residual:
        inputs.append(shift_p)
        in_specs.append(pl.BlockSpec((C_out_p, 1), lambda b: (0, 0)))

    # Scratch: two ping-pong halo-padded activation buffers + small residual buffer.
    c_max = max(ci for (_, ci, _) in conv_stages)
    pad_w = HALO + L_pad + HALO
    scratch_shapes = [pltpu.VMEM((c_max, pad_w), dt), pltpu.VMEM((c_max, pad_w), dt)]
    if use_residual:
        scratch_shapes.append(pltpu.VMEM((C_out_p, L_pad), jnp.float32))

    kernel = _make_fused_kernel(
        use_bottleneck=use_bottleneck, use_residual=use_residual,
        nb_p=nb_p, c_in_p=C_in_p, c_out_p=C_out_p, conv_stages=conv_stages,
        L=L, L_pad=L_pad, c_max=c_max, halo=HALO, staging_dtype=dt)

    # Advisory cost estimate and a VMEM limit safe on v7x (<= half of 64 MiB).
    itemsize = jnp.dtype(dt).itemsize
    flops = 2 * B * L_pad * sum(k * ci * co for (k, ci, co) in conv_stages)
    if use_bottleneck or use_residual:
        flops += 2 * B * L_pad * int(inputs[1].shape[0]) * C_in_p
    weight_bytes = sum(int(a.size) * jnp.dtype(a.dtype).itemsize for a in inputs[1:])
    io_block_bytes = (C_in_p + C_out_p) * L_pad * itemsize
    scratch_bytes = (2 * c_max * pad_w * itemsize
                     + (C_out_p * L_pad * 4 if use_residual else 0))
    vmem_needed = scratch_bytes + 2 * io_block_bytes + weight_bytes
    vmem_limit = int(min(max(4 * vmem_needed, 16 * 2 ** 20), 32 * 2 ** 20))
    bytes_accessed = B * (C_in_p + C_out_p) * L_pad * itemsize + weight_bytes

    out = pl.pallas_call(
        kernel,
        out_shape=jax.ShapeDtypeStruct((B, C_out_p, L_pad), dt),
        grid=(B,),
        in_specs=in_specs,
        out_specs=pl.BlockSpec((1, C_out_p, L_pad), lambda b: (b, 0, 0)),
        scratch_shapes=scratch_shapes,
        compiler_params=pltpu.CompilerParams(
            dimension_semantics=("parallel",),
            vmem_limit_bytes=vmem_limit,
        ),
        cost_estimate=pl.CostEstimate(flops=int(flops), transcendentals=0,
                                      bytes_accessed=int(bytes_accessed)),
    )(*inputs)

    return out[:, :C_out, :L]


# ----------------------------------------------------------------------------
# Pure-JAX reference (for correctness check)
# ----------------------------------------------------------------------------
def _conv1d_same_ref(x, w):
    K = w.shape[2]
    left, right = (K - 1) // 2, K // 2
    return jax.lax.conv_general_dilated(
        x, w, window_strides=(1,), padding=[(left, right)],
        dimension_numbers=("NCH", "OIH", "NCH"),
        precision=jax.lax.Precision.HIGHEST,
    )


def _inception_ref(x, params):
    h = _conv1d_same_ref(x, params["w_bottleneck"])
    for w in params["w_convs"]:
        h = _conv1d_same_ref(h, w)
    eps = 1e-5
    scale = params["bn_gamma"] / jnp.sqrt(params["bn_var"] + eps)
    shift = params["bn_beta"] - params["bn_mean"] * scale
    r = _conv1d_same_ref(x, params["w_res"])
    r = jnp.maximum(r * scale[None, :, None] + shift[None, :, None], 0.0)
    return h + r


# ----------------------------------------------------------------------------
# Parameter construction (deterministic, mirrors InceptionBlock.__init__ shapes)
# ----------------------------------------------------------------------------
def make_params(key, in_channels, out_channels, bottleneck_channels, kernel_size):
    kernel_size_s = [kernel_size // (2 ** i) for i in range(3)]  # [41, 20, 10]
    start_channels = bottleneck_channels if bottleneck_channels > 0 else in_channels
    channels = [start_channels] + [out_channels] * 3

    keys = jax.random.split(key, 8)
    params = {}
    params["w_bottleneck"] = 0.1 * jax.random.normal(
        keys[0], (bottleneck_channels, in_channels, 1), jnp.float32)
    w_convs = []
    for i, k in enumerate(kernel_size_s):
        w_convs.append(0.1 * jax.random.normal(
            keys[1 + i], (channels[i + 1], channels[i], k), jnp.float32))
    params["w_convs"] = w_convs
    params["w_res"] = 0.1 * jax.random.normal(
        keys[4], (out_channels, in_channels, 1), jnp.float32)
    # BatchNorm1d(out_channels) defaults: gamma=1, beta=0, mean=0, var=1.
    params["bn_gamma"] = jnp.ones((out_channels,), jnp.float32)
    params["bn_beta"] = jnp.zeros((out_channels,), jnp.float32)
    params["bn_mean"] = jnp.zeros((out_channels,), jnp.float32)
    params["bn_var"] = jnp.ones((out_channels,), jnp.float32)
    return params


# ----------------------------------------------------------------------------
if __name__ == "__main__":
    B, C_IN, L = 2, 4, 16
    C_OUT, BOTTLENECK, KSIZE = 8, 32, 41   # module defaults: bottleneck=32, kernel=41

    key = jax.random.PRNGKey(0)
    kx, kp = jax.random.split(key)
    x = jax.random.normal(kx, (B, C_IN, L), jnp.float32)
    params = make_params(kp, C_IN, C_OUT, BOTTLENECK, KSIZE)

    fwd = jax.jit(functools.partial(inception_block,
                                    use_bottleneck=True, use_residual=True))
    out = jax.block_until_ready(fwd(x, params))

    ref = _inception_ref(x, params)
    assert out.shape == (B, C_OUT, L), out.shape
    max_err = float(jnp.max(jnp.abs(out - ref)))
    assert jnp.allclose(out, ref, atol=5e-3, rtol=5e-3), max_err
    print("KERNEL_OK")
</pallas_src>

<mosaic_0001>
module attributes {stable_mosaic.version = 11 : i64} {
  func.func @kernel(%arg0: i32, %arg1: memref<1x8x128xf32, #tpu.memory_space<vmem>>, %arg2: memref<40x8xf32, #tpu.memory_space<vmem>>, %arg3: memref<41x8x32xf32, #tpu.memory_space<vmem>>, %arg4: memref<20x8x8xf32, #tpu.memory_space<vmem>>, %arg5: memref<10x8x8xf32, #tpu.memory_space<vmem>>, %arg6: memref<8x1xf32, #tpu.memory_space<vmem>>, %arg7: memref<1x8x128xf32, #tpu.memory_space<vmem>>, %arg8: memref<32x384xf32, #tpu.memory_space<vmem>>, %arg9: memref<32x384xf32, #tpu.memory_space<vmem>>, %arg10: memref<8x128xf32, #tpu.memory_space<vmem>>) attributes {dimension_semantics = [#tpu.dimension_semantics<parallel>], iteration_bounds = array<i64: 2>, scalar_prefetch = 0 : i64, scratch_operands = 3 : i64, tpu.core_type = #tpu.core_type<tc>, window_params = [{transform_indices = @transform_0, window_bounds = array<i64: 1, 8, 128>}, {pipeline_mode = #tpu.pipeline_mode<synchronous>, transform_indices = @transform_1, window_bounds = array<i64: 40, 8>}, {pipeline_mode = #tpu.pipeline_mode<synchronous>, transform_indices = @transform_2, window_bounds = array<i64: 41, 8, 32>}, {pipeline_mode = #tpu.pipeline_mode<synchronous>, transform_indices = @transform_3, window_bounds = array<i64: 20, 8, 8>}, {pipeline_mode = #tpu.pipeline_mode<synchronous>, transform_indices = @transform_4, window_bounds = array<i64: 10, 8, 8>}, {pipeline_mode = #tpu.pipeline_mode<synchronous>, transform_indices = @transform_5, window_bounds = array<i64: 8, 1>}, {transform_indices = @transform_6, window_bounds = array<i64: 1, 8, 128>}]} {
    %cst = arith.constant 0.000000e+00 : f32
    %0 = vector.broadcast %cst : f32 to vector<32x128xf32>
    %c0 = arith.constant 0 : index
    %c0_0 = arith.constant 0 : index
    %1 = vector.load %arg8[%c0, %c0_0] : memref<32x384xf32, #tpu.memory_space<vmem>>, vector<32x128xf32>
    tpu.vector_store %arg8[%c0, %c0_0], %0 {strides = array<i32>} : memref<32x384xf32, #tpu.memory_space<vmem>>, vector<32x128xf32>,
    %c0_1 = arith.constant 0 : index
    %c256 = arith.constant 256 : index
    %2 = vector.load %arg8[%c0_1, %c256] : memref<32x384xf32, #tpu.memory_space<vmem>>, vector<32x128xf32>
    tpu.vector_store %arg8[%c0_1, %c256], %0 {strides = array<i32>} : memref<32x384xf32, #tpu.memory_space<vmem>>, vector<32x128xf32>,
    %c0_2 = arith.constant 0 : index
    %c0_3 = arith.constant 0 : index
    %3 = vector.load %arg9[%c0_2, %c0_3] : memref<32x384xf32, #tpu.memory_space<vmem>>, vector<32x128xf32>
    tpu.vector_store %arg9[%c0_2, %c0_3], %0 {strides = array<i32>} : memref<32x384xf32, #tpu.memory_space<vmem>>, vector<32x128xf32>,
    %c0_4 = arith.constant 0 : index
    %c256_5 = arith.constant 256 : index
    %4 = vector.load %arg9[%c0_4, %c256_5] : memref<32x384xf32, #tpu.memory_space<vmem>>, vector<32x128xf32>
    tpu.vector_store %arg9[%c0_4, %c256_5], %0 {strides = array<i32>} : memref<32x384xf32, #tpu.memory_space<vmem>>, vector<32x128xf32>,
    %c0_6 = arith.constant 0 : index
    %c0_7 = arith.constant 0 : index
    %c0_8 = arith.constant 0 : index
    %5 = vector.load %arg1[%c0_6, %c0_7, %c0_8] : memref<1x8x128xf32, #tpu.memory_space<vmem>>, vector<1x8x128xf32>
    %6 = vector.shape_cast %5 : vector<1x8x128xf32> to vector<8x128xf32>
    %c0_9 = arith.constant 0 : index
    %c0_10 = arith.constant 0 : index
    %7 = vector.load %arg2[%c0_9, %c0_10] : memref<40x8xf32, #tpu.memory_space<vmem>>, vector<40x8xf32>
    %cst_11 = arith.constant dense<0.000000e+00> : vector<40x128xf32>
    %8 = tpu.matmul %7, %6, %cst_11 {dimension_numbers = #tpu.dot_dimension_numbers<[1], [0], [0], [1], [0, 0, 1, 1], [], []>} : vector<40x8xf32>, vector<8x128xf32>, vector<40x128xf32> -> vector<40x128xf32>
    %9 = vector.extract_strided_slice %8 {offsets = [32, 0], sizes = [8, 128], strides = [1, 1]} : vector<40x128xf32> to vector<8x128xf32>
    %c0_12 = arith.constant 0 : index
    %c0_13 = arith.constant 0 : index
    %10 = vector.load %arg6[%c0_12, %c0_13] : memref<8x1xf32, #tpu.memory_space<vmem>>, vector<8x1xf32>
    %11 = vector.broadcast %10 : vector<8x1xf32> to vector<8x128xf32>
    %12 = arith.addf %9, %11 : vector<8x128xf32>
    %cst_14 = arith.constant 0.000000e+00 : f32
    %13 = vector.broadcast %cst_14 : f32 to vector<8x128xf32>
    %14 = arith.maximumf %12, %13 : vector<8x128xf32>
    %c0_15 = arith.constant 0 : index
    %c0_16 = arith.constant 0 : index
    %15 = vector.load %arg10[%c0_15, %c0_16] : memref<8x128xf32, #tpu.memory_space<vmem>>, vector<8x128xf32>
    tpu.vector_store %arg10[%c0_15, %c0_16], %14 {strides = array<i32>} : memref<8x128xf32, #tpu.memory_space<vmem>>, vector<8x128xf32>,
    %16 = vector.extract_strided_slice %8 {offsets = [0, 0], sizes = [32, 128], strides = [1, 1]} : vector<40x128xf32> to vector<32x128xf32>
    %c0_17 = arith.constant 0 : index
    %c128 = arith.constant 128 : index
    %17 = vector.load %arg8[%c0_17, %c128] : memref<32x384xf32, #tpu.memory_space<vmem>>, vector<32x128xf32>
    tpu.vector_store %arg8[%c0_17, %c128], %16 {strides = array<i32>} : memref<32x384xf32, #tpu.memory_space<vmem>>, vector<32x128xf32>,
    %18 = tpu.iota {dimensions = array<i32: 1>} : vector<1x128xi32>
    %c16_i32 = arith.constant 16 : i32
    %19 = vector.broadcast %c16_i32 : i32 to vector<1x128xi32>
    %20 = arith.cmpi slt, %18, %19 : vector<1x128xi32>
    %c0_18 = arith.constant 0 : index
    %c0_19 = arith.constant 0 : index
    %c0_20 = arith.constant 0 : index
    %21 = vector.load %arg3[%c0_18, %c0_19, %c0_20] : memref<41x8x32xf32, #tpu.memory_space<vmem>>, vector<1x8x32xf32>
    %22 = vector.shape_cast %21 : vector<1x8x32xf32> to vector<8x32xf32>
    %c0_21 = arith.constant 0 : index
    %c108 = arith.constant 108 : index
    %23 = vector.load %arg8[%c0_21, %c108] : memref<32x384xf32, #tpu.memory_space<vmem>>, vector<32x128xf32>
    %cst_22 = arith.constant dense<0.000000e+00> : vector<8x128xf32>
    %24 = tpu.matmul %22, %23, %cst_22 {dimension_numbers = #tpu.dot_dimension_numbers<[1], [0], [0], [1], [0, 0, 1, 1], [], []>} : vector<8x32xf32>, vector<32x128xf32>, vector<8x128xf32> -> vector<8x128xf32>
    %c1 = arith.constant 1 : index
    %c0_23 = arith.constant 0 : index
    %c0_24 = arith.constant 0 : index
    %25 = vector.load %arg3[%c1, %c0_23, %c0_24] : memref<41x8x32xf32, #tpu.memory_space<vmem>>, vector<1x8x32xf32>
    %26 = vector.shape_cast %25 : vector<1x8x32xf32> to vector<8x32xf32>
    %c0_25 = arith.constant 0 : index
    %c109 = arith.constant 109 : index
    %27 = vector.load %arg8[%c0_25, %c109] : memref<32x384xf32, #tpu.memory_space<vmem>>, vector<32x128xf32>
    %cst_26 = arith.constant dense<0.000000e+00> : vector<8x128xf32>
    %28 = tpu.matmul %26, %27, %cst_26 {dimension_numbers = #tpu.dot_dimension_numbers<[1], [0], [0], [1], [0, 0, 1, 1], [], []>} : vector<8x32xf32>, vector<32x128xf32>, vector<8x128xf32> -> vector<8x128xf32>
    %29 = arith.addf %24, %28 : vector<8x128xf32>
    %c2 = arith.constant 2 : index
    %c0_27 = arith.constant 0 : index
    %c0_28 = arith.constant 0 : index
    %30 = vector.load %arg3[%c2, %c0_27, %c0_28] : memref<41x8x32xf32, #tpu.memory_space<vmem>>, vector<1x8x32xf32>
    %31 = vector.shape_cast %30 : vector<1x8x32xf32> to vector<8x32xf32>
    %c0_29 = arith.constant 0 : index
    %c110 = arith.constant 110 : index
    %32 = vector.load %arg8[%c0_29, %c110] : memref<32x384xf32, #tpu.memory_space<vmem>>, vector<32x128xf32>
    %cst_30 = arith.constant dense<0.000000e+00> : vector<8x128xf32>
    %33 = tpu.matmul %31, %32, %cst_30 {dimension_numbers = #tpu.dot_dimension_numbers<[1], [0], [0], [1], [0, 0, 1, 1], [], []>} : vector<8x32xf32>, vector<32x128xf32>, vector<8x128xf32> -> vector<8x128xf32>
    %34 = arith.addf %29, %33 : vector<8x128xf32>
    %c3 = arith.constant 3 : index
    %c0_31 = arith.constant 0 : index
    %c0_32 = arith.constant 0 : index
    %35 = vector.load %arg3[%c3, %c0_31, %c0_32] : memref<41x8x32xf32, #tpu.memory_space<vmem>>, vector<1x8x32xf32>
    %36 = vector.shape_cast %35 : vector<1x8x32xf32> to vector<8x32xf32>
    %c0_33 = arith.constant 0 : index
    %c111 = arith.constant 111 : index
    %37 = vector.load %arg8[%c0_33, %c111] : memref<32x384xf32, #tpu.memory_space<vmem>>, vector<32x128xf32>
    %cst_34 = arith.constant dense<0.000000e+00> : vector<8x128xf32>
    %38 = tpu.matmul %36, %37, %cst_34 {dimension_numbers = #tpu.dot_dimension_numbers<[1], [0], [0], [1], [0, 0, 1, 1], [], []>} : vector<8x32xf32>, vector<32x128xf32>, vector<8x128xf32> -> vector<8x128xf32>
    %39 = arith.addf %34, %38 : vector<8x128xf32>
    %c4 = arith.constant 4 : index
    %c0_35 = arith.constant 0 : index
    %c0_36 = arith.constant 0 : index
    %40 = vector.load %arg3[%c4, %c0_35, %c0_36] : memref<41x8x32xf32, #tpu.memory_space<vmem>>, vector<1x8x32xf32>
    %41 = vector.shape_cast %40 : vector<1x8x32xf32> to vector<8x32xf32>
    %c0_37 = arith.constant 0 : index
    %c112 = arith.constant 112 : index
    %42 = vector.load %arg8[%c0_37, %c112] : memref<32x384xf32, #tpu.memory_space<vmem>>, vector<32x128xf32>
    %cst_38 = arith.constant dense<0.000000e+00> : vector<8x128xf32>
    %43 = tpu.matmul %41, %42, %cst_38 {dimension_numbers = #tpu.dot_dimension_numbers<[1], [0], [0], [1], [0, 0, 1, 1], [], []>} : vector<8x32xf32>, vector<32x128xf32>, vector<8x128xf32> -> vector<8x128xf32>
    %44 = arith.addf %39, %43 : vector<8x128xf32>
    %c5 = arith.constant 5 : index
    %c0_39 = arith.constant 0 : index
    %c0_40 = arith.constant 0 : index
    %45 = vector.load %arg3[%c5, %c0_39, %c0_40] : memref<41x8x32xf32, #tpu.memory_space<vmem>>, vector<1x8x32xf32>
    %46 = vector.shape_cast %45 : vector<1x8x32xf32> to vector<8x32xf32>
    %c0_41 = arith.constant 0 : index
    %c113 = arith.constant 113 : index
    %47 = vector.load %arg8[%c0_41, %c113] : memref<32x384xf32, #tpu.memory_space<vmem>>, vector<32x128xf32>
    %cst_42 = arith.constant dense<0.000000e+00> : vector<8x128xf32>
    %48 = tpu.matmul %46, %47, %cst_42 {dimension_numbers = #tpu.dot_dimension_numbers<[1], [0], [0], [1], [0, 0, 1, 1], [], []>} : vector<8x32xf32>, vector<32x128xf32>, vector<8x128xf32> -> vector<8x128xf32>
    %49 = arith.addf %44, %48 : vector<8x128xf32>
    %c6 = arith.constant 6 : index
    %c0_43 = arith.constant 0 : index
    %c0_44 = arith.constant 0 : index
    %50 = vector.load %arg3[%c6, %c0_43, %c0_44] : memref<41x8x32xf32, #tpu.memory_space<vmem>>, vector<1x8x32xf32>
    %51 = vector.shape_cast %50 : vector<1x8x32xf32> to vector<8x32xf32>
    %c0_45 = arith.constant 0 : index
    %c114 = arith.constant 114 : index
    %52 = vector.load %arg8[%c0_45, %c114] : memref<32x384xf32, #tpu.memory_space<vmem>>, vector<32x128xf32>
    %cst_46 = arith.constant dense<0.000000e+00> : vector<8x128xf32>
    %53 = tpu.matmul %51, %52, %cst_46 {dimension_numbers = #tpu.dot_dimension_numbers<[1], [0], [0], [1], [0, 0, 1, 1], [], []>} : vector<8x32xf32>, vector<32x128xf32>, vector<8x128xf32> -> vector<8x128xf32>
    %54 = arith.addf %49, %53 : vector<8x128xf32>
    %c7 = arith.constant 7 : index
    %c0_47 = arith.constant 0 : index
    %c0_48 = arith.constant 0 : index
    %55 = vector.load %arg3[%c7, %c0_47, %c0_48] : memref<41x8x32xf32, #tpu.memory_space<vmem>>, vector<1x8x32xf32>
    %56 = vector.shape_cast %55 : vector<1x8x32xf32> to vector<8x32xf32>
    %c0_49 = arith.constant 0 : index
    %c115 = arith.constant 115 : index
    %57 = vector.load %arg8[%c0_49, %c115] : memref<32x384xf32, #tpu.memory_space<vmem>>, vector<32x128xf32>
    %cst_50 = arith.constant dense<0.000000e+00> : vector<8x128xf32>
    %58 = tpu.matmul %56, %57, %cst_50 {dimension_numbers = #tpu.dot_dimension_numbers<[1], [0], [0], [1], [0, 0, 1, 1], [], []>} : vector<8x32xf32>, vector<32x128xf32>, vector<8x128xf32> -> vector<8x128xf32>
    %59 = arith.addf %54, %58 : vector<8x128xf32>
    %c8 = arith.constant 8 : index
    %c0_51 = arith.constant 0 : index
    %c0_52 = arith.constant 0 : index
    %60 = vector.load %arg3[%c8, %c0_51, %c0_52] : memref<41x8x32xf32, #tpu.memory_space<vmem>>, vector<1x8x32xf32>
    %61 = vector.shape_cast %60 : vector<1x8x32xf32> to vector<8x32xf32>
    %c0_53 = arith.constant 0 : index
    %c116 = arith.constant 116 : index
    %62 = vector.load %arg8[%c0_53, %c116] : memref<32x384xf32, #tpu.memory_space<vmem>>, vector<32x128xf32>
    %cst_54 = arith.constant dense<0.000000e+00> : vector<8x128xf32>
    %63 = tpu.matmul %61, %62, %cst_54 {dimension_numbers = #tpu.dot_dimension_numbers<[1], [0], [0], [1], [0, 0, 1, 1], [], []>} : vector<8x32xf32>, vector<32x128xf32>, vector<8x128xf32> -> vector<8x128xf32>
    %64 = arith.addf %59, %63 : vector<8x128xf32>
    %c9 = arith.constant 9 : index
    %c0_55 = arith.constant 0 : index
    %c0_56 = arith.constant 0 : index
    %65 = vector.load %arg3[%c9, %c0_55, %c0_56] : memref<41x8x32xf32, #tpu.memory_space<vmem>>, vector<1x8x32xf32>
    %66 = vector.shape_cast %65 : vector<1x8x32xf32> to vector<8x32xf32>
    %c0_57 = arith.constant 0 : index
    %c117 = arith.constant 117 : index
    %67 = vector.load %arg8[%c0_57, %c117] : memref<32x384xf32, #tpu.memory_space<vmem>>, vector<32x128xf32>
    %cst_58 = arith.constant dense<0.000000e+00> : vector<8x128xf32>
    %68 = tpu.matmul %66, %67, %cst_58 {dimension_numbers = #tpu.dot_dimension_numbers<[1], [0], [0], [1], [0, 0, 1, 1], [], []>} : vector<8x32xf32>, vector<32x128xf32>, vector<8x128xf32> -> vector<8x128xf32>
    %69 = arith.addf %64, %68 : vector<8x128xf32>
    %c10 = arith.constant 10 : index
    %c0_59 = arith.constant 0 : index
    %c0_60 = arith.constant 0 : index
    %70 = vector.load %arg3[%c10, %c0_59, %c0_60] : memref<41x8x32xf32, #tpu.memory_space<vmem>>, vector<1x8x32xf32>
    %71 = vector.shape_cast %70 : vector<1x8x32xf32> to vector<8x32xf32>
    %c0_61 = arith.constant 0 : index
    %c118 = arith.constant 118 : index
    %72 = vector.load %arg8[%c0_61, %c118] : memref<32x384xf32, #tpu.memory_space<vmem>>, vector<32x128xf32>
    %cst_62 = arith.constant dense<0.000000e+00> : vector<8x128xf32>
    %73 = tpu.matmul %71, %72, %cst_62 {dimension_numbers = #tpu.dot_dimension_numbers<[1], [0], [0], [1], [0, 0, 1, 1], [], []>} : vector<8x32xf32>, vector<32x128xf32>, vector<8x128xf32> -> vector<8x128xf32>
    %74 = arith.addf %69, %73 : vector<8x128xf32>
    %c11 = arith.constant 11 : index
    %c0_63 = arith.constant 0 : index
    %c0_64 = arith.constant 0 : index
    %75 = vector.load %arg3[%c11, %c0_63, %c0_64] : memref<41x8x32xf32, #tpu.memory_space<vmem>>, vector<1x8x32xf32>
    %76 = vector.shape_cast %75 : vector<1x8x32xf32> to vector<8x32xf32>
    %c0_65 = arith.constant 0 : index
    %c119 = arith.constant 119 : index
    %77 = vector.load %arg8[%c0_65, %c119] : memref<32x384xf32, #tpu.memory_space<vmem>>, vector<32x128xf32>
    %cst_66 = arith.constant dense<0.000000e+00> : vector<8x128xf32>
    %78 = tpu.matmul %76, %77, %cst_66 {dimension_numbers = #tpu.dot_dimension_numbers<[1], [0], [0], [1], [0, 0, 1, 1], [], []>} : vector<8x32xf32>, vector<32x128xf32>, vector<8x128xf32> -> vector<8x128xf32>
    %79 = arith.addf %74, %78 : vector<8x128xf32>
    %c12 = arith.constant 12 : index
    %c0_67 = arith.constant 0 : index
    %c0_68 = arith.constant 0 : index
    %80 = vector.load %arg3[%c12, %c0_67, %c0_68] : memref<41x8x32xf32, #tpu.memory_space<vmem>>, vector<1x8x32xf32>
    %81 = vector.shape_cast %80 : vector<1x8x32xf32> to vector<8x32xf32>
    %c0_69 = arith.constant 0 : index
    %c120 = arith.constant 120 : index
    %82 = vector.load %arg8[%c0_69, %c120] : memref<32x384xf32, #tpu.memory_space<vmem>>, vector<32x128xf32>
    %cst_70 = arith.constant dense<0.000000e+00> : vector<8x128xf32>
    %83 = tpu.matmul %81, %82, %cst_70 {dimension_numbers = #tpu.dot_dimension_numbers<[1], [0], [0], [1], [0, 0, 1, 1], [], []>} : vector<8x32xf32>, vector<32x128xf32>, vector<8x128xf32> -> vector<8x128xf32>
    %84 = arith.addf %79, %83 : vector<8x128xf32>
    %c13 = arith.constant 13 : index
    %c0_71 = arith.constant 0 : index
    %c0_72 = arith.constant 0 : index
    %85 = vector.load %arg3[%c13, %c0_71, %c0_72] : memref<41x8x32xf32, #tpu.memory_space<vmem>>, vector<1x8x32xf32>
    %86 = vector.shape_cast %85 : vector<1x8x32xf32> to vector<8x32xf32>
    %c0_73 = arith.constant 0 : index
    %c121 = arith.constant 121 : index
    %87 = vector.load %arg8[%c0_73, %c121] : memref<32x384xf32, #tpu.memory_space<vmem>>, vector<32x128xf32>
    %cst_74 = arith.constant dense<0.000000e+00> : vector<8x128xf32>
    %88 = tpu.matmul %86, %87, %cst_74 {dimension_numbers = #tpu.dot_dimension_numbers<[1], [0], [0], [1], [0, 0, 1, 1], [], []>} : vector<8x32xf32>, vector<32x128xf32>, vector<8x128xf32> -> vector<8x128xf32>
    %89 = arith.addf %84, %88 : vector<8x128xf32>
    %c14 = arith.constant 14 : index
    %c0_75 = arith.constant 0 : index
    %c0_76 = arith.constant 0 : index
    %90 = vector.load %arg3[%c14, %c0_75, %c0_76] : memref<41x8x32xf32, #tpu.memory_space<vmem>>, vector<1x8x32xf32>
    %91 = vector.shape_cast %90 : vector<1x8x32xf32> to vector<8x32xf32>
    %c0_77 = arith.constant 0 : index
    %c122 = arith.constant 122 : index
    %92 = vector.load %arg8[%c0_77, %c122] : memref<32x384xf32, #tpu.memory_space<vmem>>, vector<32x128xf32>
    %cst_78 = arith.constant dense<0.000000e+00> : vector<8x128xf32>
    %93 = tpu.matmul %91, %92, %cst_78 {dimension_numbers = #tpu.dot_dimension_numbers<[1], [0], [0], [1], [0, 0, 1, 1], [], []>} : vector<8x32xf32>, vector<32x128xf32>, vector<8x128xf32> -> vector<8x128xf32>
    %94 = arith.addf %89, %93 : vector<8x128xf32>
    %c15 = arith.constant 15 : index
    %c0_79 = arith.constant 0 : index
    %c0_80 = arith.constant 0 : index
    %95 = vector.load %arg3[%c15, %c0_79, %c0_80] : memref<41x8x32xf32, #tpu.memory_space<vmem>>, vector<1x8x32xf32>
    %96 = vector.shape_cast %95 : vector<1x8x32xf32> to vector<8x32xf32>
    %c0_81 = arith.constant 0 : index
    %c123 = arith.constant 123 : index
    %97 = vector.load %arg8[%c0_81, %c123] : memref<32x384xf32, #tpu.memory_space<vmem>>, vector<32x128xf32>
    %cst_82 = arith.constant dense<0.000000e+00> : vector<8x128xf32>
    %98 = tpu.matmul %96, %97, %cst_82 {dimension_numbers = #tpu.dot_dimension_numbers<[1], [0], [0], [1], [0, 0, 1, 1], [], []>} : vector<8x32xf32>, vector<32x128xf32>, vector<8x128xf32> -> vector<8x128xf32>
    %99 = arith.addf %94, %98 : vector<8x128xf32>
    %c16 = arith.constant 16 : index
    %c0_83 = arith.constant 0 : index
    %c0_84 = arith.constant 0 : index
    %100 = vector.load %arg3[%c16, %c0_83, %c0_84] : memref<41x8x32xf32, #tpu.memory_space<vmem>>, vector<1x8x32xf32>
    %101 = vector.shape_cast %100 : vector<1x8x32xf32> to vector<8x32xf32>
    %c0_85 = arith.constant 0 : index
    %c124 = arith.constant 124 : index
    %102 = vector.load %arg8[%c0_85, %c124] : memref<32x384xf32, #tpu.memory_space<vmem>>, vector<32x128xf32>
    %cst_86 = arith.constant dense<0.000000e+00> : vector<8x128xf32>
    %103 = tpu.matmul %101, %102, %cst_86 {dimension_numbers = #tpu.dot_dimension_numbers<[1], [0], [0], [1], [0, 0, 1, 1], [], []>} : vector<8x32xf32>, vector<32x128xf32>, vector<8x128xf32> -> vector<8x128xf32>
    %104 = arith.addf %99, %103 : vector<8x128xf32>
    %c17 = arith.constant 17 : index
    %c0_87 = arith.constant 0 : index
    %c0_88 = arith.constant 0 : index
    %105 = vector.load %arg3[%c17, %c0_87, %c0_88] : memref<41x8x32xf32, #tpu.memory_space<vmem>>, vector<1x8x32xf32>
    %106 = vector.shape_cast %105 : vector<1x8x32xf32> to vector<8x32xf32>
    %c0_89 = arith.constant 0 : index
    %c125 = arith.constant 125 : index
    %107 = vector.load %arg8[%c0_89, %c125] : memref<32x384xf32, #tpu.memory_space<vmem>>, vector<32x128xf32>
    %cst_90 = arith.constant dense<0.000000e+00> : vector<8x128xf32>
    %108 = tpu.matmul %106, %107, %cst_90 {dimension_numbers = #tpu.dot_dimension_numbers<[1], [0], [0], [1], [0, 0, 1, 1], [], []>} : vector<8x32xf32>, vector<32x128xf32>, vector<8x128xf32> -> vector<8x128xf32>
    %109 = arith.addf %104, %108 : vector<8x128xf32>
    %c18 = arith.constant 18 : index
    %c0_91 = arith.constant 0 : index
    %c0_92 = arith.constant 0 : index
    %110 = vector.load %arg3[%c18, %c0_91, %c0_92] : memref<41x8x32xf32, #tpu.memory_space<vmem>>, vector<1x8x32xf32>
    %111 = vector.shape_cast %110 : vector<1x8x32xf32> to vector<8x32xf32>
    %c0_93 = arith.constant 0 : index
    %c126 = arith.constant 126 : index
    %112 = vector.load %arg8[%c0_93, %c126] : memref<32x384xf32, #tpu.memory_space<vmem>>, vector<32x128xf32>
    %cst_94 = arith.constant dense<0.000000e+00> : vector<8x128xf32>
    %113 = tpu.matmul %111, %112, %cst_94 {dimension_numbers = #tpu.dot_dimension_numbers<[1], [0], [0], [1], [0, 0, 1, 1], [], []>} : vector<8x32xf32>, vector<32x128xf32>, vector<8x128xf32> -> vector<8x128xf32>
    %114 = arith.addf %109, %113 : vector<8x128xf32>
    %c19 = arith.constant 19 : index
    %c0_95 = arith.constant 0 : index
    %c0_96 = arith.constant 0 : index
    %115 = vector.load %arg3[%c19, %c0_95, %c0_96] : memref<41x8x32xf32, #tpu.memory_space<vmem>>, vector<1x8x32xf32>
    %116 = vector.shape_cast %115 : vector<1x8x32xf32> to vector<8x32xf32>
    %c0_97 = arith.constant 0 : index
    %c127 = arith.constant 127 : index
    %117 = vector.load %arg8[%c0_97, %c127] : memref<32x384xf32, #tpu.memory_space<vmem>>, vector<32x128xf32>
    %cst_98 = arith.constant dense<0.000000e+00> : vector<8x128xf32>
    %118 = tpu.matmul %116, %117, %cst_98 {dimension_numbers = #tpu.dot_dimension_numbers<[1], [0], [0], [1], [0, 0, 1, 1], [], []>} : vector<8x32xf32>, vector<32x128xf32>, vector<8x128xf32> -> vector<8x128xf32>
    %119 = arith.addf %114, %118 : vector<8x128xf32>
    %c20 = arith.constant 20 : index
    %c0_99 = arith.constant 0 : index
    %c0_100 = arith.constant 0 : index
    %120 = vector.load %arg3[%c20, %c0_99, %c0_100] : memref<41x8x32xf32, #tpu.memory_space<vmem>>, vector<1x8x32xf32>
    %121 = vector.shape_cast %120 : vector<1x8x32xf32> to vector<8x32xf32>
    %c0_101 = arith.constant 0 : index
    %c128_102 = arith.constant 128 : index
    %122 = vector.load %arg8[%c0_101, %c128_102] : memref<32x384xf32, #tpu.memory_space<vmem>>, vector<32x128xf32>
    %cst_103 = arith.constant dense<0.000000e+00> : vector<8x128xf32>
    %123 = tpu.matmul %121, %122, %cst_103 {dimension_numbers = #tpu.dot_dimension_numbers<[1], [0], [0], [1], [0, 0, 1, 1], [], []>} : vector<8x32xf32>, vector<32x128xf32>, vector<8x128xf32> -> vector<8x128xf32>
    %124 = arith.addf %119, %123 : vector<8x128xf32>
    %c21 = arith.constant 21 : index
    %c0_104 = arith.constant 0 : index
    %c0_105 = arith.constant 0 : index
    %125 = vector.load %arg3[%c21, %c0_104, %c0_105] : memref<41x8x32xf32, #tpu.memory_space<vmem>>, vector<1x8x32xf32>
    %126 = vector.shape_cast %125 : vector<1x8x32xf32> to vector<8x32xf32>
    %c0_106 = arith.constant 0 : index
    %c129 = arith.constant 129 : index
    %127 = vector.load %arg8[%c0_106, %c129] : memref<32x384xf32, #tpu.memory_space<vmem>>, vector<32x128xf32>
    %cst_107 = arith.constant dense<0.000000e+00> : vector<8x128xf32>
    %128 = tpu.matmul %126, %127, %cst_107 {dimension_numbers = #tpu.dot_dimension_numbers<[1], [0], [0], [1], [0, 0, 1, 1], [], []>} : vector<8x32xf32>, vector<32x128xf32>, vector<8x128xf32> -> vector<8x128xf32>
    %129 = arith.addf %124, %128 : vector<8x128xf32>
    %c22 = arith.constant 22 : index
    %c0_108 = arith.constant 0 : index
    %c0_109 = arith.constant 0 : index
    %130 = vector.load %arg3[%c22, %c0_108, %c0_109] : memref<41x8x32xf32, #tpu.memory_space<vmem>>, vector<1x8x32xf32>
    %131 = vector.shape_cast %130 : vector<1x8x32xf32> to vector<8x32xf32>
    %c0_110 = arith.constant 0 : index
    %c130 = arith.constant 130 : index
    %132 = vector.load %arg8[%c0_110, %c130] : memref<32x384xf32, #tpu.memory_space<vmem>>, vector<32x128xf32>
    %cst_111 = arith.constant dense<0.000000e+00> : vector<8x128xf32>
    %133 = tpu.matmul %131, %132, %cst_111 {dimension_numbers = #tpu.dot_dimension_numbers<[1], [0], [0], [1], [0, 0, 1, 1], [], []>} : vector<8x32xf32>, vector<32x128xf32>, vector<8x128xf32> -> vector<8x128xf32>
    %134 = arith.addf %129, %133 : vector<8x128xf32>
    %c23 = arith.constant 23 : index
    %c0_112 = arith.constant 0 : index
    %c0_113 = arith.constant 0 : index
    %135 = vector.load %arg3[%c23, %c0_112, %c0_113] : memref<41x8x32xf32, #tpu.memory_space<vmem>>, vector<1x8x32xf32>
    %136 = vector.shape_cast %135 : vector<1x8x32xf32> to vector<8x32xf32>
    %c0_114 = arith.constant 0 : index
    %c131 = arith.constant 131 : index
    %137 = vector.load %arg8[%c0_114, %c131] : memref<32x384xf32, #tpu.memory_space<vmem>>, vector<32x128xf32>
    %cst_115 = arith.constant dense<0.000000e+00> : vector<8x128xf32>
    %138 = tpu.matmul %136, %137, %cst_115 {dimension_numbers = #tpu.dot_dimension_numbers<[1], [0], [0], [1], [0, 0, 1, 1], [], []>} : vector<8x32xf32>, vector<32x128xf32>, vector<8x128xf32> -> vector<8x128xf32>
    %139 = arith.addf %134, %138 : vector<8x128xf32>
    %c24 = arith.constant 24 : index
    %c0_116 = arith.constant 0 : index
    %c0_117 = arith.constant 0 : index
    %140 = vector.load %arg3[%c24, %c0_116, %c0_117] : memref<41x8x32xf32, #tpu.memory_space<vmem>>, vector<1x8x32xf32>
    %141 = vector.shape_cast %140 : vector<1x8x32xf32> to vector<8x32xf32>
    %c0_118 = arith.constant 0 : index
    %c132 = arith.constant 132 : index
    %142 = vector.load %arg8[%c0_118, %c132] : memref<32x384xf32, #tpu.memory_space<vmem>>, vector<32x128xf32>
    %cst_119 = arith.constant dense<0.000000e+00> : vector<8x128xf32>
    %143 = tpu.matmul %141, %142, %cst_119 {dimension_numbers = #tpu.dot_dimension_numbers<[1], [0], [0], [1], [0, 0, 1, 1], [], []>} : vector<8x32xf32>, vector<32x128xf32>, vector<8x128xf32> -> vector<8x128xf32>
    %144 = arith.addf %139, %143 : vector<8x128xf32>
    %c25 = arith.constant 25 : index
    %c0_120 = arith.constant 0 : index
    %c0_121 = arith.constant 0 : index
    %145 = vector.load %arg3[%c25, %c0_120, %c0_121] : memref<41x8x32xf32, #tpu.memory_space<vmem>>, vector<1x8x32xf32>
    %146 = vector.shape_cast %145 : vector<1x8x32xf32> to vector<8x32xf32>
    %c0_122 = arith.constant 0 : index
    %c133 = arith.constant 133 : index
    %147 = vector.load %arg8[%c0_122, %c133] : memref<32x384xf32, #tpu.memory_space<vmem>>, vector<32x128xf32>
    %cst_123 = arith.constant dense<0.000000e+00> : vector<8x128xf32>
    %148 = tpu.matmul %146, %147, %cst_123 {dimension_numbers = #tpu.dot_dimension_numbers<[1], [0], [0], [1], [0, 0, 1, 1], [], []>} : vector<8x32xf32>, vector<32x128xf32>, vector<8x128xf32> -> vector<8x128xf32>
    %149 = arith.addf %144, %148 : vector<8x128xf32>
    %c26 = arith.constant 26 : index
    %c0_124 = arith.constant 0 : index
    %c0_125 = arith.constant 0 : index
    %150 = vector.load %arg3[%c26, %c0_124, %c0_125] : memref<41x8x32xf32, #tpu.memory_space<vmem>>, vector<1x8x32xf32>
    %151 = vector.shape_cast %150 : vector<1x8x32xf32> to vector<8x32xf32>
    %c0_126 = arith.constant 0 : index
    %c134 = arith.constant 134 : index
    %152 = vector.load %arg8[%c0_126, %c134] : memref<32x384xf32, #tpu.memory_space<vmem>>, vector<32x128xf32>
    %cst_127 = arith.constant dense<0.000000e+00> : vector<8x128xf32>
    %153 = tpu.matmul %151, %152, %cst_127 {dimension_numbers = #tpu.dot_dimension_numbers<[1], [0], [0], [1], [0, 0, 1, 1], [], []>} : vector<8x32xf32>, vector<32x128xf32>, vector<8x128xf32> -> vector<8x128xf32>
    %154 = arith.addf %149, %153 : vector<8x128xf32>
    %c27 = arith.constant 27 : index
    %c0_128 = arith.constant 0 : index
    %c0_129 = arith.constant 0 : index
    %155 = vector.load %arg3[%c27, %c0_128, %c0_129] : memref<41x8x32xf32, #tpu.memory_space<vmem>>, vector<1x8x32xf32>
    %156 = vector.shape_cast %155 : vector<1x8x32xf32> to vector<8x32xf32>
    %c0_130 = arith.constant 0 : index
    %c135 = arith.constant 135 : index
    %157 = vector.load %arg8[%c0_130, %c135] : memref<32x384xf32, #tpu.memory_space<vmem>>, vector<32x128xf32>
    %cst_131 = arith.constant dense<0.000000e+00> : vector<8x128xf32>
    %158 = tpu.matmul %156, %157, %cst_131 {dimension_numbers = #tpu.dot_dimension_numbers<[1], [0], [0], [1], [0, 0, 1, 1], [], []>} : vector<8x32xf32>, vector<32x128xf32>, vector<8x128xf32> -> vector<8x128xf32>
    %159 = arith.addf %154, %158 : vector<8x128xf32>
    %c28 = arith.constant 28 : index
    %c0_132 = arith.constant 0 : index
    %c0_133 = arith.constant 0 : index
    %160 = vector.load %arg3[%c28, %c0_132, %c0_133] : memref<41x8x32xf32, #tpu.memory_space<vmem>>, vector<1x8x32xf32>
    %161 = vector.shape_cast %160 : vector<1x8x32xf32> to vector<8x32xf32>
    %c0_134 = arith.constant 0 : index
    %c136 = arith.constant 136 : index
    %162 = vector.load %arg8[%c0_134, %c136] : memref<32x384xf32, #tpu.memory_space<vmem>>, vector<32x128xf32>
    %cst_135 = arith.constant dense<0.000000e+00> : vector<8x128xf32>
    %163 = tpu.matmul %161, %162, %cst_135 {dimension_numbers = #tpu.dot_dimension_numbers<[1], [0], [0], [1], [0, 0, 1, 1], [], []>} : vector<8x32xf32>, vector<32x128xf32>, vector<8x128xf32> -> vector<8x128xf32>
    %164 = arith.addf %159, %163 : vector<8x128xf32>
    %c29 = arith.constant 29 : index
    %c0_136 = arith.constant 0 : index
    %c0_137 = arith.constant 0 : index
    %165 = vector.load %arg3[%c29, %c0_136, %c0_137] : memref<41x8x32xf32, #tpu.memory_space<vmem>>, vector<1x8x32xf32>
    %166 = vector.shape_cast %165 : vector<1x8x32xf32> to vector<8x32xf32>
    %c0_138 = arith.constant 0 : index
    %c137 = arith.constant 137 : index
    %167 = vector.load %arg8[%c0_138, %c137] : memref<32x384xf32, #tpu.memory_space<vmem>>, vector<32x128xf32>
    %cst_139 = arith.constant dense<0.000000e+00> : vector<8x128xf32>
    %168 = tpu.matmul %166, %167, %cst_139 {dimension_numbers = #tpu.dot_dimension_numbers<[1], [0], [0], [1], [0, 0, 1, 1], [], []>} : vector<8x32xf32>, vector<32x128xf32>, vector<8x128xf32> -> vector<8x128xf32>
    %169 = arith.addf %164, %168 : vector<8x128xf32>
    %c30 = arith.constant 30 : index
    %c0_140 = arith.constant 0 : index
    %c0_141 = arith.constant 0 : index
    %170 = vector.load %arg3[%c30, %c0_140, %c0_141] : memref<41x8x32xf32, #tpu.memory_space<vmem>>, vector<1x8x32xf32>
    %171 = vector.shape_cast %170 : vector<1x8x32xf32> to vector<8x32xf32>
    %c0_142 = arith.constant 0 : index
    %c138 = arith.constant 138 : index
    %172 = vector.load %arg8[%c0_142, %c138] : memref<32x384xf32, #tpu.memory_space<vmem>>, vector<32x128xf32>
    %cst_143 = arith.constant dense<0.000000e+00> : vector<8x128xf32>
    %173 = tpu.matmul %171, %172, %cst_143 {dimension_numbers = #tpu.dot_dimension_numbers<[1], [0], [0], [1], [0, 0, 1, 1], [], []>} : vector<8x32xf32>, vector<32x128xf32>, vector<8x128xf32> -> vector<8x128xf32>
    %174 = arith.addf %169, %173 : vector<8x128xf32>
    %c31 = arith.constant 31 : index
    %c0_144 = arith.constant 0 : index
    %c0_145 = arith.constant 0 : index
    %175 = vector.load %arg3[%c31, %c0_144, %c0_145] : memref<41x8x32xf32, #tpu.memory_space<vmem>>, vector<1x8x32xf32>
    %176 = vector.shape_cast %175 : vector<1x8x32xf32> to vector<8x32xf32>
    %c0_146 = arith.constant 0 : index
    %c139 = arith.constant 139 : index
    %177 = vector.load %arg8[%c0_146, %c139] : memref<32x384xf32, #tpu.memory_space<vmem>>, vector<32x128xf32>
    %cst_147 = arith.constant dense<0.000000e+00> : vector<8x128xf32>
    %178 = tpu.matmul %176, %177, %cst_147 {dimension_numbers = #tpu.dot_dimension_numbers<[1], [0], [0], [1], [0, 0, 1, 1], [], []>} : vector<8x32xf32>, vector<32x128xf32>, vector<8x128xf32> -> vector<8x128xf32>
    %179 = arith.addf %174, %178 : vector<8x128xf32>
    %c32 = arith.constant 32 : index
    %c0_148 = arith.constant 0 : index
    %c0_149 = arith.constant 0 : index
    %180 = vector.load %arg3[%c32, %c0_148, %c0_149] : memref<41x8x32xf32, #tpu.memory_space<vmem>>, vector<1x8x32xf32>
    %181 = vector.shape_cast %180 : vector<1x8x32xf32> to vector<8x32xf32>
    %c0_150 = arith.constant 0 : index
    %c140 = arith.constant 140 : index
    %182 = vector.load %arg8[%c0_150, %c140] : memref<32x384xf32, #tpu.memory_space<vmem>>, vector<32x128xf32>
    %cst_151 = arith.constant dense<0.000000e+00> : vector<8x128xf32>
    %183 = tpu.matmul %181, %182, %cst_151 {dimension_numbers = #tpu.dot_dimension_numbers<[1], [0], [0], [1], [0, 0, 1, 1], [], []>} : vector<8x32xf32>, vector<32x128xf32>, vector<8x128xf32> -> vector<8x128xf32>
    %184 = arith.addf %179, %183 : vector<8x128xf32>
    %c33 = arith.constant 33 : index
    %c0_152 = arith.constant 0 : index
    %c0_153 = arith.constant 0 : index
    %185 = vector.load %arg3[%c33, %c0_152, %c0_153] : memref<41x8x32xf32, #tpu.memory_space<vmem>>, vector<1x8x32xf32>
    %186 = vector.shape_cast %185 : vector<1x8x32xf32> to vector<8x32xf32>
    %c0_154 = arith.constant 0 : index
    %c141 = arith.constant 141 : index
    %187 = vector.load %arg8[%c0_154, %c141] : memref<32x384xf32, #tpu.memory_space<vmem>>, vector<32x128xf32>
    %cst_155 = arith.constant dense<0.000000e+00> : vector<8x128xf32>
    %188 = tpu.matmul %186, %187, %cst_155 {dimension_numbers = #tpu.dot_dimension_numbers<[1], [0], [0], [1], [0, 0, 1, 1], [], []>} : vector<8x32xf32>, vector<32x128xf32>, vector<8x128xf32> -> vector<8x128xf32>
    %189 = arith.addf %184, %188 : vector<8x128xf32>
    %c34 = arith.constant 34 : index
    %c0_156 = arith.constant 0 : index
    %c0_157 = arith.constant 0 : index
    %190 = vector.load %arg3[%c34, %c0_156, %c0_157] : memref<41x8x32xf32, #tpu.memory_space<vmem>>, vector<1x8x32xf32>
    %191 = vector.shape_cast %190 : vector<1x8x32xf32> to vector<8x32xf32>
    %c0_158 = arith.constant 0 : index
    %c142 = arith.constant 142 : index
    %192 = vector.load %arg8[%c0_158, %c142] : memref<32x384xf32, #tpu.memory_space<vmem>>, vector<32x128xf32>
    %cst_159 = arith.constant dense<0.000000e+00> : vector<8x128xf32>
    %193 = tpu.matmul %191, %192, %cst_159 {dimension_numbers = #tpu.dot_dimension_numbers<[1], [0], [0], [1], [0, 0, 1, 1], [], []>} : vector<8x32xf32>, vector<32x128xf32>, vector<8x128xf32> -> vector<8x128xf32>
    %194 = arith.addf %189, %193 : vector<8x128xf32>
    %c35 = arith.constant 35 : index
    %c0_160 = arith.constant 0 : index
    %c0_161 = arith.constant 0 : index
    %195 = vector.load %arg3[%c35, %c0_160, %c0_161] : memref<41x8x32xf32, #tpu.memory_space<vmem>>, vector<1x8x32xf32>
    %196 = vector.shape_cast %195 : vector<1x8x32xf32> to vector<8x32xf32>
    %c0_162 = arith.constant 0 : index
    %c143 = arith.constant 143 : index
    %197 = vector.load %arg8[%c0_162, %c143] : memref<32x384xf32, #tpu.memory_space<vmem>>, vector<32x128xf32>
    %cst_163 = arith.constant dense<0.000000e+00> : vector<8x128xf32>
    %198 = tpu.matmul %196, %197, %cst_163 {dimension_numbers = #tpu.dot_dimension_numbers<[1], [0], [0], [1], [0, 0, 1, 1], [], []>} : vector<8x32xf32>, vector<32x128xf32>, vector<8x128xf32> -> vector<8x128xf32>
    %199 = arith.addf %194, %198 : vector<8x128xf32>
    %c36 = arith.constant 36 : index
    %c0_164 = arith.constant 0 : index
    %c0_165 = arith.constant 0 : index
    %200 = vector.load %arg3[%c36, %c0_164, %c0_165] : memref<41x8x32xf32, #tpu.memory_space<vmem>>, vector<1x8x32xf32>
    %201 = vector.shape_cast %200 : vector<1x8x32xf32> to vector<8x32xf32>
    %c0_166 = arith.constant 0 : index
    %c144 = arith.constant 144 : index
    %202 = vector.load %arg8[%c0_166, %c144] : memref<32x384xf32, #tpu.memory_space<vmem>>, vector<32x128xf32>
    %cst_167 = arith.constant dense<0.000000e+00> : vector<8x128xf32>
    %203 = tpu.matmul %201, %202, %cst_167 {dimension_numbers = #tpu.dot_dimension_numbers<[1], [0], [0], [1], [0, 0, 1, 1], [], []>} : vector<8x32xf32>, vector<32x128xf32>, vector<8x128xf32> -> vector<8x128xf32>
    %204 = arith.addf %199, %203 : vector<8x128xf32>
    %c37 = arith.constant 37 : index
    %c0_168 = arith.constant 0 : index
    %c0_169 = arith.constant 0 : index
    %205 = vector.load %arg3[%c37, %c0_168, %c0_169] : memref<41x8x32xf32, #tpu.memory_space<vmem>>, vector<1x8x32xf32>
    %206 = vector.shape_cast %205 : vector<1x8x32xf32> to vector<8x32xf32>
    %c0_170 = arith.constant 0 : index
    %c145 = arith.constant 145 : index
    %207 = vector.load %arg8[%c0_170, %c145] : memref<32x384xf32, #tpu.memory_space<vmem>>, vector<32x128xf32>
    %cst_171 = arith.constant dense<0.000000e+00> : vector<8x128xf32>
    %208 = tpu.matmul %206, %207, %cst_171 {dimension_numbers = #tpu.dot_dimension_numbers<[1], [0], [0], [1], [0, 0, 1, 1], [], []>} : vector<8x32xf32>, vector<32x128xf32>, vector<8x128xf32> -> vector<8x128xf32>
    %209 = arith.addf %204, %208 : vector<8x128xf32>
    %c38 = arith.constant 38 : index
    %c0_172 = arith.constant 0 : index
    %c0_173 = arith.constant 0 : index
    %210 = vector.load %arg3[%c38, %c0_172, %c0_173] : memref<41x8x32xf32, #tpu.memory_space<vmem>>, vector<1x8x32xf32>
    %211 = vector.shape_cast %210 : vector<1x8x32xf32> to vector<8x32xf32>
    %c0_174 = arith.constant 0 : index
    %c146 = arith.constant 146 : index
    %212 = vector.load %arg8[%c0_174, %c146] : memref<32x384xf32, #tpu.memory_space<vmem>>, vector<32x128xf32>
    %cst_175 = arith.constant dense<0.000000e+00> : vector<8x128xf32>
    %213 = tpu.matmul %211, %212, %cst_175 {dimension_numbers = #tpu.dot_dimension_numbers<[1], [0], [0], [1], [0, 0, 1, 1], [], []>} : vector<8x32xf32>, vector<32x128xf32>, vector<8x128xf32> -> vector<8x128xf32>
    %214 = arith.addf %209, %213 : vector<8x128xf32>
    %c39 = arith.constant 39 : index
    %c0_176 = arith.constant 0 : index
    %c0_177 = arith.constant 0 : index
    %215 = vector.load %arg3[%c39, %c0_176, %c0_177] : memref<41x8x32xf32, #tpu.memory_space<vmem>>, vector<1x8x32xf32>
    %216 = vector.shape_cast %215 : vector<1x8x32xf32> to vector<8x32xf32>
    %c0_178 = arith.constant 0 : index
    %c147 = arith.constant 147 : index
    %217 = vector.load %arg8[%c0_178, %c147] : memref<32x384xf32, #tpu.memory_space<vmem>>, vector<32x128xf32>
    %cst_179 = arith.constant dense<0.000000e+00> : vector<8x128xf32>
    %218 = tpu.matmul %216, %217, %cst_179 {dimension_numbers = #tpu.dot_dimension_numbers<[1], [0], [0], [1], [0, 0, 1, 1], [], []>} : vector<8x32xf32>, vector<32x128xf32>, vector<8x128xf32> -> vector<8x128xf32>
    %219 = arith.addf %214, %218 : vector<8x128xf32>
    %c40 = arith.constant 40 : index
    %c0_180 = arith.constant 0 : index
    %c0_181 = arith.constant 0 : index
    %220 = vector.load %arg3[%c40, %c0_180, %c0_181] : memref<41x8x32xf32, #tpu.memory_space<vmem>>, vector<1x8x32xf32>
    %221 = vector.shape_cast %220 : vector<1x8x32xf32> to vector<8x32xf32>
    %c0_182 = arith.constant 0 : index
    %c148 = arith.constant 148 : index
    %222 = vector.load %arg8[%c0_182, %c148] : memref<32x384xf32, #tpu.memory_space<vmem>>, vector<32x128xf32>
    %cst_183 = arith.constant dense<0.000000e+00> : vector<8x128xf32>
    %223 = tpu.matmul %221, %222, %cst_183 {dimension_numbers = #tpu.dot_dimension_numbers<[1], [0], [0], [1], [0, 0, 1, 1], [], []>} : vector<8x32xf32>, vector<32x128xf32>, vector<8x128xf32> -> vector<8x128xf32>
    %224 = arith.addf %219, %223 : vector<8x128xf32>
    %cst_184 = arith.constant 0.000000e+00 : f32
    %225 = vector.shape_cast %20 : vector<1x128xi1> to vector<1x128xi1>
    %226 = vector.broadcast %225 : vector<1x128xi1> to vector<8x128xi1>
    %227 = vector.broadcast %cst_184 : f32 to vector<8x128xf32>
    %228 = arith.select %226, %224, %227 : vector<8x128xi1>, vector<8x128xf32>
    %c0_185 = arith.constant 0 : index
    %c128_186 = arith.constant 128 : index
    %229 = vector.load %arg9[%c0_185, %c128_186] : memref<32x384xf32, #tpu.memory_space<vmem>>, vector<8x128xf32>
    tpu.vector_store %arg9[%c0_185, %c128_186], %228 {strides = array<i32>} : memref<32x384xf32, #tpu.memory_space<vmem>>, vector<8x128xf32>,
    %c0_187 = arith.constant 0 : index
    %c0_188 = arith.constant 0 : index
    %c0_189 = arith.constant 0 : index
    %230 = vector.load %arg4[%c0_187, %c0_188, %c0_189] : memref<20x8x8xf32, #tpu.memory_space<vmem>>, vector<1x8x8xf32>
    %231 = vector.shape_cast %230 : vector<1x8x8xf32> to vector<8x8xf32>
    %c0_190 = arith.constant 0 : index
    %c119_191 = arith.constant 119 : index
    %232 = vector.load %arg9[%c0_190, %c119_191] : memref<32x384xf32, #tpu.memory_space<vmem>>, vector<8x128xf32>
    %cst_192 = arith.constant dense<0.000000e+00> : vector<8x128xf32>
    %233 = tpu.matmul %231, %232, %cst_192 {dimension_numbers = #tpu.dot_dimension_numbers<[1], [0], [0], [1], [0, 0, 1, 1], [], []>} : vector<8x8xf32>, vector<8x128xf32>, vector<8x128xf32> -> vector<8x128xf32>
    %c1_193 = arith.constant 1 : index
    %c0_194 = arith.constant 0 : index
    %c0_195 = arith.constant 0 : index
    %234 = vector.load %arg4[%c1_193, %c0_194, %c0_195] : memref<20x8x8xf32, #tpu.memory_space<vmem>>, vector<1x8x8xf32>
    %235 = vector.shape_cast %234 : vector<1x8x8xf32> to vector<8x8xf32>
    %c0_196 = arith.constant 0 : index
    %c120_197 = arith.constant 120 : index
    %236 = vector.load %arg9[%c0_196, %c120_197] : memref<32x384xf32, #tpu.memory_space<vmem>>, vector<8x128xf32>
    %cst_198 = arith.constant dense<0.000000e+00> : vector<8x128xf32>
    %237 = tpu.matmul %235, %236, %cst_198 {dimension_numbers = #tpu.dot_dimension_numbers<[1], [0], [0], [1], [0, 0, 1, 1], [], []>} : vector<8x8xf32>, vector<8x128xf32>, vector<8x128xf32> -> vector<8x128xf32>
    %238 = arith.addf %233, %237 : vector<8x128xf32>
    %c2_199 = arith.constant 2 : index
    %c0_200 = arith.constant 0 : index
    %c0_201 = arith.constant 0 : index
    %239 = vector.load %arg4[%c2_199, %c0_200, %c0_201] : memref<20x8x8xf32, #tpu.memory_space<vmem>>, vector<1x8x8xf32>
    %240 = vector.shape_cast %239 : vector<1x8x8xf32> to vector<8x8xf32>
    %c0_202 = arith.constant 0 : index
    %c121_203 = arith.constant 121 : index
    %241 = vector.load %arg9[%c0_202, %c121_203] : memref<32x384xf32, #tpu.memory_space<vmem>>, vector<8x128xf32>
    %cst_204 = arith.constant dense<0.000000e+00> : vector<8x128xf32>
    %242 = tpu.matmul %240, %241, %cst_204 {dimension_numbers = #tpu.dot_dimension_numbers<[1], [0], [0], [1], [0, 0, 1, 1], [], []>} : vector<8x8xf32>, vector<8x128xf32>, vector<8x128xf32> -> vector<8x128xf32>
    %243 = arith.addf %238, %242 : vector<8x128xf32>
    %c3_205 = arith.constant 3 : index
    %c0_206 = arith.constant 0 : index
    %c0_207 = arith.constant 0 : index
    %244 = vector.load %arg4[%c3_205, %c0_206, %c0_207] : memref<20x8x8xf32, #tpu.memory_space<vmem>>, vector<1x8x8xf32>
    %245 = vector.shape_cast %244 : vector<1x8x8xf32> to vector<8x8xf32>
    %c0_208 = arith.constant 0 : index
    %c122_209 = arith.constant 122 : index
    %246 = vector.load %arg9[%c0_208, %c122_209] : memref<32x384xf32, #tpu.memory_space<vmem>>, vector<8x128xf32>
    %cst_210 = arith.constant dense<0.000000e+00> : vector<8x128xf32>
    %247 = tpu.matmul %245, %246, %cst_210 {dimension_numbers = #tpu.dot_dimension_numbers<[1], [0], [0], [1], [0, 0, 1, 1], [], []>} : vector<8x8xf32>, vector<8x128xf32>, vector<8x128xf32> -> vector<8x128xf32>
    %248 = arith.addf %243, %247 : vector<8x128xf32>
    %c4_211 = arith.constant 4 : index
    %c0_212 = arith.constant 0 : index
    %c0_213 = arith.constant 0 : index
    %249 = vector.load %arg4[%c4_211, %c0_212, %c0_213] : memref<20x8x8xf32, #tpu.memory_space<vmem>>, vector<1x8x8xf32>
    %250 = vector.shape_cast %249 : vector<1x8x8xf32> to vector<8x8xf32>
    %c0_214 = arith.constant 0 : index
    %c123_215 = arith.constant 123 : index
    %251 = vector.load %arg9[%c0_214, %c123_215] : memref<32x384xf32, #tpu.memory_space<vmem>>, vector<8x128xf32>
    %cst_216 = arith.constant dense<0.000000e+00> : vector<8x128xf32>
    %252 = tpu.matmul %250, %251, %cst_216 {dimension_numbers = #tpu.dot_dimension_numbers<[1], [0], [0], [1], [0, 0, 1, 1], [], []>} : vector<8x8xf32>, vector<8x128xf32>, vector<8x128xf32> -> vector<8x128xf32>
    %253 = arith.addf %248, %252 : vector<8x128xf32>
    %c5_217 = arith.constant 5 : index
    %c0_218 = arith.constant 0 : index
    %c0_219 = arith.constant 0 : index
    %254 = vector.load %arg4[%c5_217, %c0_218, %c0_219] : memref<20x8x8xf32, #tpu.memory_space<vmem>>, vector<1x8x8xf32>
    %255 = vector.shape_cast %254 : vector<1x8x8xf32> to vector<8x8xf32>
    %c0_220 = arith.constant 0 : index
    %c124_221 = arith.constant 124 : index
    %256 = vector.load %arg9[%c0_220, %c124_221] : memref<32x384xf32, #tpu.memory_space<vmem>>, vector<8x128xf32>
    %cst_222 = arith.constant dense<0.000000e+00> : vector<8x128xf32>
    %257 = tpu.matmul %255, %256, %cst_222 {dimension_numbers = #tpu.dot_dimension_numbers<[1], [0], [0], [1], [0, 0, 1, 1], [], []>} : vector<8x8xf32>, vector<8x128xf32>, vector<8x128xf32> -> vector<8x128xf32>
    %258 = arith.addf %253, %257 : vector<8x128xf32>
    %c6_223 = arith.constant 6 : index
    %c0_224 = arith.constant 0 : index
    %c0_225 = arith.constant 0 : index
    %259 = vector.load %arg4[%c6_223, %c0_224, %c0_225] : memref<20x8x8xf32, #tpu.memory_space<vmem>>, vector<1x8x8xf32>
    %260 = vector.shape_cast %259 : vector<1x8x8xf32> to vector<8x8xf32>
    %c0_226 = arith.constant 0 : index
    %c125_227 = arith.constant 125 : index
    %261 = vector.load %arg9[%c0_226, %c125_227] : memref<32x384xf32, #tpu.memory_space<vmem>>, vector<8x128xf32>
    %cst_228 = arith.constant dense<0.000000e+00> : vector<8x128xf32>
    %262 = tpu.matmul %260, %261, %cst_228 {dimension_numbers = #tpu.dot_dimension_numbers<[1], [0], [0], [1], [0, 0, 1, 1], [], []>} : vector<8x8xf32>, vector<8x128xf32>, vector<8x128xf32> -> vector<8x128xf32>
    %263 = arith.addf %258, %262 : vector<8x128xf32>
    %c7_229 = arith.constant 7 : index
    %c0_230 = arith.constant 0 : index
    %c0_231 = arith.constant 0 : index
    %264 = vector.load %arg4[%c7_229, %c0_230, %c0_231] : memref<20x8x8xf32, #tpu.memory_space<vmem>>, vector<1x8x8xf32>
    %265 = vector.shape_cast %264 : vector<1x8x8xf32> to vector<8x8xf32>
    %c0_232 = arith.constant 0 : index
    %c126_233 = arith.constant 126 : index
    %266 = vector.load %arg9[%c0_232, %c126_233] : memref<32x384xf32, #tpu.memory_space<vmem>>, vector<8x128xf32>
    %cst_234 = arith.constant dense<0.000000e+00> : vector<8x128xf32>
    %267 = tpu.matmul %265, %266, %cst_234 {dimension_numbers = #tpu.dot_dimension_numbers<[1], [0], [0], [1], [0, 0, 1, 1], [], []>} : vector<8x8xf32>, vector<8x128xf32>, vector<8x128xf32> -> vector<8x128xf32>
    %268 = arith.addf %263, %267 : vector<8x128xf32>
    %c8_235 = arith.constant 8 : index
    %c0_236 = arith.constant 0 : index
    %c0_237 = arith.constant 0 : index
    %269 = vector.load %arg4[%c8_235, %c0_236, %c0_237] : memref<20x8x8xf32, #tpu.memory_space<vmem>>, vector<1x8x8xf32>
    %270 = vector.shape_cast %269 : vector<1x8x8xf32> to vector<8x8xf32>
    %c0_238 = arith.constant 0 : index
    %c127_239 = arith.constant 127 : index
    %271 = vector.load %arg9[%c0_238, %c127_239] : memref<32x384xf32, #tpu.memory_space<vmem>>, vector<8x128xf32>
    %cst_240 = arith.constant dense<0.000000e+00> : vector<8x128xf32>
    %272 = tpu.matmul %270, %271, %cst_240 {dimension_numbers = #tpu.dot_dimension_numbers<[1], [0], [0], [1], [0, 0, 1, 1], [], []>} : vector<8x8xf32>, vector<8x128xf32>, vector<8x128xf32> -> vector<8x128xf32>
    %273 = arith.addf %268, %272 : vector<8x128xf32>
    %c9_241 = arith.constant 9 : index
    %c0_242 = arith.constant 0 : index
    %c0_243 = arith.constant 0 : index
    %274 = vector.load %arg4[%c9_241, %c0_242, %c0_243] : memref<20x8x8xf32, #tpu.memory_space<vmem>>, vector<1x8x8xf32>
    %275 = vector.shape_cast %274 : vector<1x8x8xf32> to vector<8x8xf32>
    %c0_244 = arith.constant 0 : index
    %c128_245 = arith.constant 128 : index
    %276 = vector.load %arg9[%c0_244, %c128_245] : memref<32x384xf32, #tpu.memory_space<vmem>>, vector<8x128xf32>
    %cst_246 = arith.constant dense<0.000000e+00> : vector<8x128xf32>
    %277 = tpu.matmul %275, %276, %cst_246 {dimension_numbers = #tpu.dot_dimension_numbers<[1], [0], [0], [1], [0, 0, 1, 1], [], []>} : vector<8x8xf32>, vector<8x128xf32>, vector<8x128xf32> -> vector<8x128xf32>
    %278 = arith.addf %273, %277 : vector<8x128xf32>
    %c10_247 = arith.constant 10 : index
    %c0_248 = arith.constant 0 : index
    %c0_249 = arith.constant 0 : index
    %279 = vector.load %arg4[%c10_247, %c0_248, %c0_249] : memref<20x8x8xf32, #tpu.memory_space<vmem>>, vector<1x8x8xf32>
    %280 = vector.shape_cast %279 : vector<1x8x8xf32> to vector<8x8xf32>
    %c0_250 = arith.constant 0 : index
    %c129_251 = arith.constant 129 : index
    %281 = vector.load %arg9[%c0_250, %c129_251] : memref<32x384xf32, #tpu.memory_space<vmem>>, vector<8x128xf32>
    %cst_252 = arith.constant dense<0.000000e+00> : vector<8x128xf32>
    %282 = tpu.matmul %280, %281, %cst_252 {dimension_numbers = #tpu.dot_dimension_numbers<[1], [0], [0], [1], [0, 0, 1, 1], [], []>} : vector<8x8xf32>, vector<8x128xf32>, vector<8x128xf32> -> vector<8x128xf32>
    %283 = arith.addf %278, %282 : vector<8x128xf32>
    %c11_253 = arith.constant 11 : index
    %c0_254 = arith.constant 0 : index
    %c0_255 = arith.constant 0 : index
    %284 = vector.load %arg4[%c11_253, %c0_254, %c0_255] : memref<20x8x8xf32, #tpu.memory_space<vmem>>, vector<1x8x8xf32>
    %285 = vector.shape_cast %284 : vector<1x8x8xf32> to vector<8x8xf32>
    %c0_256 = arith.constant 0 : index
    %c130_257 = arith.constant 130 : index
    %286 = vector.load %arg9[%c0_256, %c130_257] : memref<32x384xf32, #tpu.memory_space<vmem>>, vector<8x128xf32>
    %cst_258 = arith.constant dense<0.000000e+00> : vector<8x128xf32>
    %287 = tpu.matmul %285, %286, %cst_258 {dimension_numbers = #tpu.dot_dimension_numbers<[1], [0], [0], [1], [0, 0, 1, 1], [], []>} : vector<8x8xf32>, vector<8x128xf32>, vector<8x128xf32> -> vector<8x128xf32>
    %288 = arith.addf %283, %287 : vector<8x128xf32>
    %c12_259 = arith.constant 12 : index
    %c0_260 = arith.constant 0 : index
    %c0_261 = arith.constant 0 : index
    %289 = vector.load %arg4[%c12_259, %c0_260, %c0_261] : memref<20x8x8xf32, #tpu.memory_space<vmem>>, vector<1x8x8xf32>
    %290 = vector.shape_cast %289 : vector<1x8x8xf32> to vector<8x8xf32>
    %c0_262 = arith.constant 0 : index
    %c131_263 = arith.constant 131 : index
    %291 = vector.load %arg9[%c0_262, %c131_263] : memref<32x384xf32, #tpu.memory_space<vmem>>, vector<8x128xf32>
    %cst_264 = arith.constant dense<0.000000e+00> : vector<8x128xf32>
    %292 = tpu.matmul %290, %291, %cst_264 {dimension_numbers = #tpu.dot_dimension_numbers<[1], [0], [0], [1], [0, 0, 1, 1], [], []>} : vector<8x8xf32>, vector<8x128xf32>, vector<8x128xf32> -> vector<8x128xf32>
    %293 = arith.addf %288, %292 : vector<8x128xf32>
    %c13_265 = arith.constant 13 : index
    %c0_266 = arith.constant 0 : index
    %c0_267 = arith.constant 0 : index
    %294 = vector.load %arg4[%c13_265, %c0_266, %c0_267] : memref<20x8x8xf32, #tpu.memory_space<vmem>>, vector<1x8x8xf32>
    %295 = vector.shape_cast %294 : vector<1x8x8xf32> to vector<8x8xf32>
    %c0_268 = arith.constant 0 : index
    %c132_269 = arith.constant 132 : index
    %296 = vector.load %arg9[%c0_268, %c132_269] : memref<32x384xf32, #tpu.memory_space<vmem>>, vector<8x128xf32>
    %cst_270 = arith.constant dense<0.000000e+00> : vector<8x128xf32>
    %297 = tpu.matmul %295, %296, %cst_270 {dimension_numbers = #tpu.dot_dimension_numbers<[1], [0], [0], [1], [0, 0, 1, 1], [], []>} : vector<8x8xf32>, vector<8x128xf32>, vector<8x128xf32> -> vector<8x128xf32>
    %298 = arith.addf %293, %297 : vector<8x128xf32>
    %c14_271 = arith.constant 14 : index
    %c0_272 = arith.constant 0 : index
    %c0_273 = arith.constant 0 : index
    %299 = vector.load %arg4[%c14_271, %c0_272, %c0_273] : memref<20x8x8xf32, #tpu.memory_space<vmem>>, vector<1x8x8xf32>
    %300 = vector.shape_cast %299 : vector<1x8x8xf32> to vector<8x8xf32>
    %c0_274 = arith.constant 0 : index
    %c133_275 = arith.constant 133 : index
    %301 = vector.load %arg9[%c0_274, %c133_275] : memref<32x384xf32, #tpu.memory_space<vmem>>, vector<8x128xf32>
    %cst_276 = arith.constant dense<0.000000e+00> : vector<8x128xf32>
    %302 = tpu.matmul %300, %301, %cst_276 {dimension_numbers = #tpu.dot_dimension_numbers<[1], [0], [0], [1], [0, 0, 1, 1], [], []>} : vector<8x8xf32>, vector<8x128xf32>, vector<8x128xf32> -> vector<8x128xf32>
    %303 = arith.addf %298, %302 : vector<8x128xf32>
    %c15_277 = arith.constant 15 : index
    %c0_278 = arith.constant 0 : index
    %c0_279 = arith.constant 0 : index
    %304 = vector.load %arg4[%c15_277, %c0_278, %c0_279] : memref<20x8x8xf32, #tpu.memory_space<vmem>>, vector<1x8x8xf32>
    %305 = vector.shape_cast %304 : vector<1x8x8xf32> to vector<8x8xf32>
    %c0_280 = arith.constant 0 : index
    %c134_281 = arith.constant 134 : index
    %306 = vector.load %arg9[%c0_280, %c134_281] : memref<32x384xf32, #tpu.memory_space<vmem>>, vector<8x128xf32>
    %cst_282 = arith.constant dense<0.000000e+00> : vector<8x128xf32>
    %307 = tpu.matmul %305, %306, %cst_282 {dimension_numbers = #tpu.dot_dimension_numbers<[1], [0], [0], [1], [0, 0, 1, 1], [], []>} : vector<8x8xf32>, vector<8x128xf32>, vector<8x128xf32> -> vector<8x128xf32>
    %308 = arith.addf %303, %307 : vector<8x128xf32>
    %c16_283 = arith.constant 16 : index
    %c0_284 = arith.constant 0 : index
    %c0_285 = arith.constant 0 : index
    %309 = vector.load %arg4[%c16_283, %c0_284, %c0_285] : memref<20x8x8xf32, #tpu.memory_space<vmem>>, vector<1x8x8xf32>
    %310 = vector.shape_cast %309 : vector<1x8x8xf32> to vector<8x8xf32>
    %c0_286 = arith.constant 0 : index
    %c135_287 = arith.constant 135 : index
    %311 = vector.load %arg9[%c0_286, %c135_287] : memref<32x384xf32, #tpu.memory_space<vmem>>, vector<8x128xf32>
    %cst_288 = arith.constant dense<0.000000e+00> : vector<8x128xf32>
    %312 = tpu.matmul %310, %311, %cst_288 {dimension_numbers = #tpu.dot_dimension_numbers<[1], [0], [0], [1], [0, 0, 1, 1], [], []>} : vector<8x8xf32>, vector<8x128xf32>, vector<8x128xf32> -> vector<8x128xf32>
    %313 = arith.addf %308, %312 : vector<8x128xf32>
    %c17_289 = arith.constant 17 : index
    %c0_290 = arith.constant 0 : index
    %c0_291 = arith.constant 0 : index
    %314 = vector.load %arg4[%c17_289, %c0_290, %c0_291] : memref<20x8x8xf32, #tpu.memory_space<vmem>>, vector<1x8x8xf32>
    %315 = vector.shape_cast %314 : vector<1x8x8xf32> to vector<8x8xf32>
    %c0_292 = arith.constant 0 : index
    %c136_293 = arith.constant 136 : index
    %316 = vector.load %arg9[%c0_292, %c136_293] : memref<32x384xf32, #tpu.memory_space<vmem>>, vector<8x128xf32>
    %cst_294 = arith.constant dense<0.000000e+00> : vector<8x128xf32>
    %317 = tpu.matmul %315, %316, %cst_294 {dimension_numbers = #tpu.dot_dimension_numbers<[1], [0], [0], [1], [0, 0, 1, 1], [], []>} : vector<8x8xf32>, vector<8x128xf32>, vector<8x128xf32> -> vector<8x128xf32>
    %318 = arith.addf %313, %317 : vector<8x128xf32>
    %c18_295 = arith.constant 18 : index
    %c0_296 = arith.constant 0 : index
    %c0_297 = arith.constant 0 : index
    %319 = vector.load %arg4[%c18_295, %c0_296, %c0_297] : memref<20x8x8xf32, #tpu.memory_space<vmem>>, vector<1x8x8xf32>
    %320 = vector.shape_cast %319 : vector<1x8x8xf32> to vector<8x8xf32>
    %c0_298 = arith.constant 0 : index
    %c137_299 = arith.constant 137 : index
    %321 = vector.load %arg9[%c0_298, %c137_299] : memref<32x384xf32, #tpu.memory_space<vmem>>, vector<8x128xf32>
    %cst_300 = arith.constant dense<0.000000e+00> : vector<8x128xf32>
    %322 = tpu.matmul %320, %321, %cst_300 {dimension_numbers = #tpu.dot_dimension_numbers<[1], [0], [0], [1], [0, 0, 1, 1], [], []>} : vector<8x8xf32>, vector<8x128xf32>, vector<8x128xf32> -> vector<8x128xf32>
    %323 = arith.addf %318, %322 : vector<8x128xf32>
    %c19_301 = arith.constant 19 : index
    %c0_302 = arith.constant 0 : index
    %c0_303 = arith.constant 0 : index
    %324 = vector.load %arg4[%c19_301, %c0_302, %c0_303] : memref<20x8x8xf32, #tpu.memory_space<vmem>>, vector<1x8x8xf32>
    %325 = vector.shape_cast %324 : vector<1x8x8xf32> to vector<8x8xf32>
    %c0_304 = arith.constant 0 : index
    %c138_305 = arith.constant 138 : index
    %326 = vector.load %arg9[%c0_304, %c138_305] : memref<32x384xf32, #tpu.memory_space<vmem>>, vector<8x128xf32>
    %cst_306 = arith.constant dense<0.000000e+00> : vector<8x128xf32>
    %327 = tpu.matmul %325, %326, %cst_306 {dimension_numbers = #tpu.dot_dimension_numbers<[1], [0], [0], [1], [0, 0, 1, 1], [], []>} : vector<8x8xf32>, vector<8x128xf32>, vector<8x128xf32> -> vector<8x128xf32>
    %328 = arith.addf %323, %327 : vector<8x128xf32>
    %cst_307 = arith.constant 0.000000e+00 : f32
    %329 = vector.shape_cast %20 : vector<1x128xi1> to vector<1x128xi1>
    %330 = vector.broadcast %329 : vector<1x128xi1> to vector<8x128xi1>
    %331 = vector.broadcast %cst_307 : f32 to vector<8x128xf32>
    %332 = arith.select %330, %328, %331 : vector<8x128xi1>, vector<8x128xf32>
    %c0_308 = arith.constant 0 : index
    %c128_309 = arith.constant 128 : index
    %333 = vector.load %arg8[%c0_308, %c128_309] : memref<32x384xf32, #tpu.memory_space<vmem>>, vector<8x128xf32>
    tpu.vector_store %arg8[%c0_308, %c128_309], %332 {strides = array<i32>} : memref<32x384xf32, #tpu.memory_space<vmem>>, vector<8x128xf32>,
    %c0_310 = arith.constant 0 : index
    %c0_311 = arith.constant 0 : index
    %c0_312 = arith.constant 0 : index
    %334 = vector.load %arg5[%c0_310, %c0_311, %c0_312] : memref<10x8x8xf32, #tpu.memory_space<vmem>>, vector<1x8x8xf32>
    %335 = vector.shape_cast %334 : vector<1x8x8xf32> to vector<8x8xf32>
    %c0_313 = arith.constant 0 : index
    %c124_314 = arith.constant 124 : index
    %336 = vector.load %arg8[%c0_313, %c124_314] : memref<32x384xf32, #tpu.memory_space<vmem>>, vector<8x128xf32>
    %cst_315 = arith.constant dense<0.000000e+00> : vector<8x128xf32>
    %337 = tpu.matmul %335, %336, %cst_315 {dimension_numbers = #tpu.dot_dimension_numbers<[1], [0], [0], [1], [0, 0, 1, 1], [], []>} : vector<8x8xf32>, vector<8x128xf32>, vector<8x128xf32> -> vector<8x128xf32>
    %c1_316 = arith.constant 1 : index
    %c0_317 = arith.constant 0 : index
    %c0_318 = arith.constant 0 : index
    %338 = vector.load %arg5[%c1_316, %c0_317, %c0_318] : memref<10x8x8xf32, #tpu.memory_space<vmem>>, vector<1x8x8xf32>
    %339 = vector.shape_cast %338 : vector<1x8x8xf32> to vector<8x8xf32>
    %c0_319 = arith.constant 0 : index
    %c125_320 = arith.constant 125 : index
    %340 = vector.load %arg8[%c0_319, %c125_320] : memref<32x384xf32, #tpu.memory_space<vmem>>, vector<8x128xf32>
    %cst_321 = arith.constant dense<0.000000e+00> : vector<8x128xf32>
    %341 = tpu.matmul %339, %340, %cst_321 {dimension_numbers = #tpu.dot_dimension_numbers<[1], [0], [0], [1], [0, 0, 1, 1], [], []>} : vector<8x8xf32>, vector<8x128xf32>, vector<8x128xf32> -> vector<8x128xf32>
    %342 = arith.addf %337, %341 : vector<8x128xf32>
    %c2_322 = arith.constant 2 : index
    %c0_323 = arith.constant 0 : index
    %c0_324 = arith.constant 0 : index
    %343 = vector.load %arg5[%c2_322, %c0_323, %c0_324] : memref<10x8x8xf32, #tpu.memory_space<vmem>>, vector<1x8x8xf32>
    %344 = vector.shape_cast %343 : vector<1x8x8xf32> to vector<8x8xf32>
    %c0_325 = arith.constant 0 : index
    %c126_326 = arith.constant 126 : index
    %345 = vector.load %arg8[%c0_325, %c126_326] : memref<32x384xf32, #tpu.memory_space<vmem>>, vector<8x128xf32>
    %cst_327 = arith.constant dense<0.000000e+00> : vector<8x128xf32>
    %346 = tpu.matmul %344, %345, %cst_327 {dimension_numbers = #tpu.dot_dimension_numbers<[1], [0], [0], [1], [0, 0, 1, 1], [], []>} : vector<8x8xf32>, vector<8x128xf32>, vector<8x128xf32> -> vector<8x128xf32>
    %347 = arith.addf %342, %346 : vector<8x128xf32>
    %c3_328 = arith.constant 3 : index
    %c0_329 = arith.constant 0 : index
    %c0_330 = arith.constant 0 : index
    %348 = vector.load %arg5[%c3_328, %c0_329, %c0_330] : memref<10x8x8xf32, #tpu.memory_space<vmem>>, vector<1x8x8xf32>
    %349 = vector.shape_cast %348 : vector<1x8x8xf32> to vector<8x8xf32>
    %c0_331 = arith.constant 0 : index
    %c127_332 = arith.constant 127 : index
    %350 = vector.load %arg8[%c0_331, %c127_332] : memref<32x384xf32, #tpu.memory_space<vmem>>, vector<8x128xf32>
    %cst_333 = arith.constant dense<0.000000e+00> : vector<8x128xf32>
    %351 = tpu.matmul %349, %350, %cst_333 {dimension_numbers = #tpu.dot_dimension_numbers<[1], [0], [0], [1], [0, 0, 1, 1], [], []>} : vector<8x8xf32>, vector<8x128xf32>, vector<8x128xf32> -> vector<8x128xf32>
    %352 = arith.addf %347, %351 : vector<8x128xf32>
    %c4_334 = arith.constant 4 : index
    %c0_335 = arith.constant 0 : index
    %c0_336 = arith.constant 0 : index
    %353 = vector.load %arg5[%c4_334, %c0_335, %c0_336] : memref<10x8x8xf32, #tpu.memory_space<vmem>>, vector<1x8x8xf32>
    %354 = vector.shape_cast %353 : vector<1x8x8xf32> to vector<8x8xf32>
    %c0_337 = arith.constant 0 : index
    %c128_338 = arith.constant 128 : index
    %355 = vector.load %arg8[%c0_337, %c128_338] : memref<32x384xf32, #tpu.memory_space<vmem>>, vector<8x128xf32>
    %cst_339 = arith.constant dense<0.000000e+00> : vector<8x128xf32>
    %356 = tpu.matmul %354, %355, %cst_339 {dimension_numbers = #tpu.dot_dimension_numbers<[1], [0], [0], [1], [0, 0, 1, 1], [], []>} : vector<8x8xf32>, vector<8x128xf32>, vector<8x128xf32> -> vector<8x128xf32>
    %357 = arith.addf %352, %356 : vector<8x128xf32>
    %c5_340 = arith.constant 5 : index
    %c0_341 = arith.constant 0 : index
    %c0_342 = arith.constant 0 : index
    %358 = vector.load %arg5[%c5_340, %c0_341, %c0_342] : memref<10x8x8xf32, #tpu.memory_space<vmem>>, vector<1x8x8xf32>
    %359 = vector.shape_cast %358 : vector<1x8x8xf32> to vector<8x8xf32>
    %c0_343 = arith.constant 0 : index
    %c129_344 = arith.constant 129 : index
    %360 = vector.load %arg8[%c0_343, %c129_344] : memref<32x384xf32, #tpu.memory_space<vmem>>, vector<8x128xf32>
    %cst_345 = arith.constant dense<0.000000e+00> : vector<8x128xf32>
    %361 = tpu.matmul %359, %360, %cst_345 {dimension_numbers = #tpu.dot_dimension_numbers<[1], [0], [0], [1], [0, 0, 1, 1], [], []>} : vector<8x8xf32>, vector<8x128xf32>, vector<8x128xf32> -> vector<8x128xf32>
    %362 = arith.addf %357, %361 : vector<8x128xf32>
    %c6_346 = arith.constant 6 : index
    %c0_347 = arith.constant 0 : index
    %c0_348 = arith.constant 0 : index
    %363 = vector.load %arg5[%c6_346, %c0_347, %c0_348] : memref<10x8x8xf32, #tpu.memory_space<vmem>>, vector<1x8x8xf32>
    %364 = vector.shape_cast %363 : vector<1x8x8xf32> to vector<8x8xf32>
    %c0_349 = arith.constant 0 : index
    %c130_350 = arith.constant 130 : index
    %365 = vector.load %arg8[%c0_349, %c130_350] : memref<32x384xf32, #tpu.memory_space<vmem>>, vector<8x128xf32>
    %cst_351 = arith.constant dense<0.000000e+00> : vector<8x128xf32>
    %366 = tpu.matmul %364, %365, %cst_351 {dimension_numbers = #tpu.dot_dimension_numbers<[1], [0], [0], [1], [0, 0, 1, 1], [], []>} : vector<8x8xf32>, vector<8x128xf32>, vector<8x128xf32> -> vector<8x128xf32>
    %367 = arith.addf %362, %366 : vector<8x128xf32>
    %c7_352 = arith.constant 7 : index
    %c0_353 = arith.constant 0 : index
    %c0_354 = arith.constant 0 : index
    %368 = vector.load %arg5[%c7_352, %c0_353, %c0_354] : memref<10x8x8xf32, #tpu.memory_space<vmem>>, vector<1x8x8xf32>
    %369 = vector.shape_cast %368 : vector<1x8x8xf32> to vector<8x8xf32>
    %c0_355 = arith.constant 0 : index
    %c131_356 = arith.constant 131 : index
    %370 = vector.load %arg8[%c0_355, %c131_356] : memref<32x384xf32, #tpu.memory_space<vmem>>, vector<8x128xf32>
    %cst_357 = arith.constant dense<0.000000e+00> : vector<8x128xf32>
    %371 = tpu.matmul %369, %370, %cst_357 {dimension_numbers = #tpu.dot_dimension_numbers<[1], [0], [0], [1], [0, 0, 1, 1], [], []>} : vector<8x8xf32>, vector<8x128xf32>, vector<8x128xf32> -> vector<8x128xf32>
    %372 = arith.addf %367, %371 : vector<8x128xf32>
    %c8_358 = arith.constant 8 : index
    %c0_359 = arith.constant 0 : index
    %c0_360 = arith.constant 0 : index
    %373 = vector.load %arg5[%c8_358, %c0_359, %c0_360] : memref<10x8x8xf32, #tpu.memory_space<vmem>>, vector<1x8x8xf32>
    %374 = vector.shape_cast %373 : vector<1x8x8xf32> to vector<8x8xf32>
    %c0_361 = arith.constant 0 : index
    %c132_362 = arith.constant 132 : index
    %375 = vector.load %arg8[%c0_361, %c132_362] : memref<32x384xf32, #tpu.memory_space<vmem>>, vector<8x128xf32>
    %cst_363 = arith.constant dense<0.000000e+00> : vector<8x128xf32>
    %376 = tpu.matmul %374, %375, %cst_363 {dimension_numbers = #tpu.dot_dimension_numbers<[1], [0], [0], [1], [0, 0, 1, 1], [], []>} : vector<8x8xf32>, vector<8x128xf32>, vector<8x128xf32> -> vector<8x128xf32>
    %377 = arith.addf %372, %376 : vector<8x128xf32>
    %c9_364 = arith.constant 9 : index
    %c0_365 = arith.constant 0 : index
    %c0_366 = arith.constant 0 : index
    %378 = vector.load %arg5[%c9_364, %c0_365, %c0_366] : memref<10x8x8xf32, #tpu.memory_space<vmem>>, vector<1x8x8xf32>
    %379 = vector.shape_cast %378 : vector<1x8x8xf32> to vector<8x8xf32>
    %c0_367 = arith.constant 0 : index
    %c133_368 = arith.constant 133 : index
    %380 = vector.load %arg8[%c0_367, %c133_368] : memref<32x384xf32, #tpu.memory_space<vmem>>, vector<8x128xf32>
    %cst_369 = arith.constant dense<0.000000e+00> : vector<8x128xf32>
    %381 = tpu.matmul %379, %380, %cst_369 {dimension_numbers = #tpu.dot_dimension_numbers<[1], [0], [0], [1], [0, 0, 1, 1], [], []>} : vector<8x8xf32>, vector<8x128xf32>, vector<8x128xf32> -> vector<8x128xf32>
    %382 = arith.addf %377, %381 : vector<8x128xf32>
    %c0_370 = arith.constant 0 : index
    %c0_371 = arith.constant 0 : index
    %383 = vector.load %arg10[%c0_370, %c0_371] : memref<8x128xf32, #tpu.memory_space<vmem>>, vector<8x128xf32>
    %384 = arith.addf %382, %383 : vector<8x128xf32>
    %c0_372 = arith.constant 0 : index
    %c0_373 = arith.constant 0 : index
    %c0_374 = arith.constant 0 : index
    %385 = vector.load %arg7[%c0_372, %c0_373, %c0_374] : memref<1x8x128xf32, #tpu.memory_space<vmem>>, vector<1x8x128xf32>
    %386 = vector.shape_cast %385 : vector<1x8x128xf32> to vector<8x128xf32>
    %387 = vector.shape_cast %384 : vector<8x128xf32> to vector<1x8x128xf32>
    tpu.vector_store %arg7[%c0_372, %c0_373, %c0_374], %387 {strides = array<i32>} : memref<1x8x128xf32, #tpu.memory_space<vmem>>, vector<1x8x128xf32>,
    return
  }
  func.func @transform_0(%arg0: i32) -> (i32, i32, i32) {
    %c0_i32 = arith.constant 0 : i32
    %c0_i32_0 = arith.constant 0 : i32
    %c0_i32_1 = arith.constant 0 : i32
    return %arg0, %c0_i32, %c0_i32_0 : i32, i32, i32
  }
  func.func @transform_1(%arg0: i32) -> (i32, i32) {
    %c0_i32 = arith.constant 0 : i32
    %c0_i32_0 = arith.constant 0 : i32
    %c0_i32_1 = arith.constant 0 : i32
    return %c0_i32, %c0_i32_0 : i32, i32
  }
  func.func @transform_2(%arg0: i32) -> (i32, i32, i32) {
    %c0_i32 = arith.constant 0 : i32
    %c0_i32_0 = arith.constant 0 : i32
    %c0_i32_1 = arith.constant 0 : i32
    %c0_i32_2 = arith.constant 0 : i32
    return %c0_i32, %c0_i32_0, %c0_i32_1 : i32, i32, i32
  }
  func.func @transform_3(%arg0: i32) -> (i32, i32, i32) {
    %c0_i32 = arith.constant 0 : i32
    %c0_i32_0 = arith.constant 0 : i32
    %c0_i32_1 = arith.constant 0 : i32
    %c0_i32_2 = arith.constant 0 : i32
    return %c0_i32, %c0_i32_0, %c0_i32_1 : i32, i32, i32
  }
  func.func @transform_4(%arg0: i32) -> (i32, i32, i32) {
    %c0_i32 = arith.constant 0 : i32
    %c0_i32_0 = arith.constant 0 : i32
    %c0_i32_1 = arith.constant 0 : i32
    %c0_i32_2 = arith.constant 0 : i32
    return %c0_i32, %c0_i32_0, %c0_i32_1 : i32, i32, i32
  }
  func.func @transform_5(%arg0: i32) -> (i32, i32) {
    %c0_i32 = arith.constant 0 : i32
    %c0_i32_0 = arith.constant 0 : i32
    %c0_i32_1 = arith.constant 0 : i32
    return %c0_i32, %c0_i32_0 : i32, i32
  }
  func.func @transform_6(%arg0: i32) -> (i32, i32, i32) {
    %c0_i32 = arith.constant 0 : i32
    %c0_i32_0 = arith.constant 0 : i32
    %c0_i32_1 = arith.constant 0 : i32
    return %arg0, %c0_i32, %c0_i32_0 : i32, i32, i32
  }
}

</mosaic_0001>

<bundles_post_ra>
// kernel: inception_block.1
= control target key start
LH: loop header
LB: loop body
LE: loop exit
PB: predicated region body
PF: predicated region fallthrough
CT: control target
= control target key end

     0   :  { %s11288_s0 = inlined_call_operand.vmem [shape: f32[2,8,128], index: 0, kind: input, shape index: {}]   ;;  %s11289_s1 = inlined_call_operand.vmem [shape: f32[40,8], index: 1, kind: input, shape index: {}]   ;;  %s11290_s2 = inlined_call_operand.vmem [shape: f32[41,8,32], index: 2, kind: input, shape index: {}]   ;;  %s11291_s3 = inlined_call_operand.vmem [shape: f32[20,8,8], index: 3, kind: input, shape index: {}]   ;;  %s11292_s4 = inlined_call_operand.vmem [shape: f32[10,8,8], index: 4, kind: input, shape index: {}]   ;;  %s11293_s5 = inlined_call_operand.vmem [shape: f32[8,1], index: 5, kind: input, shape index: {}]   ;;  %s11294_s6 = inlined_call_operand.hbm [shape: f32[2,8,128], index: 6, kind: output, shape index: {}]  }
   0x1   :  { %11371 = sst [smem:[#allocation20_spill]] %s11288_s0 }
   0x2   :  { %11372 = sst [smem:[#allocation21_spill]] %s11289_s1 }
   0x3   :  { %11 = vsyncpa [#allocation6], 0 }
   0x4   :  { %13 = vsyncpa [#allocation6 + $0x1], 0  ;;  %s9512_s21 = smov 0   ;;  %s9514_s22 = smov 0  }
   0x5   :  { %s9516_s23 = smov 0   ;;  %s9518_s24 = smov 0  }
   0x6 LB: > { %11373 = sst [smem:[#allocation8_spill]] %s9426_s23  ;;  %s9533_s25 = sadd.s32 4294967295, %s9430_s24   ;;  %s9430_s24 = sphi %s9518_s24, %s11445_s24   ;;  %s9426_s23 = sphi %s9516_s23, %s11442_s23   ;;  %s9422_s22 = sphi %s9514_s22, %s11444_s22   ;;  %s9418_s21 = sphi %s9512_s21, %s11443_s21  }
   0x7   : > { %s7076_s26 = sadd.s32 4294967294, %s9430_s24   ;;  %s9537_s27 = sadd.s32 1, %s9430_s24  }
   0x8   : > { %s157_s28 = sadd.s32 1, %s9426_s23  ;;  %s154_s29 = ssub.s32 %s9430_s24, %s9537_s27 }
   0x9   : > { %p167_p0 = scmp.ne.s32.totalorder %s9426_s23, %s9422_s22  ;;  %p155_p1 = scmp.eq.s32.totalorder %s154_s29, 0 }
   0xa   : > { %p168_p2 = scmp.eq.s32.totalorder %s9533_s25, 1  ;;  %p173_p3 = scmp.ne.s32.totalorder %s9422_s22, %s9418_s21 }
   0xb   : > { %p174_p4 = scmp.eq.s32.totalorder %s7076_s26, 1  ;;  %p7079_p7 = scmp.ge.s32.totalorder %s9430_s24, 1 }
   0xc   : > { %s9548_s30 = scalar_select %p155_p1, %s9426_s23, %s157_s28  }
   0xd   : > { %p9550_p5 = por %p168_p2, %p167_p0  ;;  %p9554_p6 = por %p174_p4, %p173_p3 }
   0xe   : > { %11374 = sst [smem:[#allocation9_spill]] %s9548_s30  ;;  %p214_p8 = scmp.lt.s32.totalorder %s9430_s24, 3 }
  0x10   : > { %p215_p9 = pnand %p7079_p7, %p214_p8 }
  0x12   : > { %218 = sbr.rel (%p215_p9) target bundleno = 1774 (0x6ee), region = 44 }
  0x19   : > { %p243_p10 = scmp.lt.s32.totalorder %s9533_s25, 1  ;;  %v11348_v0 = vmov 0.0   ;;  %vm9433_vm0 = vmmov 0   ;;  %s11377_s0 = sld [smem:[#allocation20_spill]]  ;;  %vm269_vm1 = vcmask 64512   ;;  %v11350_v20 = vmov 0.0|0.0  }
  0x1a   : > { %7503 = vmatprep.subr.mxu0 %v11348_v0  ;;  %7505 = vmatprep.mubr.msk.f32.mxu0 %vm9433_vm0, %v11348_v0  ;;  %s11378_s1 = sld [smem:[#allocation21_spill]]  ;;  %s11315_s28 = smov 8   ;;  %vm426_vm2 = vcmask 154624   ;;  %vm1735_vm3 = vcmask 56320   ;;  %vm435_vm4 = vcmask 261120   ;;  %vm1836_vm5 = vcmask 48128  }
  0x1b   : > { %s244_s9 = scalar_select %p243_p10, %s9533_s25, 1  ;;  %7660 = vmatprep.mubr.msk.f32.mxu1 %vm9433_vm0, %v11348_v0  ;;  %8193 = vmatprep.subr.bf16.mxu1 %v11350_v20  ;;  %vm1937_vm6 = vcmask 39936   ;;  %vm2038_vm7 = vcmask 31744   ;;  %vm2139_vm8 = vcmask 23552   ;;  %vm2240_vm9 = vcmask 15360  }
  0x1c   : > { %s11323_s29 = smov 7   ;;  %s11321_s11 = smov 4   ;;  %vm2341_vm10 = vcmask 7168   ;;  %vm2534_vm11 = vcmask 1039360   ;;  %vm11360_vm12 = vcmask 1031168   ;;  %vm11362_vm13 = vcmask 1022976  }
  0x1d   : > { %s7081_s10 = sshll.u32 %s244_s9, 3  ;;  %s11317_s9 = smov 6   ;;  %vm2837_vm14 = vcmask 1014784   ;;  %vm11364_vm15 = vcmask 1006592  }
  0x1e   : > { %s11327_s12 = smov 3   ;;  %s11337_s14 = smov 1  }
  0x1f   : > { %s246_s13 = scalar_lea.vmem %s11377_s0, %s7081_s10  ;;  %s11319_s10 = smov 5  }
  0x20   : > { %v264_v1 = vld [vmem:[%s11378_s1] sm:$0xff]  ;;  %v265_v3 = vld [vmem:[%s11378_s1 + $0x8] sm:$0xff]  ;;  %v266_v4 = vld [vmem:[%s11378_s1 + $0x10] sm:$0xff]  ;;  %s11339_s15 = smov 127   ;;  %s11343_s16 = smov 126  }
  0x21   : > { %v263_v2 = vld [vmem:[%s246_s13] sm:$0xff]  ;;  %v267_v5 = vld [vmem:[%s11378_s1 + $0x18] sm:$0xff]  ;;  %s11333_s13 = smov 2   ;;  %s11341_s17 = smov 125  }
  0x22   : > { %7504 = vmatpush3.msra.mxu0 %v263_v2  ;;  %s11301_s18 = smov 124   ;;  %s11295_s19 = smov 123  }
  0x23   : > { %7506 = vmatmul.mubr.msk.f32.vlgmr.msra.gmra.mrb[0].mxu0 %vm269_vm1, %v264_v1  ;;  %s11297_s20 = smov 122   ;;  %s11299_s26 = smov 121   ;;  %8121 = vmatprep.subr.bf16.mxu0 %v11350_v20 }
  0x24   : > { %7508 = vmatprep.mubr.msk.f32.mxu0 %vm9433_vm0, %v11348_v0  ;;  %s11427_s0 = smov 127   ;;  %s11429_s23 = smov 9  }
  0x25   : > { %s11430_s30 = smov 125  }
  0x27   : > { %7509 = vmatmul.mubr.msk.f32.gmra.mrb[2].mxu0 %vm269_vm1, %v265_v3 }
  0x28   : > { %7511 = vmatprep.mubr.msk.f32.mxu0 %vm9433_vm0, %v11348_v0 }
  0x2b   : > { %7512 = vmatmul.mubr.msk.f32.gmra.mrb[4].mxu0 %vm269_vm1, %v266_v4  ;;  %v268_v4 = vld [vmem:[%s11378_s1 + $0x20] sm:$0xff]  ;;  %s11419_s1 = smov 1  }
  0x2c   : > { %7514 = vmatprep.mubr.msk.f32.mxu0 %vm9433_vm0, %v11348_v0 }
  0x2f   : > { %7515 = vmatmul.mubr.msk.f32.gmra.mrb[6].mxu0 %vm269_vm1, %v267_v5 }
  0x30   : > { %7517 = vmatprep.mubr.msk.f32.mxu0 %vm9433_vm0, %v11348_v0 }
  0x33   : > { %7518 = vmatmul.mubr.msk.f32.gmra.mrb[8].mxu0 %vm269_vm1, %v268_v4 }
  0x34   : > { %7528 = vmatprep.mubr.msk.f32.mxu0 %vm9433_vm0, %v11348_v0 }
  0xf6   : > { %v9594_v6 = vpop.f32.mrb[0].mxu0 }
  0xf7   : > { %v7507_v7 = vpop.f32.mrb[1].mxu0  ;;  %v9598_v8 = vpack.i.bf16 %v9594_v6, %v11348_v0  ;;  %v9642_v16 = vpack.i.bf16 %v11348_v0, %v9594_v6 }
  0xf9   : > { %8568 = vrot.lane.b32.xlu0 %v9598_v8, %s11315_s28 }
  0xfa   : > { %v9602_v9 = vpop.f32.mrb[2].mxu0 }
  0xfb   : > { %v7510_v10 = vpop.f32.mrb[3].mxu0  ;;  %v9606_v11 = vpack.i.bf16 %v9602_v9, %v11348_v0  ;;  %v9646_v17 = vpack.i.bf16 %v11348_v0, %v9602_v9 }
  0xfd   : > { %8573 = vrot.lane.b32.xlu0 %v9598_v8, %s11323_s29  ;;  %8693 = vrot.lane.b32.xlu1 %v9606_v11, %s11323_s29 }
  0xfe   : > { %v9612_v12 = vpop.f32.mrb[4].mxu0 }
  0xff   : > { %v7513_v13 = vpop.f32.mrb[5].mxu0  ;;  %v9716_v21 = vpack.i.bf16 %v9612_v12, %v11348_v0  ;;  %v9774_v30 = vpack.i.bf16 %v11348_v0, %v9612_v12 }
 0x101   : > { %8578 = vrot.lane.b32.xlu0 %v9598_v8, %s11317_s9  ;;  %8698 = vrot.lane.b32.xlu1 %v9606_v11, %s11317_s9 }
 0x102   : > { %v9618_v14 = vpop.f32.mrb[6].mxu0 }
 0x103   : > { %v7516_v15 = vpop.f32.mrb[7].mxu0  ;;  %v9724_v22 = vpack.i.bf16 %v9618_v14, %v11348_v0  ;;  %v9834_v45 = vpack.i.bf16 %v11348_v0, %v9618_v14 }
 0x105   : > { %8583 = vrot.lane.b32.xlu0 %v9598_v8, %s11319_s10  ;;  %8703 = vrot.lane.b32.xlu1 %v9606_v11, %s11319_s10 }
 0x109   : > { %8588 = vrot.lane.b32.xlu0 %v9598_v8, %s11321_s11  ;;  %8708 = vrot.lane.b32.xlu1 %v9606_v11, %s11321_s11 }
 0x10d   : > { %8593 = vrot.lane.b32.xlu0 %v9598_v8, %s11327_s12  ;;  %8713 = vrot.lane.b32.xlu1 %v9606_v11, %s11327_s12 }
 0x111   : > { %8598 = vrot.lane.b32.xlu0 %v9598_v8, %s11333_s13  ;;  %8718 = vrot.lane.b32.xlu1 %v9606_v11, %s11333_s13 }
 0x115   : > { %8603 = vrot.lane.b32.xlu0 %v9598_v8, %s11337_s14  ;;  %8723 = vrot.lane.b32.xlu1 %v9606_v11, %s11337_s14 }
 0x119   : > { %8608 = vrot.lane.b32.xlu0 %v9642_v16, %s11339_s15  ;;  %8728 = vrot.lane.b32.xlu1 %v9646_v17, %s11339_s15 }
 0x11d   : > { %8613 = vrot.lane.b32.xlu0 %v9642_v16, %s11343_s16  ;;  %8733 = vrot.lane.b32.xlu1 %v9646_v17, %s11343_s16 }
 0x121   : > { %8618 = vrot.lane.b32.xlu0 %v9642_v16, %s11341_s17  ;;  %8738 = vrot.lane.b32.xlu1 %v9646_v17, %s11341_s17 }
 0x125   : > { %8623 = vrot.lane.b32.xlu0 %v9642_v16, %s11301_s18  ;;  %8743 = vrot.lane.b32.xlu1 %v9646_v17, %s11301_s18  ;;  %s11309_s18 = smov 20  }
 0x129   : > { %8628 = vrot.lane.b32.xlu0 %v9642_v16, %s11295_s19  ;;  %8748 = vrot.lane.b32.xlu1 %v9646_v17, %s11295_s19  ;;  %s11303_s19 = smov 120  }
 0x12d   : > { %8633 = vrot.lane.b32.xlu0 %v9642_v16, %s11297_s20  ;;  %8753 = vrot.lane.b32.xlu1 %v9646_v17, %s11297_s20  ;;  %s11305_s20 = smov 19  }
 0x131   : > { %8638 = vrot.lane.b32.xlu0 %v9642_v16, %s11299_s26  ;;  %8758 = vrot.lane.b32.xlu1 %v9646_v17, %s11299_s26  ;;  %s11307_s26 = smov 119  }
 0x135   : > { %8643 = vrot.lane.b32.xlu0 %v9642_v16, %s11303_s19  ;;  %8763 = vrot.lane.b32.xlu1 %v9646_v17, %s11303_s19  ;;  %s11346_s19 = smov 118  }
 0x139   : > { %8648 = vrot.lane.b32.xlu0 %v9598_v8, %s11305_s20  ;;  %8768 = vrot.lane.b32.xlu1 %v9606_v11, %s11305_s20  ;;  %s11345_s20 = smov 18  }
 0x13d   : > { %8653 = vrot.lane.b32.xlu0 %v9642_v16, %s11307_s26  ;;  %8773 = vrot.lane.b32.xlu1 %v9646_v17, %s11307_s26  ;;  %s11311_s26 = smov 117  }
 0x141   : > { %8658 = vrot.lane.b32.xlu0 %v9598_v8, %s11309_s18  ;;  %8778 = vrot.lane.b32.xlu1 %v9606_v11, %s11309_s18  ;;  %s11313_s18 = smov 17  }
 0x145   : > { %8663 = vrot.lane.b32.xlu0 %v9642_v16, %s11346_s19  ;;  %8783 = vrot.lane.b32.xlu1 %v9646_v17, %s11346_s19 }
 0x149   : > { %8668 = vrot.lane.b32.xlu0 %v9598_v8, %s11345_s20  ;;  %8788 = vrot.lane.b32.xlu1 %v9606_v11, %s11345_s20 }
 0x14d   : > { %8673 = vrot.lane.b32.xlu0 %v9642_v16, %s11311_s26  ;;  %8793 = vrot.lane.b32.xlu1 %v9646_v17, %s11311_s26  ;;  %s9458_s26 = smov 116  }
 0x151   : > { %8798 = vrot.lane.b32.xlu1 %v9606_v11, %s11313_s18  ;;  %8678 = vrot.lane.b32.xlu0 %v9606_v11, %s11315_s28 }
 0x155   : > { %8683 = vrot.lane.b32.xlu0 %v9598_v8, %s11313_s18  ;;  %8803 = vrot.lane.b32.xlu1 %v9716_v21, %s11315_s28  ;;  %s9459_s18 = smov 16  }
 0x159   : > { %8688 = vrot.lane.b32.xlu0 %v9642_v16, %s9458_s26  ;;  %8913 = vrot.lane.b32.xlu1 %v9724_v22, %s11315_s28  ;;  %s9460_s28 = smov 115  }
 0x15d   : > { %8808 = vrot.lane.b32.xlu0 %v9716_v21, %s11323_s29  ;;  %8918 = vrot.lane.b32.xlu1 %v9646_v17, %s9458_s26 }
 0x161   : > { %8813 = vrot.lane.b32.xlu0 %v9716_v21, %s11317_s9  ;;  %8938 = vrot.lane.b32.xlu1 %v9724_v22, %s11323_s29  ;;  %s11331_s29 = smov 14  }
 0x165   : > { %8818 = vrot.lane.b32.xlu0 %v9716_v21, %s11319_s10  ;;  %8943 = vrot.lane.b32.xlu1 %v9606_v11, %s9459_s18 }
 0x169   : > { %8823 = vrot.lane.b32.xlu0 %v9716_v21, %s11321_s11  ;;  %8953 = vrot.lane.b32.xlu1 %v9724_v22, %s11317_s9  ;;  %s11329_s9 = smov 15  }
 0x16b   : > { %v9746_v23 = vpop.permute.xlu0 %8568 }
 0x16d   : > { %8828 = vrot.lane.b32.xlu0 %v9716_v21, %s11327_s12  ;;  %8958 = vrot.lane.b32.xlu1 %v9646_v17, %s9460_s28 }
 0x16f   : > { %v9752_v24 = vpop.permute.xlu0 %8573  ;;  %v9754_v25 = vpop.permute.xlu1 %8693 }
 0x171   : > { %8833 = vrot.lane.b32.xlu0 %v9716_v21, %s11333_s13  ;;  %8978 = vrot.lane.b32.xlu1 %v9724_v22, %s11319_s10  ;;  %s11325_s10 = smov 114  }
 0x173   : > { %v9760_v26 = vpop.permute.xlu0 %8578  ;;  %v9762_v27 = vpop.permute.xlu1 %8698 }
 0x175   : > { %8838 = vrot.lane.b32.xlu0 %v9716_v21, %s11337_s14  ;;  %8983 = vrot.lane.b32.xlu1 %v9606_v11, %s11329_s9  ;;  %s11335_s9 = smov 113  }
 0x177   : > { %v9768_v28 = vpop.permute.xlu0 %8583  ;;  %v9770_v29 = vpop.permute.xlu1 %8703 }
 0x179   : > { %8843 = vrot.lane.b32.xlu0 %v9774_v30, %s11339_s15  ;;  %8993 = vrot.lane.b32.xlu1 %v9724_v22, %s11321_s11  ;;  %s11379_s11 = smov 124  }
 0x17b   : > { %v9780_v31 = vpop.permute.xlu0 %8588  ;;  %v9782_v32 = vpop.permute.xlu1 %8708 }
 0x17d   : > { %8848 = vrot.lane.b32.xlu0 %v9774_v30, %s11343_s16  ;;  %8998 = vrot.lane.b32.xlu1 %v9646_v17, %s11325_s10  ;;  %s11380_s10 = smov 123  }
 0x17f   : > { %v9788_v33 = vpop.permute.xlu0 %8593  ;;  %v9790_v34 = vpop.permute.xlu1 %8713 }
 0x181   : > { %8853 = vrot.lane.b32.xlu0 %v9774_v30, %s11341_s17  ;;  %9018 = vrot.lane.b32.xlu1 %v9724_v22, %s11327_s12  ;;  %s11381_s12 = smov 122  }
 0x183   : > { %v9796_v35 = vpop.permute.xlu0 %8598  ;;  %v9798_v36 = vpop.permute.xlu1 %8718 }
 0x185   : > { %8858 = vrot.lane.b32.xlu0 %v9774_v30, %s11379_s11  ;;  %9023 = vrot.lane.b32.xlu1 %v9606_v11, %s11331_s29  ;;  %s11382_s29 = smov 121  }
 0x187   : > { %v9804_v37 = vpop.permute.xlu0 %8603  ;;  %v9806_v38 = vpop.permute.xlu1 %8723 }
 0x189   : > { %8863 = vrot.lane.b32.xlu0 %v9774_v30, %s11380_s10  ;;  %9033 = vrot.lane.b32.xlu1 %v9724_v22, %s11333_s13  ;;  %s11383_s13 = smov 120  }
 0x18b   : > { %v9812_v39 = vpop.permute.xlu0 %8608  ;;  %v9814_v40 = vpop.permute.xlu1 %8728 }
 0x18d   : > { %8868 = vrot.lane.b32.xlu0 %v9774_v30, %s11381_s12  ;;  %9038 = vrot.lane.b32.xlu1 %v9646_v17, %s11335_s9  ;;  %s11384_s9 = smov 19  }
 0x18f   : > { %v9820_v41 = vpop.permute.xlu0 %8613  ;;  %v9822_v42 = vpop.permute.xlu1 %8733 }
 0x191   : > { %8873 = vrot.lane.b32.xlu0 %v9774_v30, %s11382_s29  ;;  %9053 = vrot.lane.b32.xlu1 %v9724_v22, %s11337_s14  ;;  %s11385_s14 = smov 119  }
 0x193   : > { %v9828_v43 = vpop.permute.xlu0 %8618  ;;  %v9830_v44 = vpop.permute.xlu1 %8738 }
 0x195   : > { %8878 = vrot.lane.b32.xlu0 %v9774_v30, %s11383_s13  ;;  %9058 = vrot.lane.b32.xlu1 %v9834_v45, %s11339_s15  ;;  %s11386_s15 = smov 20  }
 0x197   : > { %v9840_v46 = vpop.permute.xlu0 %8623  ;;  %v9842_v47 = vpop.permute.xlu1 %8743 }
 0x199   : > { %8883 = vrot.lane.b32.xlu0 %v9716_v21, %s11384_s9  ;;  %9063 = vrot.lane.b32.xlu1 %v9834_v45, %s11343_s16  ;;  %s11396_s16 = smov 15  }
 0x19b   : > { %v9848_v48 = vpop.permute.xlu0 %8628  ;;  %v9850_v49 = vpop.permute.xlu1 %8748 }
 0x19d   : > { %8888 = vrot.lane.b32.xlu0 %v9774_v30, %s11385_s14  ;;  %9068 = vrot.lane.b32.xlu1 %v9834_v45, %s11341_s17  ;;  %s11387_s17 = smov 117  }
 0x19f   : > { %v9856_v50 = vpop.permute.xlu0 %8633  ;;  %v9858_v51 = vpop.permute.xlu1 %8753 }
 0x1a1   : > { %8893 = vrot.lane.b32.xlu0 %v9716_v21, %s11386_s15  ;;  %9073 = vrot.lane.b32.xlu1 %v9834_v45, %s11379_s11 }
 0x1a3   : > { %v9864_v52 = vpop.permute.xlu0 %8638  ;;  %v9866_v53 = vpop.permute.xlu1 %8758 }
 0x1a5   : > { %8898 = vrot.lane.b32.xlu0 %v9774_v30, %s11346_s19  ;;  %9078 = vrot.lane.b32.xlu1 %v9834_v45, %s11380_s10  ;;  %s11389_s19 = smov 17  }
 0x1a7   : > { %v9872_v54 = vpop.permute.xlu0 %8643  ;;  %v9874_v55 = vpop.permute.xlu1 %8763 }
 0x1a9   : > { %8903 = vrot.lane.b32.xlu0 %v9716_v21, %s11345_s20  ;;  %9083 = vrot.lane.b32.xlu1 %v9834_v45, %s11381_s12  ;;  %s11399_s20 = smov 114  }
 0x1ab   : > { %v8649_v56 = vpop.permute.xlu0 %8648  ;;  %v8769_v57 = vpop.permute.xlu1 %8768 }
 0x1ac   : > { %v8651_v58 = vunpack.i.h.bf16 %v8649_v56  ;;  %v8650_v59 = vunpack.i.l.bf16 %v8649_v56  ;;  %v8771_v60 = vunpack.i.h.bf16 %v8769_v57  ;;  %v8770_v61 = vunpack.i.l.bf16 %v8769_v57 }
 0x1ad   : > { %8908 = vrot.lane.b32.xlu0 %v9774_v30, %s11387_s17  ;;  %9088 = vrot.lane.b32.xlu1 %v9834_v45, %s11382_s29 }
 0x1ae   : > { %v427_v62 = vsel %vm426_vm2, %v8650_v59, %v8651_v58  ;;  %v428_v63 = vsel %vm426_vm2, %v8770_v61, %v8771_v60  ;;  %v8571_v59 = vunpack.i.h.bf16 %v9746_v23  ;;  %v8570_v60 = vunpack.i.l.bf16 %v9746_v23 }
 0x1af   : > { %v9886_v1 = vpop.permute.xlu0 %8653  ;;  %v9888_v2 = vpop.permute.xlu1 %8773  ;;  %v8122_v3 = vpack.c.bf16 %v428_v63, %v427_v62 }
 0x1b0   : > { %11388 = vst [vmem:[#allocation10_spill] sm:$0xff] %v9888_v2  ;;  %v1635_v4 = vsel %vm269_vm1, %v8570_v60, %v8571_v59  ;;  %v8575_v59 = vunpack.i.l.bf16 %v9752_v24 }
 0x1b1   : > { %8123 = vmatpush3.bf16.msra.mxu0 %v8122_v3  ;;  %8923 = vrot.lane.b32.xlu0 %v9716_v21, %s11389_s19 }
 0x1b2   : > { %9093 = vrot.lane.b32.xlu1 %v9834_v45, %s11383_s13  ;;  %8124 = vmatprep.subr.bf16.mxu0 %v11350_v20 }
 0x1b3   : > { %v9899_v5 = vpop.permute.xlu0 %8658  ;;  %v9901_v7 = vpop.permute.xlu1 %8778 }
 0x1b5   : > { %8928 = vrot.lane.b32.xlu0 %v9774_v30, %s9458_s26 }
 0x1b6   : > { %9098 = vrot.lane.b32.xlu1 %v9724_v22, %s11384_s9  ;;  %s11394_s9 = smov 118  }
 0x1b7   : > { %v9909_v10 = vpop.permute.xlu0 %8663  ;;  %v9911_v13 = vpop.permute.xlu1 %8783 }
 0x1b8   : > { %11390 = vst [vmem:[#allocation11_spill] sm:$0xff] %v9909_v10  ;;  %11391 = vst [vmem:[#allocation12_spill] sm:$0xff] %v9911_v13 }
 0x1b9   : > { %8933 = vrot.lane.b32.xlu0 %v9598_v8, %s9459_s18 }
 0x1ba   : > { %9103 = vrot.lane.b32.xlu1 %v9834_v45, %s11385_s14 }
 0x1bb   : > { %v9917_v15 = vpop.permute.xlu0 %8668  ;;  %v9919_v56 = vpop.permute.xlu1 %8788 }
 0x1bd   : > { %8948 = vrot.lane.b32.xlu0 %v9642_v16, %s9460_s28 }
 0x1be   : > { %9108 = vrot.lane.b32.xlu1 %v9724_v22, %s11386_s15  ;;  %s11395_s15 = smov 18  }
 0x1bf   : > { %v9925_v57 = vpop.permute.xlu0 %8673  ;;  %v9927_v58 = vpop.permute.xlu1 %8793 }
 0x1c0   : > { %11392 = vst [vmem:[#allocation13_spill] sm:$0xff] %v9925_v57  ;;  %11393 = vst [vmem:[#allocation14_spill] sm:$0xff] %v9927_v58  ;;  %v11397_v58 = vmov 0.0|0.0   ;;  %v8576_v57 = vunpack.i.h.bf16 %v9752_v24 }
 0x1c1   : > { %8963 = vrot.lane.b32.xlu0 %v9716_v21, %s9459_s18 }
 0x1c2   : > { %9113 = vrot.lane.b32.xlu1 %v9834_v45, %s11394_s9  ;;  %v1736_v2 = vsel %vm1735_vm3, %v8575_v59, %v8576_v57  ;;  %v8581_v57 = vunpack.i.h.bf16 %v9760_v26  ;;  %v8580_v59 = vunpack.i.l.bf16 %v9760_v26 }
 0x1c3   : > { %v9935_v61 = vpop.permute.xlu1 %8798  ;;  %v8679_v62 = vpop.permute.xlu0 %8678 }
 0x1c4   : > { %v8681_v63 = vunpack.i.h.bf16 %v8679_v62  ;;  %v8680_v3 = vunpack.i.l.bf16 %v8679_v62 }
 0x1c5   : > { %8968 = vrot.lane.b32.xlu0 %v9774_v30, %s9460_s28 }
 0x1c6   : > { %9118 = vrot.lane.b32.xlu1 %v9724_v22, %s11395_s15  ;;  %v1636_v19 = vsel %vm269_vm1, %v8680_v3, %v8681_v63  ;;  %s9468_s15 = smov 111  }
 0x1c7   : > { %v9943_v18 = vpop.permute.xlu0 %8683  ;;  %v8804_v23 = vpop.permute.xlu1 %8803  ;;  %v8194_v0 = vpack.c.bf16 %v1636_v19, %v1635_v4  ;;  %v8696_v19 = vunpack.i.h.bf16 %v9754_v25 }
 0x1c8   : > { %v8806_v20 = vunpack.i.h.bf16 %v8804_v23  ;;  %v8805_v62 = vunpack.i.l.bf16 %v8804_v23 }
 0x1c9   : > { %8195 = vmatpush3.bf16.msra.mxu1 %v8194_v0  ;;  %8973 = vrot.lane.b32.xlu0 %v9598_v8, %s11396_s16  ;;  %v8695_v0 = vunpack.i.l.bf16 %v9754_v25 }
 0x1ca   : > { %9123 = vrot.lane.b32.xlu1 %v9834_v45, %s11387_s17  ;;  %8196 = vmatprep.subr.bf16.mxu1 %v11397_v58  ;;  %v1637_v23 = vsel %vm269_vm1, %v8805_v62, %v8806_v20  ;;  %s9469_s17 = smov 11  }
 0x1cb   : > { %v9952_v60 = vpop.permute.xlu0 %8688  ;;  %v8914_v63 = vpop.permute.xlu1 %8913  ;;  %v1737_v25 = vsel %vm1735_vm3, %v8695_v0, %v8696_v19 }
 0x1cc   : > { %11398 = vst [vmem:[#allocation15_spill] sm:$0xff] %v9952_v60  ;;  %v8916_v3 = vunpack.i.h.bf16 %v8914_v63  ;;  %v8915_v4 = vunpack.i.l.bf16 %v8914_v63  ;;  %v7110_v63 = vld [vmem:[%s11290_s2 + $0x60] sm:$0xff] }
 0x1cd   : > { %8988 = vrot.lane.b32.xlu0 %v9642_v16, %s11399_s20 }
 0x1ce   : > { %9128 = vrot.lane.b32.xlu1 %v9724_v22, %s11389_s19  ;;  %v1638_v24 = vsel %vm269_vm1, %v8915_v4, %v8916_v3  ;;  %v8200_v3 = vpack.c.bf16 %v1737_v25, %v1736_v2  ;;  %v8700_v4 = vunpack.i.l.bf16 %v9762_v27  ;;  %s11402_s19 = smov 14  }
 0x1cf   : > { %v8809_v13 = vpop.permute.xlu0 %8808  ;;  %v9962_v60 = vpop.permute.xlu1 %8918  ;;  %v8197_v10 = vpack.c.bf16 %v1638_v24, %v1637_v23 }
 0x1d0   : > { %11400 = vst [vmem:[#allocation16_spill] sm:$0xff] %v9962_v60  ;;  %v8811_v20 = vunpack.i.h.bf16 %v8809_v13  ;;  %v8810_v62 = vunpack.i.l.bf16 %v8809_v13 }
 0x1d1   : > { %9003 = vrot.lane.b32.xlu0 %v9716_v21, %s11396_s16  ;;  %8198 = vmatpush3.bf16.msra.mxu1 %v8197_v10  ;;  %v8701_v10 = vunpack.i.h.bf16 %v9762_v27 }
 0x1d2   : > { %9133 = vrot.lane.b32.xlu1 %v9834_v45, %s9458_s26  ;;  %8199 = vmatprep.subr.bf16.mxu1 %v11397_v58  ;;  %v1738_v13 = vsel %vm1735_vm3, %v8810_v62, %v8811_v20  ;;  %v7112_v20 = vld [vmem:[%s11290_s2 + $0x68] sm:$0xff]  ;;  %s9466_s26 = smov 112  }
 0x1d3   : > { %v8814_v19 = vpop.permute.xlu0 %8813  ;;  %v8939_v0 = vpop.permute.xlu1 %8938 }
 0x1d4   : > { %v8941_v23 = vunpack.i.h.bf16 %v8939_v0  ;;  %v8940_v24 = vunpack.i.l.bf16 %v8939_v0  ;;  %7661 = vmatmul.mubr.msk.f32.vlgmr.msra.gmra.mrb[0].mxu1 %vm435_vm4, %v7110_v63  ;;  %v11401_v0 = vmov 0.0   ;;  %v1837_v63 = vsel %vm1836_vm5, %v8580_v59, %v8581_v57 }
 0x1d5   : > { %9008 = vrot.lane.b32.xlu0 %v9774_v30, %s11399_s20  ;;  %8201 = vmatpush3.bf16.msra.mxu1 %v8200_v3  ;;  %v1838_v3 = vsel %vm1836_vm5, %v8700_v4, %v8701_v10  ;;  %v8816_v62 = vunpack.i.h.bf16 %v8814_v19  ;;  %v8585_v57 = vunpack.i.l.bf16 %v9768_v28 }
 0x1d6   : > { %v1739_v26 = vsel %vm1735_vm3, %v8940_v24, %v8941_v23  ;;  %9138 = vrot.lane.b32.xlu1 %v9724_v22, %s9459_s18  ;;  %8202 = vmatprep.subr.bf16.mxu1 %v11397_v58  ;;  %v8815_v23 = vunpack.i.l.bf16 %v8814_v19  ;;  %v8586_v24 = vunpack.i.h.bf16 %v9768_v28  ;;  %v8206_v4 = vpack.c.bf16 %v1838_v3, %v1837_v63  ;;  %s9467_s18 = smov 12  }
 0x1d7   : > { %v8819_v2 = vpop.permute.xlu0 %8818  ;;  %v9986_v27 = vpop.permute.xlu1 %8943  ;;  %v8203_v25 = vpack.c.bf16 %v1739_v26, %v1738_v13  ;;  %7671 = vmatprep.mubr.msk.f32.mxu1 %vm9433_vm0, %v11401_v0  ;;  %v8706_v13 = vunpack.i.h.bf16 %v9770_v29  ;;  %v8705_v26 = vunpack.i.l.bf16 %v9770_v29 }
 0x1d8   : > { %v1839_v19 = vsel %vm1836_vm5, %v8815_v23, %v8816_v62  ;;  %v8821_v62 = vunpack.i.h.bf16 %v8819_v2  ;;  %v8820_v23 = vunpack.i.l.bf16 %v8819_v2 }
 0x1d9   : > { %9013 = vrot.lane.b32.xlu0 %v9598_v8, %s11402_s19  ;;  %8204 = vmatpush3.bf16.msra.mxu1 %v8203_v25 }
 0x1da   : > { %9143 = vrot.lane.b32.xlu1 %v9834_v45, %s9460_s28  ;;  %8205 = vmatprep.subr.bf16.mxu1 %v11397_v58  ;;  %s11403_s28 = smov 113   ;;  %v1940_v2 = vsel %vm1937_vm6, %v8820_v23, %v8821_v62  ;;  %v7116_v62 = vld [vmem:[%s11290_s2 + $0x78] sm:$0xff] }
 0x1db   : > { %v10002_v59 = vpop.permute.xlu0 %8823  ;;  %v8954_v10 = vpop.permute.xlu1 %8953 }
 0x1dc   : > { %v8956_v25 = vunpack.i.h.bf16 %v8954_v10  ;;  %v8955_v60 = vunpack.i.l.bf16 %v8954_v10  ;;  %7672 = vmatmul.mubr.msk.f32.vlgmr.msra.gmra.mrb[0].mxu1 %vm435_vm4, %v7112_v20  ;;  %v1938_v20 = vsel %vm1937_vm6, %v8585_v57, %v8586_v24  ;;  %v1939_v10 = vsel %vm1937_vm6, %v8705_v26, %v8706_v13 }
 0x1dd   : > { %9028 = vrot.lane.b32.xlu0 %v9642_v16, %s11403_s28  ;;  %8207 = vmatpush3.bf16.msra.mxu1 %v8206_v4  ;;  %v8591_v4 = vunpack.i.h.bf16 %v9780_v31  ;;  %v8590_v24 = vunpack.i.l.bf16 %v9780_v31  ;;  %v8212_v26 = vpack.c.bf16 %v1939_v10, %v1938_v20  ;;  %v8826_v23 = vunpack.i.h.bf16 %v10002_v59 }
 0x1de   : > { %v1840_v28 = vsel %vm1836_vm5, %v8955_v60, %v8956_v25  ;;  %9148 = vrot.lane.b32.xlu1 %v9724_v22, %s11396_s16  ;;  %8208 = vmatprep.subr.bf16.mxu1 %v11397_v58  ;;  %v7114_v60 = vld [vmem:[%s11290_s2 + $0x70] sm:$0xff]  ;;  %v8711_v25 = vunpack.i.h.bf16 %v9782_v32  ;;  %s11411_s16 = smov 6  }
 0x1df   : > { %v10014_v63 = vpop.permute.xlu0 %8828  ;;  %v10016_v29 = vpop.permute.xlu1 %8958  ;;  %v8209_v3 = vpack.c.bf16 %v1840_v28, %v1839_v19  ;;  %7682 = vmatprep.mubr.msk.f32.mxu1 %vm9433_vm0, %v11401_v0  ;;  %v8710_v19 = vunpack.i.l.bf16 %v9782_v32 }
 0x1e0   : > { %11404 = vst [vmem:[#allocation17_spill] sm:$0xff] %v10016_v29 }
 0x1e1   : > { %9043 = vrot.lane.b32.xlu0 %v9716_v21, %s11402_s19  ;;  %8210 = vmatpush3.bf16.msra.mxu1 %v8209_v3 }
 0x1e2   : > { %9153 = vrot.lane.b32.xlu1 %v9834_v45, %s11399_s20  ;;  %8211 = vmatprep.subr.bf16.mxu1 %v11397_v58  ;;  %s9465_s20 = smov 13  }
 0x1e3   : > { %v10032_v57 = vpop.permute.xlu0 %8833  ;;  %v8979_v13 = vpop.permute.xlu1 %8978 }
 0x1e4   : > { %v8981_v28 = vunpack.i.h.bf16 %v8979_v13  ;;  %v8980_v3 = vunpack.i.l.bf16 %v8979_v13  ;;  %7683 = vmatmul.mubr.msk.f32.vlgmr.msra.gmra.mrb[0].mxu1 %vm435_vm4, %v7114_v60  ;;  %v2039_v60 = vsel %vm2038_vm7, %v8590_v24, %v8591_v4  ;;  %v2040_v13 = vsel %vm2038_vm7, %v8710_v19, %v8711_v25 }
 0x1e5   : > { %9048 = vrot.lane.b32.xlu0 %v9774_v30, %s11403_s28  ;;  %8213 = vmatpush3.bf16.msra.mxu1 %v8212_v26  ;;  %v8825_v26 = vunpack.i.l.bf16 %v10002_v59  ;;  %v8596_v4 = vunpack.i.h.bf16 %v9788_v33  ;;  %v8595_v24 = vunpack.i.l.bf16 %v9788_v33 }
 0x1e6   : > { %v1941_v31 = vsel %vm1937_vm6, %v8980_v3, %v8981_v28  ;;  %9158 = vrot.lane.b32.xlu1 %v9724_v22, %s11402_s19  ;;  %8214 = vmatprep.subr.bf16.mxu1 %v11397_v58  ;;  %v8218_v28 = vpack.c.bf16 %v2040_v13, %v2039_v60  ;;  %v8716_v3 = vunpack.i.h.bf16 %v9790_v34  ;;  %s9471_s19 = smov 10  }
 0x1e7   : > { %v10044_v20 = vpop.permute.xlu0 %8838  ;;  %v10046_v32 = vpop.permute.xlu1 %8983  ;;  %v8215_v10 = vpack.c.bf16 %v1941_v31, %v1940_v2  ;;  %7693 = vmatprep.mubr.msk.f32.mxu1 %vm9433_vm0, %v11401_v0  ;;  %v8715_v2 = vunpack.i.l.bf16 %v9790_v34  ;;  %v2041_v33 = vsel %vm2038_vm7, %v8825_v26, %v8826_v23  ;;  %v7118_v23 = vld [vmem:[%s11290_s2 + $0x80] sm:$0xff]  ;;  %v8831_v26 = vunpack.i.h.bf16 %v10014_v63 }
 0x1e9   : > { %9168 = vrot.lane.b32.xlu0 %v9598_v8, %s9465_s20  ;;  %8216 = vmatpush3.bf16.msra.mxu1 %v8215_v10 }
 0x1ea   : > { %9163 = vrot.lane.b32.xlu1 %v9834_v45, %s11403_s28  ;;  %8217 = vmatprep.subr.bf16.mxu1 %v11397_v58  ;;  %s9472_s28 = smov 109  }
 0x1eb   : > { %v10064_v25 = vpop.permute.xlu0 %8843  ;;  %v8994_v19 = vpop.permute.xlu1 %8993 }
 0x1ec   : > { %v8996_v31 = vunpack.i.h.bf16 %v8994_v19  ;;  %v8995_v10 = vunpack.i.l.bf16 %v8994_v19  ;;  %7694 = vmatmul.mubr.msk.f32.vlgmr.msra.gmra.mrb[0].mxu1 %vm435_vm4, %v7116_v62  ;;  %v2140_v62 = vsel %vm2139_vm8, %v8595_v24, %v8596_v4  ;;  %v2141_v19 = vsel %vm2139_vm8, %v8715_v2, %v8716_v3 }
 0x1ed   : > { %9178 = vrot.lane.b32.xlu0 %v9642_v16, %s9466_s26  ;;  %8219 = vmatpush3.bf16.msra.mxu1 %v8218_v28  ;;  %v8830_v28 = vunpack.i.l.bf16 %v10014_v63  ;;  %v8601_v4 = vunpack.i.h.bf16 %v9796_v35  ;;  %v8600_v24 = vunpack.i.l.bf16 %v9796_v35 }
 0x1ee   : > { %v2042_v59 = vsel %vm2038_vm7, %v8995_v10, %v8996_v31  ;;  %9173 = vrot.lane.b32.xlu1 %v9606_v11, %s9465_s20  ;;  %8220 = vmatprep.subr.bf16.mxu1 %v11397_v58  ;;  %v8224_v31 = vpack.c.bf16 %v2141_v19, %v2140_v62  ;;  %v8721_v10 = vunpack.i.h.bf16 %v9798_v36 }
 0x1ef   : > { %v10076_v34 = vpop.permute.xlu0 %8848  ;;  %v10078_v60 = vpop.permute.xlu1 %8998  ;;  %v8221_v13 = vpack.c.bf16 %v2042_v59, %v2041_v33  ;;  %7704 = vmatprep.mubr.msk.f32.mxu1 %vm9433_vm0, %v11401_v0  ;;  %v8720_v33 = vunpack.i.l.bf16 %v9798_v36  ;;  %v2142_v63 = vsel %vm2139_vm8, %v8830_v28, %v8831_v26  ;;  %v7120_v26 = vld [vmem:[%s11290_s2 + $0x88] sm:$0xff]  ;;  %v8836_v28 = vunpack.i.h.bf16 %v10032_v57 }
 0x1f0   : > { %11405 = vst [vmem:[#allocation18_spill] sm:$0xff] %v10078_v60 }
 0x1f1   : > { %9188 = vrot.lane.b32.xlu0 %v9716_v21, %s9465_s20  ;;  %8222 = vmatpush3.bf16.msra.mxu1 %v8221_v13 }
 0x1f2   : > { %9183 = vrot.lane.b32.xlu1 %v9646_v17, %s9466_s26  ;;  %8223 = vmatprep.subr.bf16.mxu1 %v11397_v58 }
 0x1f3   : > { %v10096_v3 = vpop.permute.xlu0 %8853  ;;  %v9019_v2 = vpop.permute.xlu1 %9018 }
 0x1f4   : > { %v9021_v59 = vunpack.i.h.bf16 %v9019_v2  ;;  %v9020_v13 = vunpack.i.l.bf16 %v9019_v2  ;;  %7705 = vmatmul.mubr.msk.f32.vlgmr.msra.gmra.mrb[0].mxu1 %vm435_vm4, %v7118_v23  ;;  %v2241_v23 = vsel %vm2240_vm9, %v8600_v24, %v8601_v4  ;;  %v2242_v2 = vsel %vm2240_vm9, %v8720_v33, %v8721_v10 }
 0x1f5   : > { %9198 = vrot.lane.b32.xlu0 %v9774_v30, %s9466_s26  ;;  %8225 = vmatpush3.bf16.msra.mxu1 %v8224_v31  ;;  %v8835_v31 = vunpack.i.l.bf16 %v10032_v57  ;;  %v8606_v4 = vunpack.i.h.bf16 %v9804_v37  ;;  %v8605_v24 = vunpack.i.l.bf16 %v9804_v37 }
 0x1f6   : > { %v2143_v35 = vsel %vm2139_vm8, %v9020_v13, %v9021_v59  ;;  %9193 = vrot.lane.b32.xlu1 %v9724_v22, %s9465_s20  ;;  %8226 = vmatprep.subr.bf16.mxu1 %v11397_v58  ;;  %v8230_v59 = vpack.c.bf16 %v2242_v2, %v2241_v23  ;;  %v8726_v13 = vunpack.i.h.bf16 %v9806_v38  ;;  %s11366_s20 = smov 9  }
 0x1f7   : > { %v10108_v62 = vpop.permute.xlu0 %8858  ;;  %v10110_v36 = vpop.permute.xlu1 %9023  ;;  %v8227_v19 = vpack.c.bf16 %v2143_v35, %v2142_v63  ;;  %7715 = vmatprep.mubr.msk.f32.mxu1 %vm9433_vm0, %v11401_v0  ;;  %v8725_v63 = vunpack.i.l.bf16 %v9806_v38  ;;  %v2243_v37 = vsel %vm2240_vm9, %v8835_v31, %v8836_v28  ;;  %v7122_v28 = vld [vmem:[%s11290_s2 + $0x90] sm:$0xff]  ;;  %v8841_v31 = vunpack.i.h.bf16 %v10044_v20 }
 0x1f9   : > { %9208 = vrot.lane.b32.xlu0 %v9598_v8, %s9467_s18  ;;  %8228 = vmatpush3.bf16.msra.mxu1 %v8227_v19 }
 0x1fa   : > { %9203 = vrot.lane.b32.xlu1 %v9834_v45, %s9466_s26  ;;  %8229 = vmatprep.subr.bf16.mxu1 %v11397_v58  ;;  %s9474_s26 = smov 108  }
 0x1fb   : > { %v10128_v10 = vpop.permute.xlu0 %8863  ;;  %v9034_v33 = vpop.permute.xlu1 %9033 }
 0x1fc   : > { %v9036_v35 = vunpack.i.h.bf16 %v9034_v33  ;;  %v9035_v19 = vunpack.i.l.bf16 %v9034_v33  ;;  %7716 = vmatmul.mubr.msk.f32.vlgmr.msra.gmra.mrb[0].mxu1 %vm435_vm4, %v7120_v26  ;;  %v2342_v26 = vsel %vm2341_vm10, %v8605_v24, %v8606_v4  ;;  %v2343_v33 = vsel %vm2341_vm10, %v8725_v63, %v8726_v13 }
 0x1fd   : > { %9218 = vrot.lane.b32.xlu0 %v9642_v16, %s9468_s15  ;;  %8231 = vmatpush3.bf16.msra.mxu1 %v8230_v59  ;;  %v8840_v59 = vunpack.i.l.bf16 %v10044_v20  ;;  %v8236_v13 = vpack.c.bf16 %v2343_v33, %v2342_v26  ;;  %v7124_v26 = vld [vmem:[%s11290_s2 + $0x98] sm:$0xff] }
 0x1fe   : > { %v2244_v57 = vsel %vm2240_vm9, %v9035_v19, %v9036_v35  ;;  %9213 = vrot.lane.b32.xlu1 %v9606_v11, %s9467_s18  ;;  %8232 = vmatprep.subr.bf16.mxu1 %v11397_v58 }
 0x1ff   : > { %v10140_v38 = vpop.permute.xlu0 %8868  ;;  %v10142_v23 = vpop.permute.xlu1 %9038  ;;  %v8233_v2 = vpack.c.bf16 %v2244_v57, %v2243_v37  ;;  %7726 = vmatprep.mubr.msk.f32.mxu1 %vm9433_vm0, %v11401_v0  ;;  %v2344_v19 = vsel %vm2341_vm10, %v8840_v59, %v8841_v31  ;;  %v8611_v31 = vunpack.i.h.bf16 %v9812_v39  ;;  %v8610_v59 = vunpack.i.l.bf16 %v9812_v39 }
 0x200   : > { %11406 = vst [vmem:[#allocation19_spill] sm:$0xff] %v10142_v23  ;;  %v8745_v23 = vunpack.i.l.bf16 %v9842_v47 }
 0x201   : > { %9228 = vrot.lane.b32.xlu0 %v9716_v21, %s9467_s18  ;;  %8234 = vmatpush3.bf16.msra.mxu1 %v8233_v2 }
 0x202   : > { %9223 = vrot.lane.b32.xlu1 %v9646_v17, %s9468_s15  ;;  %8235 = vmatprep.subr.bf16.mxu1 %v11397_v58 }
 0x203   : > { %v10158_v4 = vpop.permute.xlu0 %8873  ;;  %v9054_v24 = vpop.permute.xlu1 %9053 }
 0x204   : > { %v9056_v63 = vunpack.i.h.bf16 %v9054_v24  ;;  %v9055_v35 = vunpack.i.l.bf16 %v9054_v24  ;;  %7727 = vmatmul.mubr.msk.f32.vlgmr.msra.gmra.mrb[0].mxu1 %vm435_vm4, %v7122_v28  ;;  %v8731_v24 = vunpack.i.h.bf16 %v9814_v40 }
 0x205   : > { %9238 = vrot.lane.b32.xlu0 %v9774_v30, %s9468_s15  ;;  %8237 = vmatpush3.bf16.msra.mxu1 %v8236_v13  ;;  %v8730_v13 = vunpack.i.l.bf16 %v9814_v40  ;;  %v2535_v40 = vsel %vm2534_vm11, %v8610_v59, %v8611_v31 }
 0x206   : > { %v2345_v20 = vsel %vm2341_vm10, %v9055_v35, %v9056_v63  ;;  %9233 = vrot.lane.b32.xlu1 %v9724_v22, %s9467_s18  ;;  %8238 = vmatprep.subr.bf16.mxu1 %v11397_v58  ;;  %s9470_s18 = smov 110   ;;  %v11407_v63 = vpack.c.bf16 %v9602_v9, %v9594_v6  ;;  %v11408_v6 = vpack.c.bf16 %v9618_v14, %v9612_v12  ;;  %v7126_v9 = vld [vmem:[%s11290_s2 + $0xa0] sm:$0xff]  ;;  %v8615_v14 = vunpack.i.l.bf16 %v9820_v41 }
 0x207   : > { %v10168_v37 = vpop.permute.xlu0 %8878  ;;  %v9059_v57 = vpop.permute.xlu1 %9058  ;;  %v8239_v2 = vpack.c.bf16 %v2345_v20, %v2344_v19  ;;  %7737 = vmatprep.mubr.msk.f32.mxu1 %vm9433_vm0, %v11401_v0  ;;  %v2536_v19 = vsel %vm2534_vm11, %v8730_v13, %v8731_v24  ;;  %v8736_v24 = vunpack.i.h.bf16 %v9822_v42  ;;  %v8735_v13 = vunpack.i.l.bf16 %v9822_v42 }
 0x208   : > { %v9061_v20 = vunpack.i.h.bf16 %v9059_v57  ;;  %v8248_v12 = vpack.c.bf16 %v2536_v19, %v2535_v40 }
 0x209   : > { %9248 = vrot.lane.b32.xlu0 %v9598_v8, %s9469_s17  ;;  %8240 = vmatpush3.bf16.msra.mxu1 %v8239_v2  ;;  %v9060_v2 = vunpack.i.l.bf16 %v9059_v57  ;;  %v8616_v57 = vunpack.i.h.bf16 %v9820_v41 }
 0x20a   : > { %9243 = vrot.lane.b32.xlu1 %v9834_v45, %s9468_s15  ;;  %8241 = vmatprep.subr.bf16.mxu1 %v11397_v58  ;;  %s11410_s15 = smov 7  }
 0x20b   : > { %v10180_v33 = vpop.permute.xlu0 %8883  ;;  %v10182_v28 = vpop.permute.xlu1 %9063  ;;  %v2636_v19 = vsel %vm11360_vm12, %v8615_v14, %v8616_v57 }
 0x20c   : > { %7738 = vmatmul.mubr.msk.f32.vlgmr.msra.gmra.mrb[0].mxu1 %vm435_vm4, %v7124_v26  ;;  %v8846_v26 = vunpack.i.h.bf16 %v10064_v25 }
 0x20d   : > { %9258 = vrot.lane.b32.xlu0 %v9642_v16, %s9470_s18  ;;  %8243 = vmatpush3.bf16.msra.mxu1 %v11407_v63  ;;  %v8845_v63 = vunpack.i.l.bf16 %v10064_v25  ;;  %v2538_v25 = vsel %vm2534_vm11, %v9060_v2, %v9061_v20  ;;  %v2637_v20 = vsel %vm11360_vm12, %v8735_v13, %v8736_v24  ;;  %v9066_v2 = vunpack.i.h.bf16 %v10182_v28 }
 0x20e   : > { %9253 = vrot.lane.b32.xlu1 %v9606_v11, %s9469_s17  ;;  %8244 = vmatprep.subr.bf16.mxu1 %v11397_v58  ;;  %v8254_v24 = vpack.c.bf16 %v2637_v20, %v2636_v19  ;;  %v8620_v13 = vunpack.i.l.bf16 %v9828_v43 }
 0x20f   : > { %v10197_v39 = vpop.permute.xlu0 %8888  ;;  %v10199_v35 = vpop.permute.xlu1 %9068  ;;  %7748 = vmatprep.mubr.msk.f32.mxu1 %vm9433_vm0, %v11401_v0 }
 0x211   : > { %9268 = vrot.lane.b32.xlu0 %v9716_v21, %s9469_s17  ;;  %8246 = vmatpush3.bf16.msra.mxu1 %v11408_v6  ;;  %v2537_v6 = vsel %vm2534_vm11, %v8845_v63, %v8846_v26  ;;  %v7128_v26 = vld [vmem:[%s11290_s2 + $0xa8] sm:$0xff]  ;;  %v8851_v63 = vunpack.i.h.bf16 %v10076_v34 }
 0x212   : > { %9263 = vrot.lane.b32.xlu1 %v9646_v17, %s9470_s18  ;;  %8247 = vmatprep.subr.bf16.mxu1 %v11397_v58  ;;  %v8251_v42 = vpack.c.bf16 %v2538_v25, %v2537_v6  ;;  %v8741_v25 = vunpack.i.h.bf16 %v9830_v44  ;;  %v8740_v6 = vunpack.i.l.bf16 %v9830_v44 }
 0x213   : > { %v10219_v31 = vpop.permute.xlu0 %8893  ;;  %v10221_v59 = vpop.permute.xlu1 %9073 }
 0x214   : > { %7749 = vmatmul.mubr.msk.f32.vlgmr.msra.gmra.mrb[0].mxu1 %vm435_vm4, %v7126_v9  ;;  %v9065_v9 = vunpack.i.l.bf16 %v10182_v28  ;;  %v8621_v28 = vunpack.i.h.bf16 %v9828_v43 }
 0x215   : > { %9278 = vrot.lane.b32.xlu0 %v9774_v30, %s9470_s18  ;;  %8249 = vmatpush3.bf16.msra.mxu1 %v8248_v12  ;;  %v8850_v12 = vunpack.i.l.bf16 %v10076_v34 }
 0x216   : > { %9273 = vrot.lane.b32.xlu1 %v9724_v22, %s9469_s17  ;;  %8250 = vmatprep.subr.bf16.mxu1 %v11397_v58  ;;  %v2639_v34 = vsel %vm11360_vm12, %v9065_v9, %v9066_v2  ;;  %v2737_v20 = vsel %vm11362_vm13, %v8620_v13, %v8621_v28  ;;  %v2738_v2 = vsel %vm11362_vm13, %v8740_v6, %v8741_v25  ;;  %v9071_v9 = vunpack.i.h.bf16 %v10199_v35  ;;  %v7130_v28 = vld [vmem:[%s11290_s2 + $0xb0] sm:$0xff]  ;;  %s11409_s17 = smov 8  }
 0x217   : > { %v10234_v41 = vpop.permute.xlu0 %8898  ;;  %v10236_v40 = vpop.permute.xlu1 %9078  ;;  %7759 = vmatprep.mubr.msk.f32.mxu1 %vm9433_vm0, %v11401_v0  ;;  %v8856_v13 = vunpack.i.h.bf16 %v10096_v3 }
 0x219   : > { %9288 = vrot.lane.b32.xlu0 %v9598_v8, %s9471_s19  ;;  %8252 = vmatpush3.bf16.msra.mxu1 %v8251_v42  ;;  %v2638_v42 = vsel %vm11360_vm12, %v8850_v12, %v8851_v63  ;;  %v8626_v63 = vunpack.i.h.bf16 %v9840_v46  ;;  %v8625_v12 = vunpack.i.l.bf16 %v9840_v46  ;;  %vm525_vm12 = vcmask 162816  }
 0x21a   : > { %9283 = vrot.lane.b32.xlu1 %v9834_v45, %s9470_s18  ;;  %8253 = vmatprep.subr.bf16.mxu1 %v11397_v58  ;;  %v8257_v19 = vpack.c.bf16 %v2639_v34, %v2638_v42  ;;  %s11414_s18 = smov 4  }
 0x21b   : > { %v10255_v57 = vpop.permute.xlu0 %8903  ;;  %v10257_v14 = vpop.permute.xlu1 %9083  ;;  %v2838_v34 = vsel %vm2837_vm14, %v8625_v12, %v8626_v63 }
 0x21c   : > { %7760 = vmatmul.mubr.msk.f32.vlgmr.msra.gmra.mrb[0].mxu1 %vm435_vm4, %v7128_v26  ;;  %v9070_v26 = vunpack.i.l.bf16 %v10199_v35  ;;  %v8855_v35 = vunpack.i.l.bf16 %v10096_v3 }
 0x21d   : > { %9298 = vrot.lane.b32.xlu0 %v9642_v16, %s9472_s28  ;;  %8255 = vmatpush3.bf16.msra.mxu1 %v8254_v24  ;;  %v8746_v24 = vunpack.i.h.bf16 %v9842_v47  ;;  %v8260_v47 = vpack.c.bf16 %v2738_v2, %v2737_v20  ;;  %v8885_v20 = vunpack.i.l.bf16 %v10180_v33 }
 0x21e   : > { %9293 = vrot.lane.b32.xlu1 %v9606_v11, %s9471_s19  ;;  %8256 = vmatprep.subr.bf16.mxu1 %v11397_v58  ;;  %v2740_v25 = vsel %vm11362_vm13, %v9070_v26, %v9071_v9  ;;  %v2739_v3 = vsel %vm11362_vm13, %v8855_v35, %v8856_v13  ;;  %v8660_v26 = vunpack.i.l.bf16 %v9899_v5  ;;  %vm11365_vm13 = vcmask 998400  }
 0x21f   : > { %v10270_v43 = vpop.permute.xlu0 %8908  ;;  %v10272_v44 = vpop.permute.xlu1 %9088  ;;  %7770 = vmatprep.mubr.msk.f32.mxu1 %vm9433_vm0, %v11401_v0  ;;  %v2839_v42 = vsel %vm2837_vm14, %v8745_v23, %v8746_v24  ;;  %v8263_v9 = vpack.c.bf16 %v2740_v25, %v2739_v3  ;;  %v8661_v23 = vunpack.i.h.bf16 %v9899_v5  ;;  %v8781_v24 = vunpack.i.h.bf16 %v9901_v7 }
 0x220   : > { %v8266_v12 = vpack.c.bf16 %v2839_v42, %v2838_v34  ;;  %v8630_v5 = vunpack.i.l.bf16 %v9848_v48  ;;  %v9076_v25 = vunpack.i.h.bf16 %v10221_v59  ;;  %v9075_v34 = vunpack.i.l.bf16 %v10221_v59 }
 0x221   : > { %9308 = vrot.lane.b32.xlu0 %v9716_v21, %s9471_s19  ;;  %8258 = vmatpush3.bf16.msra.mxu1 %v8257_v19  ;;  %v8886_v19 = vunpack.i.h.bf16 %v10180_v33  ;;  %v7132_v33 = vld [vmem:[%s11290_s2 + $0xb8] sm:$0xff]  ;;  %v526_v29 = vsel %vm525_vm12, %v8660_v26, %v8661_v23  ;;  %v8636_v26 = vunpack.i.h.bf16 %v9856_v50 }
 0x222   : > { %9303 = vrot.lane.b32.xlu1 %v9646_v17, %s9472_s28  ;;  %8259 = vmatprep.subr.bf16.mxu1 %v11397_v58 }
 0x223   : > { %v10294_v46 = vpop.permute.xlu0 %8923  ;;  %v429_v42 = vsel %vm426_vm2, %v8885_v20, %v8886_v19  ;;  %v7087_v20 = vld [vmem:[%s11290_s2 + $0x8] sm:$0xff] }
 0x224   : > { %v10297_v6 = vpop.permute.xlu1 %9093  ;;  %7771 = vmatmul.mubr.msk.f32.vlgmr.msra.gmra.mrb[0].mxu1 %vm435_vm4, %v7130_v28  ;;  %v8780_v28 = vunpack.i.l.bf16 %v9901_v7  ;;  %v8750_v7 = vunpack.i.l.bf16 %v9850_v49 }
 0x225   : > { %9318 = vrot.lane.b32.xlu0 %v9774_v30, %s9472_s28  ;;  %8261 = vmatpush3.bf16.msra.mxu1 %v8260_v47  ;;  %v8631_v47 = vunpack.i.h.bf16 %v9848_v48  ;;  %v8861_v48 = vunpack.i.h.bf16 %v10108_v62 }
 0x226   : > { %9313 = vrot.lane.b32.xlu1 %v9724_v22, %s9471_s19  ;;  %8262 = vmatprep.subr.bf16.mxu1 %v11397_v58  ;;  %s11413_s19 = smov 5  }
 0x227   : > { %v10310_v2 = vpop.permute.xlu0 %8928  ;;  %7781 = vmatprep.mubr.msk.f32.mxu1 %vm9433_vm0, %v11401_v0  ;;  %v2939_v19 = vsel %vm11364_vm15, %v8630_v5, %v8631_v47 }
 0x228   : > { %v9099_v63 = vpop.permute.xlu1 %9098 }
 0x229   : > { %v9101_v13 = vunpack.i.h.bf16 %v9099_v63  ;;  %v9100_v35 = vunpack.i.l.bf16 %v9099_v63  ;;  %9328 = vrot.lane.b32.xlu0 %v9598_v8, %s11366_s20  ;;  %8264 = vmatpush3.bf16.msra.mxu1 %v8263_v9  ;;  %v8751_v8 = vunpack.i.h.bf16 %v9850_v49  ;;  %v8860_v63 = vunpack.i.l.bf16 %v10108_v62 }
 0x22a   : > { %9323 = vrot.lane.b32.xlu1 %v9834_v45, %s9472_s28  ;;  %8265 = vmatprep.subr.bf16.mxu1 %v11397_v58  ;;  %v527_v49 = vsel %vm525_vm12, %v8780_v28, %v8781_v24  ;;  %v2841_v62 = vsel %vm2837_vm14, %v9075_v34, %v9076_v25  ;;  %v8790_v25 = vunpack.i.l.bf16 %v9919_v56  ;;  %v9081_v34 = vunpack.i.h.bf16 %v10236_v40  ;;  %s11415_s28 = smov 3  }
 0x22b   : > { %v430_v3 = vsel %vm426_vm2, %v9100_v35, %v9101_v13  ;;  %v10334_v9 = vpop.permute.xlu0 %8933  ;;  %vm625_vm2 = vcmask 146432   ;;  %v2940_v23 = vsel %vm11364_vm15, %v8750_v7, %v8751_v8  ;;  %v2840_v28 = vsel %vm2837_vm14, %v8860_v63, %v8861_v48 }
 0x22c   : > { %v10338_v59 = vpop.permute.xlu1 %9103  ;;  %7782 = vmatmul.mubr.msk.f32.vlgmr.msra.gmra.mrb[0].mxu1 %vm435_vm4, %v7132_v33  ;;  %v8125_v60 = vpack.c.bf16 %v430_v3, %v429_v42  ;;  %v8128_v35 = vpack.c.bf16 %v527_v49, %v526_v29  ;;  %v8670_v33 = vunpack.i.l.bf16 %v9917_v15  ;;  %v8269_v5 = vpack.c.bf16 %v2841_v62, %v2840_v28 }
 0x22d   : > { %9338 = vrot.lane.b32.xlu0 %v9642_v16, %s9474_s26  ;;  %8267 = vmatpush3.bf16.msra.mxu1 %v8266_v12  ;;  %v8896_v16 = vunpack.i.h.bf16 %v10219_v31  ;;  %v8895_v12 = vunpack.i.l.bf16 %v10219_v31  ;;  %v9080_v29 = vunpack.i.l.bf16 %v10236_v40  ;;  %v8755_v8 = vunpack.i.l.bf16 %v9858_v51 }
 0x22e   : > { %9333 = vrot.lane.b32.xlu1 %v9606_v11, %s11366_s20  ;;  %8126 = vmatpush3.bf16.msra.mxu0 %v8125_v60  ;;  %v8635_v11 = vunpack.i.l.bf16 %v9856_v50  ;;  %v8671_v60 = vunpack.i.h.bf16 %v9917_v15  ;;  %v8791_v50 = vunpack.i.h.bf16 %v9919_v56  ;;  %v8756_v15 = vunpack.i.h.bf16 %v9858_v51  ;;  %v7134_v56 = vld [vmem:[%s11290_s2 + $0xc0] sm:$0xff] }
 0x22f   : > { %v10356_v24 = vpop.permute.xlu0 %8948  ;;  %8127 = vmatprep.subr.bf16.mxu0 %v11397_v58  ;;  %8268 = vmatprep.subr.bf16.mxu1 %v11397_v58  ;;  %v8865_v40 = vunpack.i.l.bf16 %v10128_v10  ;;  %v8272_v48 = vpack.c.bf16 %v2940_v23, %v2939_v19  ;;  %v2942_v62 = vsel %vm11364_vm15, %v9080_v29, %v9081_v34  ;;  %v391_v23 = vld [vmem:[%s11290_s2] sm:$0xff]  ;;  %v8871_v29 = vunpack.i.h.bf16 %v10140_v38 }
 0x230   : > { %v9109_v13 = vpop.permute.xlu1 %9108  ;;  %7792 = vmatprep.mubr.msk.f32.mxu1 %vm9433_vm0, %v11401_v0  ;;  %v626_v63 = vsel %vm625_vm2, %v8670_v33, %v8671_v60  ;;  %v627_v49 = vsel %vm625_vm2, %v8790_v25, %v8791_v50  ;;  %v8685_v33 = vunpack.i.l.bf16 %v9943_v18  ;;  %v8801_v50 = vunpack.i.h.bf16 %v9935_v61 }
 0x231   : > { %v9111_v31 = vunpack.i.h.bf16 %v9109_v13  ;;  %v9110_v47 = vunpack.i.l.bf16 %v9109_v13  ;;  %9348 = vrot.lane.b32.xlu0 %v9716_v21, %s11366_s20  ;;  %7529 = vmatmul.mubr.msk.f32.vlgmr.msra.gmra.mrb[10].mxu0 %vm435_vm4, %v7087_v20  ;;  %v528_v21 = vsel %vm525_vm12, %v8895_v12, %v8896_v16  ;;  %v3041_v20 = vsel %vm11365_vm13, %v8755_v8, %v8756_v15 }
 0x232   : > { %9343 = vrot.lane.b32.xlu1 %v9646_v17, %s9474_s26  ;;  %8129 = vmatpush3.bf16.msra.mxu0 %v8128_v35  ;;  %v8866_v17 = vunpack.i.h.bf16 %v10128_v10  ;;  %v3040_v10 = vsel %vm11365_vm13, %v8635_v11, %v8636_v26  ;;  %v8906_v16 = vunpack.i.h.bf16 %v10255_v57  ;;  %v8641_v12 = vunpack.i.h.bf16 %v9864_v52 }
 0x233   : > { %v529_v7 = vsel %vm525_vm12, %v9110_v47, %v9111_v31  ;;  %8270 = vmatpush3.bf16.msra.mxu1 %v8269_v5  ;;  %v10379_v42 = vpop.permute.xlu0 %8963  ;;  %8130 = vmatprep.subr.bf16.mxu0 %v11397_v58  ;;  %vm3140_vm12 = vcmask 990208   ;;  %v8761_v26 = vunpack.i.h.bf16 %v9866_v53  ;;  %v8134_v13 = vpack.c.bf16 %v627_v49, %v626_v63  ;;  %v7090_v63 = vld [vmem:[%s11290_s2 + $0x10] sm:$0xff] }
 0x234   : > { %v10387_v3 = vpop.permute.xlu1 %9113  ;;  %8271 = vmatprep.subr.bf16.mxu1 %v11397_v58  ;;  %v8131_v51 = vpack.c.bf16 %v529_v7, %v528_v21  ;;  %7539 = vmatprep.mubr.msk.f32.mxu0 %vm9433_vm0, %v11401_v0  ;;  %v2941_v11 = vsel %vm11364_vm15, %v8865_v40, %v8866_v17  ;;  %v9086_v31 = vunpack.i.h.bf16 %v10257_v14  ;;  %v9085_v47 = vunpack.i.l.bf16 %v10257_v14  ;;  %v7136_v14 = vld [vmem:[%s11290_s2 + $0xc8] sm:$0xff] }
 0x235   : > { %9358 = vrot.lane.b32.xlu0 %v9774_v30, %s9474_s26  ;;  %v8905_v30 = vunpack.i.l.bf16 %v10255_v57  ;;  %v8275_v35 = vpack.c.bf16 %v2942_v62, %v2941_v11  ;;  %v8760_v5 = vunpack.i.l.bf16 %v9866_v53  ;;  %v8870_v53 = vunpack.i.l.bf16 %v10140_v38 }
 0x236   : > { %7793 = vmatmul.mubr.msk.f32.vlgmr.msra.gmra.mrb[0].mxu1 %vm435_vm4, %v7134_v56  ;;  %9353 = vrot.lane.b32.xlu1 %v9724_v22, %s11366_s20  ;;  %v8640_v22 = vunpack.i.l.bf16 %v9864_v52  ;;  %v8686_v52 = vunpack.i.h.bf16 %v9943_v18  ;;  %v8278_v21 = vpack.c.bf16 %v3041_v20, %v3040_v10  ;;  %vm11367_vm15 = vcmask 982016  }
 0x237   : > { %8132 = vmatpush3.bf16.msra.mxu0 %v8131_v51  ;;  %8273 = vmatpush3.bf16.msra.mxu1 %v8272_v48  ;;  %v10404_v19 = vpop.permute.xlu0 %8968  ;;  %v628_v25 = vsel %vm625_vm2, %v8905_v30, %v8906_v16  ;;  %v3043_v7 = vsel %vm11365_vm13, %v9085_v47, %v9086_v31  ;;  %v3142_v56 = vsel %vm3140_vm12, %v8760_v5, %v8761_v26  ;;  %v8646_v17 = vunpack.i.h.bf16 %v9872_v54 }
 0x238   : > { %v9119_v60 = vpop.permute.xlu1 %9118  ;;  %8133 = vmatprep.subr.bf16.mxu0 %v11397_v58  ;;  %8274 = vmatprep.subr.bf16.mxu1 %v11397_v58  ;;  %v8926_v40 = vunpack.i.h.bf16 %v10294_v46  ;;  %v8925_v51 = vunpack.i.l.bf16 %v10294_v46  ;;  %v8645_v49 = vunpack.i.l.bf16 %v9872_v54  ;;  %v8766_v62 = vunpack.i.h.bf16 %v9874_v55 }
 0x239   : > { %v9121_v57 = vunpack.i.h.bf16 %v9119_v60  ;;  %v9120_v28 = vunpack.i.l.bf16 %v9119_v60  ;;  %7803 = vmatprep.mubr.msk.f32.mxu1 %vm9433_vm0, %v11401_v0  ;;  %4547 = vrot.lane.b32.xlu0 %v11401_v0, %s11409_s17  ;;  %v3042_v20 = vsel %vm11365_vm13, %v8870_v53, %v8871_v29  ;;  %v9091_v54 = vunpack.i.h.bf16 %v10272_v44  ;;  %v7092_v29 = vld [vmem:[%s11290_s2 + $0x18] sm:$0xff] }
 0x23a   : > { %9363 = vrot.lane.b32.xlu1 %v9834_v45, %s9474_s26  ;;  %7540 = vmatmul.mubr.msk.f32.vlgmr.msra.gmra.mrb[10].mxu0 %vm435_vm4, %v391_v23  ;;  %v8800_v45 = vunpack.i.l.bf16 %v9935_v61  ;;  %v3141_v61 = vsel %vm3140_vm12, %v8640_v22, %v8641_v12  ;;  %v8281_v12 = vpack.c.bf16 %v3043_v7, %v3042_v20  ;;  %v9090_v22 = vunpack.i.l.bf16 %v10272_v44  ;;  %v7138_v44 = vld [vmem:[%s11290_s2 + $0xd0] sm:$0xff]  ;;  %s11428_s26 = smov 126  }
 0x23b   : > { %v629_v34 = vsel %vm625_vm2, %v9120_v28, %v9121_v57  ;;  %8135 = vmatpush3.bf16.msra.mxu0 %v8134_v13  ;;  %8276 = vmatpush3.bf16.msra.mxu1 %v8275_v35  ;;  %v10430_v18 = vpop.permute.xlu0 %8973  ;;  %vm726_vm2 = vcmask 138240   ;;  %v8936_v26 = vunpack.i.h.bf16 %v10334_v9  ;;  %v8935_v11 = vunpack.i.l.bf16 %v10334_v9 }
 0x23c   : > { %v10438_v15 = vpop.permute.xlu1 %9123  ;;  %8136 = vmatprep.subr.bf16.mxu0 %v11397_v58  ;;  %8277 = vmatprep.subr.bf16.mxu1 %v11397_v58  ;;  %v8137_v8 = vpack.c.bf16 %v629_v34, %v628_v25  ;;  %v727_v38 = vsel %vm726_vm2, %v8685_v33, %v8686_v52  ;;  %v728_v10 = vsel %vm726_vm2, %v8800_v45, %v8801_v50  ;;  %v8765_v60 = vunpack.i.l.bf16 %v9874_v55 }
 0x23d   : > { %7550 = vmatprep.mubr.msk.f32.mxu0 %vm9433_vm0, %v11401_v0  ;;  %4626 = vrot.lane.b32.xlu0 %v11401_v0, %s11366_s20  ;;  %v8140_v23 = vpack.c.bf16 %v728_v10, %v727_v38  ;;  %v8946_v57 = vunpack.i.h.bf16 %v9986_v27  ;;  %v729_v28 = vsel %vm726_vm2, %v8925_v51, %v8926_v40  ;;  %v8945_v9 = vunpack.i.l.bf16 %v9986_v27  ;;  %s11417_s20 = smov 2  }
 0x23e   : > { %7804 = vmatmul.mubr.msk.f32.vlgmr.msra.gmra.mrb[0].mxu1 %vm435_vm4, %v7136_v14  ;;  %v8876_v52 = vunpack.i.h.bf16 %v10158_v4  ;;  %v8875_v55 = vunpack.i.l.bf16 %v10158_v4  ;;  %v8284_v47 = vpack.c.bf16 %v3142_v56, %v3141_v61  ;;  %v3242_v27 = vsel %vm11367_vm15, %v8645_v49, %v8646_v17 }
 0x23f   : > { %8138 = vmatpush3.bf16.msra.mxu0 %v8137_v8  ;;  %8279 = vmatpush3.bf16.msra.mxu1 %v8278_v21  ;;  %v10454_v48 = vpop.permute.xlu0 %8988  ;;  %vm11368_vm13 = vcmask 973824   ;;  %v3144_v4 = vsel %vm3140_vm12, %v9090_v22, %v9091_v54  ;;  %v3243_v50 = vsel %vm11367_vm15, %v8765_v60, %v8766_v62  ;;  %v8656_v25 = vunpack.i.h.bf16 %v9886_v1  ;;  %v11412_v8 = vld [vmem:[#allocation10_spill] sm:$0xff] }
 0x240   : > { %v9129_v16 = vpop.permute.xlu1 %9128  ;;  %8139 = vmatprep.subr.bf16.mxu0 %v11397_v58  ;;  %8280 = vmatprep.subr.bf16.mxu1 %v11397_v58  ;;  %v8966_v34 = vunpack.i.h.bf16 %v10379_v42  ;;  %v8965_v14 = vunpack.i.l.bf16 %v10379_v42  ;;  %v8655_v53 = vunpack.i.l.bf16 %v9886_v1  ;;  %v8776_v21 = vunpack.i.h.bf16 %v11412_v8 }
 0x241   : > { %v9131_v46 = vunpack.i.h.bf16 %v9129_v16  ;;  %v9130_v30 = vunpack.i.l.bf16 %v9129_v16  ;;  %7814 = vmatprep.mubr.msk.f32.mxu1 %vm9433_vm0, %v11401_v0  ;;  %4707 = vrot.lane.b32.xlu0 %v11401_v0, %s11410_s15  ;;  %v3143_v38 = vsel %vm3140_vm12, %v8875_v55, %v8876_v52  ;;  %v9096_v1 = vunpack.i.h.bf16 %v10297_v6 }
 0x242   : > { %7551 = vmatmul.mubr.msk.f32.vlgmr.msra.gmra.mrb[10].mxu0 %vm435_vm4, %v7090_v63  ;;  %v8287_v40 = vpack.c.bf16 %v3144_v4, %v3143_v38  ;;  %v9095_v51 = vunpack.i.l.bf16 %v10297_v6  ;;  %v8976_v63 = vunpack.i.h.bf16 %v10430_v18  ;;  %v8975_v49 = vunpack.i.l.bf16 %v10430_v18  ;;  %v7140_v6 = vld [vmem:[%s11290_s2 + $0xd8] sm:$0xff] }
 0x243   : > { %v730_v13 = vsel %vm726_vm2, %v9130_v30, %v9131_v46  ;;  %8141 = vmatpush3.bf16.msra.mxu0 %v8140_v23  ;;  %8282 = vmatpush3.bf16.msra.mxu1 %v8281_v12  ;;  %v10478_v35 = vpop.permute.xlu0 %9003  ;;  %vm827_vm2 = vcmask 130048   ;;  %v8775_v62 = vunpack.i.l.bf16 %v11412_v8  ;;  %v8986_v10 = vunpack.i.h.bf16 %v10046_v32 }
 0x244   : > { %v10486_v33 = vpop.permute.xlu1 %9133  ;;  %8142 = vmatprep.subr.bf16.mxu0 %v11397_v58  ;;  %8283 = vmatprep.subr.bf16.mxu1 %v11397_v58  ;;  %v8143_v31 = vpack.c.bf16 %v730_v13, %v729_v28  ;;  %v828_v5 = vsel %vm827_vm2, %v8935_v11, %v8936_v26  ;;  %v829_v61 = vsel %vm827_vm2, %v8945_v9, %v8946_v57  ;;  %v8985_v18 = vunpack.i.l.bf16 %v10046_v32  ;;  %v7094_v28 = vld [vmem:[%s11290_s2 + $0x20] sm:$0xff] }
 0x245   : > { %7561 = vmatprep.mubr.msk.f32.mxu0 %vm9433_vm0, %v11401_v0  ;;  %4789 = vrot.lane.b32.xlu0 %v11401_v0, %s11411_s16  ;;  %v8146_v17 = vpack.c.bf16 %v829_v61, %v828_v5  ;;  %v830_v20 = vsel %vm827_vm2, %v8965_v14, %v8966_v34  ;;  %v8881_v30 = vunpack.i.h.bf16 %v10168_v37  ;;  %v8880_v23 = vunpack.i.l.bf16 %v10168_v37 }
 0x246   : > { %7815 = vmatmul.mubr.msk.f32.vlgmr.msra.gmra.mrb[0].mxu1 %vm435_vm4, %v7138_v44  ;;  %v8290_v22 = vpack.c.bf16 %v3243_v50, %v3242_v27  ;;  %v3245_v32 = vsel %vm11367_vm15, %v9095_v51, %v9096_v1  ;;  %v3343_v37 = vsel %vm11368_vm13, %v8655_v53, %v8656_v25  ;;  %v9006_v11 = vunpack.i.h.bf16 %v10478_v35  ;;  %v7142_v53 = vld [vmem:[%s11290_s2 + $0xe0] sm:$0xff] }
 0x247   : > { %8144 = vmatpush3.bf16.msra.mxu0 %v8143_v31  ;;  %8285 = vmatpush3.bf16.msra.mxu1 %v8284_v47  ;;  %v10502_v45 = vpop.permute.xlu0 %9008  ;;  %v9005_v60 = vunpack.i.l.bf16 %v10478_v35  ;;  %v3344_v13 = vsel %vm11368_vm13, %v8775_v62, %v8776_v21  ;;  %v3244_v9 = vsel %vm11367_vm15, %v8880_v23, %v8881_v30  ;;  %v9106_v27 = vunpack.i.h.bf16 %v10338_v59 }
 0x248   : > { %v9139_v7 = vpop.permute.xlu1 %9138  ;;  %8145 = vmatprep.subr.bf16.mxu0 %v11397_v58  ;;  %8286 = vmatprep.subr.bf16.mxu1 %v11397_v58  ;;  %v8293_v47 = vpack.c.bf16 %v3245_v32, %v3244_v9  ;;  %v9105_v4 = vunpack.i.l.bf16 %v10338_v59  ;;  %v9026_v25 = vunpack.i.h.bf16 %v10110_v36  ;;  %v9025_v59 = vunpack.i.l.bf16 %v10110_v36  ;;  %v11418_v36 = vld [vmem:[#allocation12_spill] sm:$0xff] }
 0x249   : > { %v9141_v42 = vunpack.i.h.bf16 %v9139_v7  ;;  %v9140_v56 = vunpack.i.l.bf16 %v9139_v7  ;;  %7825 = vmatprep.mubr.msk.f32.mxu1 %vm9433_vm0, %v11401_v0  ;;  %4871 = vrot.lane.b32.xlu0 %v11401_v0, %s11413_s19  ;;  %v8891_v8 = vunpack.i.h.bf16 %v10197_v39  ;;  %v8890_v21 = vunpack.i.l.bf16 %v10197_v39  ;;  %v11416_v7 = vld [vmem:[#allocation11_spill] sm:$0xff] }
 0x24a   : > { %7562 = vmatmul.mubr.msk.f32.vlgmr.msra.gmra.mrb[10].mxu0 %vm435_vm4, %v7092_v29  ;;  %v8786_v39 = vunpack.i.h.bf16 %v11418_v36  ;;  %v3346_v1 = vsel %vm11368_vm13, %v9105_v4, %v9106_v27  ;;  %vm11369_vm15 = vcmask 965632   ;;  %v9116_v32 = vunpack.i.h.bf16 %v10387_v3 }
 0x24b   : > { %v831_v16 = vsel %vm827_vm2, %v9140_v56, %v9141_v42  ;;  %8147 = vmatpush3.bf16.msra.mxu0 %v8146_v17  ;;  %8288 = vmatpush3.bf16.msra.mxu1 %v8287_v40  ;;  %v10526_v46 = vpop.permute.xlu0 %9013  ;;  %vm928_vm2 = vcmask 121856   ;;  %v8666_v42 = vunpack.i.h.bf16 %v11416_v7  ;;  %v8665_v56 = vunpack.i.l.bf16 %v11416_v7 }
 0x24c   : > { %v10534_v12 = vpop.permute.xlu1 %9143  ;;  %8148 = vmatprep.subr.bf16.mxu0 %v11397_v58  ;;  %8289 = vmatprep.subr.bf16.mxu1 %v11397_v58  ;;  %v8149_v54 = vpack.c.bf16 %v831_v16, %v830_v20  ;;  %v929_v26 = vsel %vm928_vm2, %v8975_v49, %v8976_v63  ;;  %v930_v44 = vsel %vm928_vm2, %v8985_v18, %v8986_v10  ;;  %v9016_v5 = vunpack.i.h.bf16 %v10526_v46  ;;  %v7096_v10 = vld [vmem:[%s11290_s2 + $0x28] sm:$0xff] }
 0x24d   : > { %7572 = vmatprep.mubr.msk.f32.mxu0 %vm9433_vm0, %v11401_v0  ;;  %4953 = vrot.lane.b32.xlu0 %v11401_v0, %s11414_s18  ;;  %v8152_v31 = vpack.c.bf16 %v930_v44, %v929_v26  ;;  %v9015_v50 = vunpack.i.l.bf16 %v10526_v46  ;;  %v931_v34 = vsel %vm928_vm2, %v9005_v60, %v9006_v11  ;;  %v8296_v17 = vpack.c.bf16 %v3344_v13, %v3343_v37 }
 0x24e   : > { %7826 = vmatmul.mubr.msk.f32.vlgmr.msra.gmra.mrb[0].mxu1 %vm435_vm4, %v7140_v6  ;;  %v8785_v40 = vunpack.i.l.bf16 %v11418_v36  ;;  %v3345_v16 = vsel %vm11368_vm13, %v8890_v21, %v8891_v8  ;;  %v9115_v26 = vunpack.i.l.bf16 %v10387_v3  ;;  %v8901_v13 = vunpack.i.h.bf16 %v10234_v41 }
 0x24f   : > { %8150 = vmatpush3.bf16.msra.mxu0 %v8149_v54  ;;  %8291 = vmatpush3.bf16.msra.mxu1 %v8290_v22  ;;  %v10548_v57 = vpop.permute.xlu0 %9028  ;;  %v8299_v23 = vpack.c.bf16 %v3346_v1, %v3345_v16  ;;  %v3444_v54 = vsel %vm11369_vm15, %v8665_v56, %v8666_v42  ;;  %v8900_v44 = vunpack.i.l.bf16 %v10234_v41  ;;  %vm1130_vm13 = vcmask 105472  }
 0x250   : > { %v9149_v52 = vpop.permute.xlu1 %9148  ;;  %8151 = vmatprep.subr.bf16.mxu0 %v11397_v58  ;;  %8292 = vmatprep.subr.bf16.mxu1 %v11397_v58  ;;  %v3445_v22 = vsel %vm11369_vm15, %v8785_v40, %v8786_v39  ;;  %v3447_v41 = vsel %vm11369_vm15, %v9115_v26, %v9116_v32  ;;  %v9126_v7 = vunpack.i.h.bf16 %v10438_v15  ;;  %v9125_v42 = vunpack.i.l.bf16 %v10438_v15  ;;  %v7146_v39 = vld [vmem:[%s11290_s2 + $0xf0] sm:$0xff] }
 0x251   : > { %v9151_v35 = vunpack.i.h.bf16 %v9149_v52  ;;  %v9150_v55 = vunpack.i.l.bf16 %v9149_v52  ;;  %7836 = vmatprep.mubr.msk.f32.mxu1 %vm9433_vm0, %v11401_v0  ;;  %5035 = vrot.lane.b32.xlu0 %v11401_v0, %s11415_s28  ;;  %v11420_v52 = vld [vmem:[#allocation13_spill] sm:$0xff]  ;;  %v8911_v40 = vunpack.i.h.bf16 %v10270_v43  ;;  %v8910_v1 = vunpack.i.l.bf16 %v10270_v43  ;;  %v11423_v43 = vld [vmem:[#allocation15_spill] sm:$0xff] }
 0x252   : > { %7573 = vmatmul.mubr.msk.f32.vlgmr.msra.gmra.mrb[10].mxu0 %vm435_vm4, %v7094_v28  ;;  %v7144_v28 = vld [vmem:[%s11290_s2 + $0xe8] sm:$0xff] }
 0x253   : > { %v932_v14 = vsel %vm928_vm2, %v9150_v55, %v9151_v35  ;;  %8153 = vmatpush3.bf16.msra.mxu0 %v8152_v31  ;;  %8294 = vmatpush3.bf16.msra.mxu1 %v8293_v47  ;;  %v9044_v29 = vpop.permute.xlu0 %9043  ;;  %vm1029_vm2 = vcmask 113664   ;;  %v8676_v35 = vunpack.i.h.bf16 %v11420_v52  ;;  %v8302_v55 = vpack.c.bf16 %v3445_v22, %v3444_v54  ;;  %v11421_v47 = vld [vmem:[#allocation14_spill] sm:$0xff] }
 0x254   : > { %v10576_v61 = vpop.permute.xlu1 %9153  ;;  %8154 = vmatprep.subr.bf16.mxu0 %v11397_v58  ;;  %8295 = vmatprep.subr.bf16.mxu1 %v11397_v58  ;;  %v8155_v38 = vpack.c.bf16 %v932_v14, %v931_v34  ;;  %v1030_v51 = vsel %vm1029_vm2, %v9015_v50, %v9016_v5  ;;  %v9046_v63 = vunpack.i.h.bf16 %v9044_v29  ;;  %v9045_v49 = vunpack.i.l.bf16 %v9044_v29  ;;  %v7098_v34 = vld [vmem:[%s11290_s2 + $0x30] sm:$0xff] }
 0x255   : > { %7583 = vmatprep.mubr.msk.f32.mxu0 %vm9433_vm0, %v11401_v0  ;;  %5117 = vrot.lane.b32.xlu0 %v11401_v0, %s11417_s20  ;;  %v1031_v20 = vsel %vm1029_vm2, %v9025_v59, %v9026_v25  ;;  %v8675_v31 = vunpack.i.l.bf16 %v11420_v52  ;;  %v8796_v27 = vunpack.i.h.bf16 %v11421_v47  ;;  %v8795_v4 = vunpack.i.l.bf16 %v11421_v47  ;;  %v7148_v52 = vld [vmem:[%s11290_s2 + $0xf8] sm:$0xff] }
 0x256   : > { %7837 = vmatmul.mubr.msk.f32.vlgmr.msra.gmra.mrb[0].mxu1 %vm435_vm4, %v7142_v53  ;;  %v8158_v30 = vpack.c.bf16 %v1031_v20, %v1030_v51  ;;  %v1032_v37 = vsel %vm1029_vm2, %v9045_v49, %v9046_v63  ;;  %v3446_v14 = vsel %vm11369_vm15, %v8900_v44, %v8901_v13  ;;  %v11422_v49 = vld [vmem:[#allocation16_spill] sm:$0xff]  ;;  %vm3645_vm15 = vcmask 949248  }
 0x257   : > { %8156 = vmatpush3.bf16.msra.mxu0 %v8155_v38  ;;  %8297 = vmatpush3.bf16.msra.mxu1 %v8296_v17  ;;  %v10591_v62 = vpop.permute.xlu0 %9048  ;;  %v8305_v8 = vpack.c.bf16 %v3447_v41, %v3446_v14  ;;  %v8920_v20 = vunpack.i.l.bf16 %v11422_v49  ;;  %v8950_v41 = vunpack.i.l.bf16 %v10356_v24 }
 0x258   : > { %v9159_v46 = vpop.permute.xlu1 %9158  ;;  %8157 = vmatprep.subr.bf16.mxu0 %v11397_v58  ;;  %8298 = vmatprep.subr.bf16.mxu1 %v11397_v58 }
 0x259   : > { %v9161_v6 = vunpack.i.h.bf16 %v9159_v46  ;;  %v9160_v18 = vunpack.i.l.bf16 %v9159_v46  ;;  %7847 = vmatprep.mubr.msk.f32.mxu1 %vm9433_vm0, %v11401_v0  ;;  %5199 = vrot.lane.b32.xlu0 %v11401_v0, %s11419_s1 }
 0x25a   : > { %7584 = vmatmul.mubr.msk.f32.vlgmr.msra.gmra.mrb[10].mxu0 %vm435_vm4, %v7096_v10  ;;  %v8921_v10 = vunpack.i.h.bf16 %v11422_v49  ;;  %v8970_v49 = vunpack.i.l.bf16 %v10404_v19 }
 0x25b   : > { %v1033_v11 = vsel %vm1029_vm2, %v9160_v18, %v9161_v6  ;;  %8159 = vmatpush3.bf16.msra.mxu0 %v8158_v30  ;;  %8300 = vmatpush3.bf16.msra.mxu1 %v8299_v23  ;;  %v9169_v60 = vpop.permute.xlu0 %9168  ;;  %vm3544_vm2 = vcmask 957440   ;;  %v8691_v30 = vunpack.i.h.bf16 %v11423_v43  ;;  %v8690_v23 = vunpack.i.l.bf16 %v11423_v43 }
 0x25c   : > { %v10616_v9 = vpop.permute.xlu1 %9163  ;;  %8160 = vmatprep.subr.bf16.mxu0 %v11397_v58  ;;  %8301 = vmatprep.subr.bf16.mxu1 %v11397_v58  ;;  %v8161_v3 = vpack.c.bf16 %v1033_v11, %v1032_v37  ;;  %v9171_v5 = vunpack.i.h.bf16 %v9169_v60  ;;  %v9170_v50 = vunpack.i.l.bf16 %v9169_v60  ;;  %v3545_v21 = vsel %vm3544_vm2, %v8675_v31, %v8676_v35 }
 0x25d   : > { %7594 = vmatprep.mubr.msk.f32.mxu0 %vm9433_vm0, %v11401_v0  ;;  %v3546_v38 = vsel %vm3544_vm2, %v8795_v4, %v8796_v27  ;;  %v3548_v16 = vsel %vm3544_vm2, %v9125_v42, %v9126_v7  ;;  %v3547_v54 = vsel %vm3544_vm2, %v8910_v1, %v8911_v40  ;;  %v3647_v11 = vsel %vm3645_vm15, %v8920_v20, %v8921_v10  ;;  %v7150_v1 = vld [vmem:[%s11290_s2 + $0x100] sm:$0xff] }
 0x25e   : > { %7848 = vmatmul.mubr.msk.f32.vlgmr.msra.gmra.mrb[0].mxu1 %vm435_vm4, %v7144_v28  ;;  %v1131_v56 = vsel %vm1130_vm13, %v9170_v50, %v9171_v5  ;;  %v8308_v63 = vpack.c.bf16 %v3546_v38, %v3545_v21  ;;  %v8311_v37 = vpack.c.bf16 %v3548_v16, %v3547_v54  ;;  %v9136_v60 = vunpack.i.h.bf16 %v10486_v33  ;;  %v7100_v50 = vld [vmem:[%s11290_s2 + $0x38] sm:$0xff] }
 0x25f   : > { %8162 = vmatpush3.bf16.msra.mxu0 %v8161_v3  ;;  %8303 = vmatpush3.bf16.msra.mxu1 %v8302_v55  ;;  %v10628_v25 = vpop.permute.xlu0 %9178  ;;  %v9135_v28 = vunpack.i.l.bf16 %v10486_v33  ;;  %v3646_v35 = vsel %vm3645_vm15, %v8690_v23, %v8691_v30  ;;  %v8931_v55 = vunpack.i.h.bf16 %v10310_v2  ;;  %v8930_v31 = vunpack.i.l.bf16 %v10310_v2 }
 0x260   : > { %v9174_v29 = vpop.permute.xlu1 %9173  ;;  %8304 = vmatprep.subr.bf16.mxu1 %v11397_v58  ;;  %7858 = vmatprep.mubr.msk.f32.mxu1 %vm9433_vm0, %v11401_v0  ;;  %v8314_v33 = vpack.c.bf16 %v3647_v11, %v3646_v35  ;;  %v8951_v4 = vunpack.i.h.bf16 %v10356_v24  ;;  %vm3746_vm2 = vcmask 941056   ;;  %v8991_v16 = vunpack.i.h.bf16 %v10454_v48  ;;  %v7152_v35 = vld [vmem:[%s11290_s2 + $0x108] sm:$0xff] }
 0x261   : > { %v9176_v53 = vunpack.i.h.bf16 %v9174_v29  ;;  %v9175_v59 = vunpack.i.l.bf16 %v9174_v29  ;;  %8163 = vmatprep.subr.bf16.mxu0 %v11397_v58  ;;  %v3649_v5 = vsel %vm3645_vm15, %v9135_v28, %v9136_v60  ;;  %v11424_v29 = vld [vmem:[#allocation17_spill] sm:$0xff]  ;;  %v9156_v28 = vunpack.i.h.bf16 %v10576_v61 }
 0x262   : > { %7595 = vmatmul.mubr.msk.f32.vlgmr.msra.gmra.mrb[10].mxu0 %vm435_vm4, %v7098_v34  ;;  %v8960_v24 = vunpack.i.l.bf16 %v11424_v29  ;;  %v3747_v42 = vsel %vm3746_vm2, %v8950_v41, %v8951_v4  ;;  %v9031_v41 = vunpack.i.h.bf16 %v10548_v57 }
 0x263   : > { %v1132_v17 = vsel %vm1130_vm13, %v9175_v59, %v9176_v53  ;;  %8306 = vmatpush3.bf16.msra.mxu1 %v8305_v8  ;;  %v9189_v36 = vpop.permute.xlu0 %9188  ;;  %7605 = vmatprep.mubr.msk.f32.mxu0 %vm9433_vm0, %v11401_v0  ;;  %v8961_v53 = vunpack.i.h.bf16 %v11424_v29  ;;  %v3648_v59 = vsel %vm3645_vm15, %v8930_v31, %v8931_v55  ;;  %vm3847_vm15 = vcmask 932864  }
 0x264   : > { %v8164_v15 = vpack.c.bf16 %v1132_v17, %v1131_v56  ;;  %v10652_v51 = vpop.permute.xlu1 %9183  ;;  %8307 = vmatprep.subr.bf16.mxu1 %v11397_v58  ;;  %v9191_v46 = vunpack.i.h.bf16 %v9189_v36  ;;  %v9190_v6 = vunpack.i.l.bf16 %v9189_v36  ;;  %v8317_v7 = vpack.c.bf16 %v3649_v5, %v3648_v59 }
 0x265   : > { %v9146_v56 = vunpack.i.h.bf16 %v10534_v12  ;;  %v9145_v17 = vunpack.i.l.bf16 %v10534_v12  ;;  %v9011_v31 = vunpack.i.h.bf16 %v10502_v45  ;;  %v9030_v5 = vunpack.i.l.bf16 %v10548_v57 }
 0x266   : > { %7859 = vmatmul.mubr.msk.f32.vlgmr.msra.gmra.mrb[0].mxu1 %vm435_vm4, %v7146_v39  ;;  %8165 = vmatpush3.bf16.msra.mxu0 %v8164_v15  ;;  %v1133_v13 = vsel %vm1130_vm13, %v9190_v6, %v9191_v46  ;;  %v3748_v15 = vsel %vm3746_vm2, %v8960_v24, %v8961_v53  ;;  %v8990_v46 = vunpack.i.l.bf16 %v10454_v48  ;;  %v11426_v53 = vld [vmem:[#allocation19_spill] sm:$0xff] }
 0x267   : > { %8309 = vmatpush3.bf16.msra.mxu1 %v8308_v63  ;;  %v10659_v18 = vpop.permute.xlu0 %9198  ;;  %7869 = vmatprep.mubr.msk.f32.mxu1 %vm9433_vm0, %v11401_v0  ;;  %v8971_v63 = vunpack.i.h.bf16 %v10404_v19  ;;  %v8320_v20 = vpack.c.bf16 %v3748_v15, %v3747_v42  ;;  %v3750_v6 = vsel %vm3746_vm2, %v9145_v17, %v9146_v56  ;;  %v11425_v19 = vld [vmem:[#allocation18_spill] sm:$0xff]  ;;  %v9041_v24 = vunpack.i.h.bf16 %v11426_v53  ;;  %v10769_v15 = vpop.f32.mrb[8].mxu0 }
 0x268   : > { %v9194_v22 = vpop.permute.xlu1 %9193  ;;  %8310 = vmatprep.subr.bf16.mxu1 %v11397_v58  ;;  %8166 = vmatprep.subr.bf16.mxu0 %v11397_v58  ;;  %v9001_v54 = vunpack.i.h.bf16 %v11425_v19  ;;  %v3848_v60 = vsel %vm3847_vm15, %v8990_v46, %v8991_v16  ;;  %v9040_v57 = vunpack.i.l.bf16 %v11426_v53  ;;  %v9166_v56 = vunpack.i.h.bf16 %v10616_v9  ;;  %v7519_v16 = vpop.f32.mrb[9].mxu0 }
 0x269   : > { %v9196_v32 = vunpack.i.h.bf16 %v9194_v22  ;;  %v9195_v26 = vunpack.i.l.bf16 %v9194_v22  ;;  %v9000_v22 = vunpack.i.l.bf16 %v11425_v19  ;;  %v9165_v17 = vunpack.i.l.bf16 %v10616_v9 }
 0x26a   : > { %v9050_v9 = vunpack.i.l.bf16 %v10591_v62 }
 0x26b   : > { %v1134_v44 = vsel %vm1130_vm13, %v9195_v26, %v9196_v32  ;;  %8312 = vmatpush3.bf16.msra.mxu1 %v8311_v37  ;;  %v9209_v3 = vpop.permute.xlu0 %9208  ;;  %vm1231_vm13 = vcmask 97280   ;;  %v3749_v32 = vsel %vm3746_vm2, %v8970_v49, %v8971_v63  ;;  %v3849_v55 = vsel %vm3847_vm15, %v9000_v22, %v9001_v54 }
 0x26c   : > { %v8167_v47 = vpack.c.bf16 %v1134_v44, %v1133_v13  ;;  %v10679_v27 = vpop.permute.xlu1 %9203  ;;  %8313 = vmatprep.subr.bf16.mxu1 %v11397_v58  ;;  %v9211_v2 = vunpack.i.h.bf16 %v9209_v3  ;;  %v9210_v34 = vunpack.i.l.bf16 %v9209_v3  ;;  %v8323_v11 = vpack.c.bf16 %v3750_v6, %v3749_v32 }
 0x26d   : > { %v9155_v13 = vunpack.i.l.bf16 %v10576_v61  ;;  %v8326_v61 = vpack.c.bf16 %v3849_v55, %v3848_v60  ;;  %vm3948_vm2 = vcmask 924672   ;;  %v9051_v49 = vunpack.i.h.bf16 %v10591_v62 }
 0x26e   : > { %7870 = vmatmul.mubr.msk.f32.vlgmr.msra.gmra.mrb[0].mxu1 %vm435_vm4, %v7148_v52  ;;  %8168 = vmatpush3.bf16.msra.mxu0 %v8167_v47  ;;  %v1232_v36 = vsel %vm1231_vm13, %v9210_v34, %v9211_v2  ;;  %v9010_v47 = vunpack.i.l.bf16 %v10502_v45  ;;  %v7102_v2 = vld [vmem:[%s11290_s2 + $0x40] sm:$0xff]  ;;  %v3949_v42 = vsel %vm3948_vm2, %v9030_v5, %v9031_v41  ;;  %v3950_v63 = vsel %vm3948_vm2, %v9040_v57, %v9041_v24 }
 0x26f   : > { %8315 = vmatpush3.bf16.msra.mxu1 %v8314_v33  ;;  %v10689_v14 = vpop.permute.xlu0 %9218  ;;  %7880 = vmatprep.mubr.msk.f32.mxu1 %vm9433_vm0, %v11401_v0  ;;  %v8332_v46 = vpack.c.bf16 %v3950_v63, %v3949_v42  ;;  %v3952_v6 = vsel %vm3948_vm2, %v9165_v17, %v9166_v56  ;;  %v3951_v22 = vsel %vm3948_vm2, %v9050_v9, %v9051_v49  ;;  %v9181_v32 = vunpack.i.h.bf16 %v10628_v25  ;;  %v7158_v17 = vld [vmem:[%s11290_s2 + $0x120] sm:$0xff] }
 0x270   : > { %v9214_v8 = vpop.permute.xlu1 %9213  ;;  %8316 = vmatprep.subr.bf16.mxu1 %v11397_v58  ;;  %8169 = vmatprep.subr.bf16.mxu0 %v11397_v58  ;;  %v3850_v59 = vsel %vm3847_vm15, %v9010_v47, %v9011_v31  ;;  %v9201_v55 = vunpack.i.h.bf16 %v10659_v18  ;;  %v9200_v31 = vunpack.i.l.bf16 %v10659_v18  ;;  %v9221_v53 = vunpack.i.h.bf16 %v10689_v14 }
 0x271   : > { %v9216_v21 = vunpack.i.h.bf16 %v9214_v8  ;;  %v9215_v38 = vunpack.i.l.bf16 %v9214_v8  ;;  %7606 = vmatmul.mubr.msk.f32.vlgmr.msra.gmra.mrb[10].mxu0 %vm435_vm4, %v7100_v50  ;;  %v3851_v50 = vsel %vm3847_vm15, %v9155_v13, %v9156_v28  ;;  %vm4049_vm15 = vcmask 916480  }
 0x272   : > { %7616 = vmatprep.mubr.msk.f32.mxu0 %vm9433_vm0, %v11401_v0  ;;  %v9206_v28 = vunpack.i.h.bf16 %v10679_v27  ;;  %v9205_v13 = vunpack.i.l.bf16 %v10679_v27  ;;  %vm4150_vm2 = vcmask 908288  }
 0x273   : > { %v1233_v39 = vsel %vm1231_vm13, %v9215_v38, %v9216_v21  ;;  %8318 = vmatpush3.bf16.msra.mxu1 %v8317_v7  ;;  %v9229_v40 = vpop.permute.xlu0 %9228  ;;  %v8329_v7 = vpack.c.bf16 %v3851_v50, %v3850_v59  ;;  %v7104_v50 = vld [vmem:[%s11290_s2 + $0x48] sm:$0xff] }
 0x274   : > { %v8170_v12 = vpack.c.bf16 %v1233_v39, %v1232_v36  ;;  %v10712_v10 = vpop.permute.xlu1 %9223  ;;  %8319 = vmatprep.subr.bf16.mxu1 %v11397_v58  ;;  %v9231_v43 = vunpack.i.h.bf16 %v9229_v40  ;;  %v9230_v30 = vunpack.i.l.bf16 %v9229_v40 }
 0x275   : > { %v9226_v41 = vunpack.i.h.bf16 %v10712_v10  ;;  %v9225_v5 = vunpack.i.l.bf16 %v10712_v10  ;;  %v9220_v10 = vunpack.i.l.bf16 %v10689_v14 }
 0x276   : > { %7881 = vmatmul.mubr.msk.f32.vlgmr.msra.gmra.mrb[0].mxu1 %vm435_vm4, %v7150_v1  ;;  %8171 = vmatpush3.bf16.msra.mxu0 %v8170_v12  ;;  %v1234_v44 = vsel %vm1231_vm13, %v9230_v30, %v9231_v43  ;;  %v7154_v1 = vld [vmem:[%s11290_s2 + $0x110] sm:$0xff]  ;;  %v9186_v43 = vunpack.i.h.bf16 %v10652_v51  ;;  %v9185_v30 = vunpack.i.l.bf16 %v10652_v51  ;;  %v8335_v51 = vpack.c.bf16 %v3952_v6, %v3951_v22 }
 0x277   : > { %8321 = vmatpush3.bf16.msra.mxu1 %v8320_v20  ;;  %v10719_v23 = vpop.permute.xlu0 %9238  ;;  %7891 = vmatprep.mubr.msk.f32.mxu1 %vm9433_vm0, %v11401_v0 }
 0x278   : > { %v9234_v48 = vpop.permute.xlu1 %9233  ;;  %8322 = vmatprep.subr.bf16.mxu1 %v11397_v58  ;;  %8172 = vmatprep.subr.bf16.mxu0 %v11397_v58  ;;  %v4051_v60 = vsel %vm4049_vm15, %v9185_v30, %v9186_v43 }
 0x279   : > { %v9236_v26 = vunpack.i.h.bf16 %v9234_v48  ;;  %v9235_v37 = vunpack.i.l.bf16 %v9234_v48  ;;  %v9180_v48 = vunpack.i.l.bf16 %v10628_v25 }
 0x27b   : > { %v1235_v3 = vsel %vm1231_vm13, %v9235_v37, %v9236_v26  ;;  %8324 = vmatpush3.bf16.msra.mxu1 %v8323_v11  ;;  %v9249_v52 = vpop.permute.xlu0 %9248  ;;  %vm1332_vm13 = vcmask 89088  }
 0x27c   : > { %v8173_v33 = vpack.c.bf16 %v1235_v3, %v1234_v44  ;;  %v10739_v4 = vpop.permute.xlu1 %9243  ;;  %8325 = vmatprep.subr.bf16.mxu1 %v11397_v58  ;;  %v9251_v45 = vunpack.i.h.bf16 %v9249_v52  ;;  %v9250_v34 = vunpack.i.l.bf16 %v9249_v52  ;;  %v7156_v52 = vld [vmem:[%s11290_s2 + $0x118] sm:$0xff] }
 0x27e   : > { %7892 = vmatmul.mubr.msk.f32.vlgmr.msra.gmra.mrb[0].mxu1 %vm435_vm4, %v7152_v35  ;;  %8174 = vmatpush3.bf16.msra.mxu0 %v8173_v33  ;;  %v1333_v36 = vsel %vm1332_vm13, %v9250_v34, %v9251_v45  ;;  %v4050_v35 = vsel %vm4049_vm15, %v9180_v48, %v9181_v32  ;;  %v4052_v34 = vsel %vm4049_vm15, %v9200_v31, %v9201_v55  ;;  %v7106_v31 = vld [vmem:[%s11290_s2 + $0x50] sm:$0xff] }
 0x27f   : > { %8327 = vmatpush3.bf16.msra.mxu1 %v8326_v61  ;;  %v10749_v29 = vpop.permute.xlu0 %9258  ;;  %7902 = vmatprep.mubr.msk.f32.mxu1 %vm9433_vm0, %v11401_v0  ;;  %v8338_v27 = vpack.c.bf16 %v4051_v60, %v4050_v35  ;;  %v4053_v61 = vsel %vm4049_vm15, %v9205_v13, %v9206_v28  ;;  %vm4251_vm15 = vcmask 900096  }
 0x280   : > { %v9254_v8 = vpop.permute.xlu1 %9253  ;;  %8328 = vmatprep.subr.bf16.mxu1 %v11397_v58  ;;  %8175 = vmatprep.subr.bf16.mxu0 %v11397_v58  ;;  %v8341_v57 = vpack.c.bf16 %v4053_v61, %v4052_v34  ;;  %v9261_v43 = vunpack.i.h.bf16 %v10749_v29  ;;  %v9260_v30 = vunpack.i.l.bf16 %v10749_v29 }
 0x281   : > { %v9256_v21 = vunpack.i.h.bf16 %v9254_v8  ;;  %v9255_v38 = vunpack.i.l.bf16 %v9254_v8  ;;  %7617 = vmatmul.mubr.msk.f32.vlgmr.msra.gmra.mrb[10].mxu0 %vm435_vm4, %v7102_v2 }
 0x282   : > { %7627 = vmatprep.mubr.msk.f32.mxu0 %vm9433_vm0, %v11401_v0  ;;  %v4252_v60 = vsel %vm4251_vm15, %v9260_v30, %v9261_v43 }
 0x283   : > { %v1334_v39 = vsel %vm1332_vm13, %v9255_v38, %v9256_v21  ;;  %8330 = vmatpush3.bf16.msra.mxu1 %v8329_v7  ;;  %v9269_v40 = vpop.permute.xlu0 %9268  ;;  %v4152_v21 = vsel %vm4150_vm2, %v9225_v5, %v9226_v41  ;;  %v9246_v38 = vunpack.i.h.bf16 %v10739_v4  ;;  %v9245_v7 = vunpack.i.l.bf16 %v10739_v4 }
 0x284   : > { %v8176_v12 = vpack.c.bf16 %v1334_v39, %v1333_v36  ;;  %v10774_v20 = vpop.permute.xlu1 %9263  ;;  %8331 = vmatprep.subr.bf16.mxu1 %v11397_v58  ;;  %v9271_v19 = vunpack.i.h.bf16 %v9269_v40  ;;  %v9270_v54 = vunpack.i.l.bf16 %v9269_v40  ;;  %v4151_v36 = vsel %vm4150_vm2, %v9220_v10, %v9221_v53 }
 0x285   : > { %v9241_v39 = vunpack.i.h.bf16 %v10719_v23  ;;  %v9240_v40 = vunpack.i.l.bf16 %v10719_v23  ;;  %v8344_v63 = vpack.c.bf16 %v4152_v21, %v4151_v36  ;;  %v4154_v49 = vsel %vm4150_vm2, %v9245_v7, %v9246_v38 }
 0x286   : > { %7903 = vmatmul.mubr.msk.f32.vlgmr.msra.gmra.mrb[0].mxu1 %vm435_vm4, %v7154_v1  ;;  %8177 = vmatpush3.bf16.msra.mxu0 %v8176_v12  ;;  %v1335_v44 = vsel %vm1332_vm13, %v9270_v54, %v9271_v19  ;;  %v9266_v9 = vunpack.i.h.bf16 %v10774_v20  ;;  %v9265_v12 = vunpack.i.l.bf16 %v10774_v20 }
 0x287   : > { %8333 = vmatpush3.bf16.msra.mxu1 %v8332_v46  ;;  %v10781_v62 = vpop.permute.xlu0 %9278  ;;  %7913 = vmatprep.mubr.msk.f32.mxu1 %vm9433_vm0, %v11401_v0  ;;  %v4153_v23 = vsel %vm4150_vm2, %v9240_v40, %v9241_v39  ;;  %vm4352_vm2 = vcmask 891904  }
 0x288   : > { %v9274_v26 = vpop.permute.xlu1 %9273  ;;  %8334 = vmatprep.subr.bf16.mxu1 %v11397_v58  ;;  %8178 = vmatprep.subr.bf16.mxu0 %v11397_v58  ;;  %v8347_v20 = vpack.c.bf16 %v4154_v49, %v4153_v23  ;;  %v4253_v32 = vsel %vm4251_vm15, %v9265_v12, %v9266_v9  ;;  %v9281_v28 = vunpack.i.h.bf16 %v10781_v62  ;;  %v9280_v13 = vunpack.i.l.bf16 %v10781_v62 }
 0x289   : > { %v9276_v37 = vunpack.i.h.bf16 %v9274_v26  ;;  %v9275_v11 = vunpack.i.l.bf16 %v9274_v26 }
 0x28b   : > { %v1336_v3 = vsel %vm1332_vm13, %v9275_v11, %v9276_v37  ;;  %8336 = vmatpush3.bf16.msra.mxu1 %v8335_v51  ;;  %v9289_v25 = vpop.permute.xlu0 %9288  ;;  %vm1433_vm13 = vcmask 80896   ;;  %v7160_v11 = vld [vmem:[%s11290_s2 + $0x128] sm:$0xff] }
 0x28c   : > { %v8179_v47 = vpack.c.bf16 %v1336_v3, %v1335_v44  ;;  %v10801_v33 = vpop.permute.xlu1 %9283  ;;  %8337 = vmatprep.subr.bf16.mxu1 %v11397_v58  ;;  %v9291_v18 = vunpack.i.h.bf16 %v9289_v25  ;;  %v9290_v2 = vunpack.i.l.bf16 %v9289_v25  ;;  %v8350_v25 = vpack.c.bf16 %v4253_v32, %v4252_v60 }
 0x28d   : > { %v9286_v48 = vunpack.i.h.bf16 %v10801_v33  ;;  %v9285_v26 = vunpack.i.l.bf16 %v10801_v33 }
 0x28e   : > { %7914 = vmatmul.mubr.msk.f32.vlgmr.msra.gmra.mrb[0].mxu1 %vm435_vm4, %v7156_v52  ;;  %8180 = vmatpush3.bf16.msra.mxu0 %v8179_v47  ;;  %v1434_v14 = vsel %vm1433_vm13, %v9290_v2, %v9291_v18 }
 0x28f   : > { %8339 = vmatpush3.bf16.msra.mxu1 %v8338_v27  ;;  %v10811_v45 = vpop.permute.xlu0 %9298  ;;  %7924 = vmatprep.mubr.msk.f32.mxu1 %vm9433_vm0, %v11401_v0  ;;  %v4255_v52 = vsel %vm4251_vm15, %v9285_v26, %v9286_v48  ;;  %v4254_v27 = vsel %vm4251_vm15, %v9280_v13, %v9281_v28  ;;  %vm4453_vm15 = vcmask 883712   ;;  %v7166_v28 = vld [vmem:[%s11290_s2 + $0x140] sm:$0xff]  ;;  %v388_v13 = vlaneseq }
 0x290   : > { %v9294_v24 = vpop.permute.xlu1 %9293  ;;  %8340 = vmatprep.subr.bf16.mxu1 %v11397_v58  ;;  %8181 = vmatprep.subr.bf16.mxu0 %v11397_v58  ;;  %v9301_v61 = vunpack.i.h.bf16 %v10811_v45  ;;  %v9300_v41 = vunpack.i.l.bf16 %v10811_v45 }
 0x291   : > { %v9296_v59 = vunpack.i.h.bf16 %v9294_v24  ;;  %v9295_v8 = vunpack.i.l.bf16 %v9294_v24  ;;  %7628 = vmatmul.mubr.msk.f32.vlgmr.msra.gmra.mrb[10].mxu0 %vm435_vm4, %v7104_v50  ;;  %v8353_v50 = vpack.c.bf16 %v4255_v52, %v4254_v27 }
 0x292   : > { %7638 = vmatprep.mubr.msk.f32.mxu0 %vm9433_vm0, %v11401_v0 }
 0x293   : > { %v1435_v42 = vsel %vm1433_vm13, %v9295_v8, %v9296_v59  ;;  %8342 = vmatpush3.bf16.msra.mxu1 %v8341_v57  ;;  %v9309_v56 = vpop.permute.xlu0 %9308  ;;  %v7162_v59 = vld [vmem:[%s11290_s2 + $0x130] sm:$0xff]  ;;  %v4353_v8 = vsel %vm4352_vm2, %v9300_v41, %v9301_v61 }
 0x294   : > { %v8182_v4 = vpack.c.bf16 %v1435_v42, %v1434_v14  ;;  %v10834_v1 = vpop.permute.xlu1 %9303  ;;  %8343 = vmatprep.subr.bf16.mxu1 %v11397_v58  ;;  %v9311_v16 = vunpack.i.h.bf16 %v9309_v56  ;;  %v9310_v46 = vunpack.i.l.bf16 %v9309_v56 }
 0x295   : > { %v9306_v35 = vunpack.i.h.bf16 %v10834_v1  ;;  %v9305_v55 = vunpack.i.l.bf16 %v10834_v1 }
 0x296   : > { %7925 = vmatmul.mubr.msk.f32.vlgmr.msra.gmra.mrb[0].mxu1 %vm435_vm4, %v7158_v17  ;;  %8183 = vmatpush3.bf16.msra.mxu0 %v8182_v4  ;;  %v1436_v51 = vsel %vm1433_vm13, %v9310_v46, %v9311_v16 }
 0x297   : > { %8345 = vmatpush3.bf16.msra.mxu1 %v8344_v63  ;;  %v10841_v6 = vpop.permute.xlu0 %9318  ;;  %7935 = vmatprep.mubr.msk.f32.mxu1 %vm9433_vm0, %v11401_v0  ;;  %v4354_v34 = vsel %vm4352_vm2, %v9305_v55, %v9306_v35 }
 0x298   : > { %v9314_v19 = vpop.permute.xlu1 %9313  ;;  %8346 = vmatprep.subr.bf16.mxu1 %v11397_v58  ;;  %8184 = vmatprep.subr.bf16.mxu0 %v11397_v58  ;;  %v9321_v21 = vunpack.i.h.bf16 %v10841_v6  ;;  %v9320_v38 = vunpack.i.l.bf16 %v10841_v6  ;;  %v8356_v42 = vpack.c.bf16 %v4354_v34, %v4353_v8 }
 0x299   : > { %v9316_v54 = vunpack.i.h.bf16 %v9314_v19  ;;  %v9315_v22 = vunpack.i.l.bf16 %v9314_v19 }
 0x29a   : > { %v4355_v4 = vsel %vm4352_vm2, %v9320_v38, %v9321_v21  ;;  %v7175_v38 = vld [vmem:[%s11291_s3 + $0x20] sm:$0xff] }
 0x29b   : > { %v1437_v37 = vsel %vm1433_vm13, %v9315_v22, %v9316_v54  ;;  %8348 = vmatpush3.bf16.msra.mxu1 %v8347_v20  ;;  %v9329_v29 = vpop.permute.xlu0 %9328  ;;  %vm1534_vm13 = vcmask 72704   ;;  %v7164_v20 = vld [vmem:[%s11290_s2 + $0x138] sm:$0xff] }
 0x29c   : > { %v8185_v44 = vpack.c.bf16 %v1437_v37, %v1436_v51  ;;  %v9324_v3 = vpop.permute.xlu1 %9323  ;;  %8349 = vmatprep.subr.bf16.mxu1 %v11397_v58  ;;  %v9331_v47 = vunpack.i.h.bf16 %v9329_v29  ;;  %v9330_v62 = vunpack.i.l.bf16 %v9329_v29  ;;  %v7108_v37 = vld [vmem:[%s11290_s2 + $0x58] sm:$0xff] }
 0x29d   : > { %v9326_v53 = vunpack.i.h.bf16 %v9324_v3  ;;  %v9325_v10 = vunpack.i.l.bf16 %v9324_v3 }
 0x29e   : > { %7936 = vmatmul.mubr.msk.f32.vlgmr.msra.gmra.mrb[0].mxu1 %vm435_vm4, %v7160_v11  ;;  %8186 = vmatpush3.bf16.msra.mxu0 %v8185_v44  ;;  %v1535_v45 = vsel %vm1534_vm13, %v9330_v62, %v9331_v47  ;;  %v7168_v62 = vld [vmem:[%s11291_s3 + $0x8] sm:$0xff] }
 0x29f   : > { %8351 = vmatpush3.bf16.msra.mxu1 %v8350_v25  ;;  %v9339_v33 = vpop.permute.xlu0 %9338  ;;  %7946 = vmatprep.mubr.msk.f32.mxu1 %vm9433_vm0, %v11401_v0  ;;  %v4356_v56 = vsel %vm4352_vm2, %v9325_v10, %v9326_v53  ;;  %v10921_v25 = vand.u32 127, %v388_v13  ;;  %v7171_v53 = vld [vmem:[%s11291_s3 + $0x10] sm:$0xff] }
 0x2a0   : > { %v9334_v5 = vpop.permute.xlu1 %9333  ;;  %8352 = vmatprep.subr.bf16.mxu1 %v11397_v58  ;;  %8187 = vmatprep.subr.bf16.mxu0 %v11397_v58  ;;  %v9341_v1 = vunpack.i.h.bf16 %v9339_v33  ;;  %v9340_v63 = vunpack.i.l.bf16 %v9339_v33  ;;  %v8359_v12 = vpack.c.bf16 %v4356_v56, %v4355_v4  ;;  %v7177_v56 = vld [vmem:[%s11291_s3 + $0x28] sm:$0xff] }
 0x2a1   : > { %v9336_v18 = vunpack.i.h.bf16 %v9334_v5  ;;  %v9335_v2 = vunpack.i.l.bf16 %v9334_v5  ;;  %7639 = vmatmul.mubr.msk.f32.vlgmr.msra.gmra.mrb[10].mxu0 %vm435_vm4, %v7106_v31  ;;  %vm390_vm2 = vcmp.lt.s32.totalorder %v10921_v25, 16  ;;  %v7216_v25 = vld [vmem:[%s11292_s4 + $0x28] sm:$0xff] }
 0x2a2   : > { %7649 = vmatprep.mubr.msk.f32.mxu0 %vm9433_vm0, %v11401_v0  ;;  %v4454_v54 = vsel %vm4453_vm15, %v9340_v63, %v9341_v1 }
 0x2a3   : > { %v1536_v24 = vsel %vm1534_vm13, %v9335_v2, %v9336_v18  ;;  %8354 = vmatpush3.bf16.msra.mxu1 %v8353_v50  ;;  %v9349_v57 = vpop.permute.xlu0 %9348  ;;  %v4540_v18 = vld [vmem:[%s11291_s3] sm:$0xff] }
 0x2a4   : > { %v8188_v7 = vpack.c.bf16 %v1536_v24, %v1535_v45  ;;  %v9344_v14 = vpop.permute.xlu1 %9343  ;;  %8355 = vmatprep.subr.bf16.mxu1 %v11397_v58  ;;  %v9351_v39 = vunpack.i.h.bf16 %v9349_v57  ;;  %v9350_v40 = vunpack.i.l.bf16 %v9349_v57  ;;  %v7173_v57 = vld [vmem:[%s11291_s3 + $0x18] sm:$0xff] }
 0x2a5   : > { %v9346_v17 = vunpack.i.h.bf16 %v9344_v14  ;;  %v9345_v36 = vunpack.i.l.bf16 %v9344_v14 }
 0x2a6   : > { %7947 = vmatmul.mubr.msk.f32.vlgmr.msra.gmra.mrb[0].mxu1 %vm435_vm4, %v7162_v59  ;;  %8189 = vmatpush3.bf16.msra.mxu0 %v8188_v7  ;;  %v1537_v23 = vsel %vm1534_vm13, %v9350_v40, %v9351_v39  ;;  %v7179_v40 = vld [vmem:[%s11291_s3 + $0x30] sm:$0xff] }
 0x2a7   : > { %8357 = vmatpush3.bf16.msra.mxu1 %v8356_v42  ;;  %7957 = vmatprep.mubr.msk.f32.mxu1 %vm9433_vm0, %v11401_v0  ;;  %v9359_v49 = vpop.permute.xlu0 %9358  ;;  %v4455_v6 = vsel %vm4453_vm15, %v9345_v36, %v9346_v17 }
 0x2a8   : > { %v9354_v9 = vpop.permute.xlu1 %9353  ;;  %8358 = vmatprep.subr.bf16.mxu1 %v11397_v58  ;;  %8190 = vmatprep.subr.bf16.mxu0 %v11397_v58  ;;  %v9361_v43 = vunpack.i.h.bf16 %v9359_v49  ;;  %v9360_v30 = vunpack.i.l.bf16 %v9359_v49  ;;  %v8362_v48 = vpack.c.bf16 %v4455_v6, %v4454_v54  ;;  %v7181_v49 = vld [vmem:[%s11291_s3 + $0x38] sm:$0xff]  ;;  %v7185_v6 = vld [vmem:[%s11291_s3 + $0x48] sm:$0xff] }
 0x2a9   : > { %v9356_v16 = vunpack.i.h.bf16 %v9354_v9  ;;  %v9355_v46 = vunpack.i.l.bf16 %v9354_v9 }
 0x2aa   : > { %v4456_v29 = vsel %vm4453_vm15, %v9360_v30, %v9361_v43 }
 0x2ab   : > { %v1538_v19 = vsel %vm1534_vm13, %v9355_v46, %v9356_v16  ;;  %8360 = vmatpush3.bf16.msra.mxu1 %v8359_v12  ;;  %v4548_v31 = vpop.permute.xlu0 %4547  ;;  %v7183_v16 = vld [vmem:[%s11291_s3 + $0x40] sm:$0xff] }
 0x2ac   : > { %v8191_v22 = vpack.c.bf16 %v1538_v19, %v1537_v23  ;;  %v9364_v32 = vpop.permute.xlu1 %9363  ;;  %8361 = vmatprep.subr.bf16.mxu1 %v11397_v58  ;;  %v7187_v19 = vld [vmem:[%s11291_s3 + $0x50] sm:$0xff] }
 0x2ad   : > { %v9366_v26 = vunpack.i.h.bf16 %v9364_v32  ;;  %v9365_v51 = vunpack.i.l.bf16 %v9364_v32  ;;  %v7189_v32 = vld [vmem:[%s11291_s3 + $0x58] sm:$0xff] }
 0x2ae   : > { %7958 = vmatmul.mubr.msk.f32.vlgmr.msra.gmra.mrb[0].mxu1 %vm435_vm4, %v7164_v20  ;;  %8192 = vmatpush3.bf16.msra.mxu0 %v8191_v22 }
 0x2af   : > { %v4457_v11 = vsel %vm4453_vm15, %v9365_v51, %v9366_v26  ;;  %8363 = vmatpush3.bf16.msra.mxu1 %v8362_v48  ;;  %7968 = vmatprep.mubr.msk.f32.mxu1 %vm9433_vm0, %v11401_v0  ;;  %v4627_v27 = vpop.permute.xlu0 %4626  ;;  %vm11437_vm15 = vcmask 965632  }
 0x2b0   : > { %v8365_v60 = vpack.c.bf16 %v4457_v11, %v4456_v29  ;;  %8364 = vmatprep.subr.bf16.mxu1 %v11397_v58  ;;  %7971 = vmatprep.subr.mxu0 %v11401_v0 }
 0x2b1   : > { %7650 = vmatmul.mubr.msk.f32.vlgmr.msra.gmra.mrb[10].mxu0 %vm435_vm4, %v7108_v37  ;;  %v7191_v37 = vld [vmem:[%s11291_s3 + $0x60] sm:$0xff] }
 0x2b2   : > { %7973 = vmatprep.mubr.msk.f32.mxu0 %vm9433_vm0, %v11401_v0 }
 0x2b3   : > { %8366 = vmatpush3.bf16.msra.mxu1 %v8365_v60  ;;  %v4708_v5 = vpop.permute.xlu0 %4707 }
 0x2b6   : > { %7969 = vmatmul.mubr.msk.f32.vlgmr.msra.gmra.mrb[0].mxu1 %vm435_vm4, %v7166_v28  ;;  %vm11432_vm4 = vcmask 1022976   ;;  %v7193_v28 = vld [vmem:[%s11291_s3 + $0x68] sm:$0xff] }
 0x2b7   : > { %v4790_v10 = vpop.permute.xlu0 %4789 }
 0x2bb   : > { %v4872_v59 = vpop.permute.xlu0 %4871 }
 0x2bf   : > { %v4954_v7 = vpop.permute.xlu0 %4953 }
 0x2c3   : > { %v5036_v17 = vpop.permute.xlu0 %5035 }
 0x2c7   : > { %v5118_v4 = vpop.permute.xlu0 %5117 }
 0x2cb   : > { %v5200_v9 = vpop.permute.xlu0 %5199 }
 0x384   : > { %v1612_v44 = vpop.f32.mrb[10].mxu0 }
 0x385   : > { %v7651_v3 = vpop.f32.mrb[11].mxu0 }
 0x389   : > { %v4531_v58 = vpop.f32.mrb[0].mxu1 }
 0x38a   : > { %v10924_v52 = vadd.f32 %v4531_v58, %v1612_v44  ;;  %v7970_v35 = vpop.f32.mrb[1].mxu1  ;;  %v7195_v58 = vld [vmem:[%s11291_s3 + $0x70] sm:$0xff] }
 0x38c   : > { %v4538_v55 = vsel %vm390_vm2, %v10924_v52, 0.0 }
 0x38d   : > { %5361 = vrot.lane.b32.xlu0 %v4538_v55, %s11427_s0  ;;  %4549 = vrot.lane.b32.xlu1 %v4538_v55, %s11409_s17 }
 0x391   : > { %5443 = vrot.lane.b32.xlu0 %v4538_v55, %s11428_s26  ;;  %4628 = vrot.lane.b32.xlu1 %v4538_v55, %s11429_s23 }
 0x395   : > { %5525 = vrot.lane.b32.xlu0 %v4538_v55, %s11430_s30  ;;  %4709 = vrot.lane.b32.xlu1 %v4538_v55, %s11410_s15 }
 0x399   : > { %5607 = vrot.lane.b32.xlu0 %v4538_v55, %s11379_s11  ;;  %4791 = vrot.lane.b32.xlu1 %v4538_v55, %s11411_s16 }
 0x39d   : > { %5689 = vrot.lane.b32.xlu0 %v4538_v55, %s11380_s10  ;;  %4873 = vrot.lane.b32.xlu1 %v4538_v55, %s11413_s19 }
 0x3a1   : > { %5771 = vrot.lane.b32.xlu0 %v4538_v55, %s11381_s12  ;;  %4955 = vrot.lane.b32.xlu1 %v4538_v55, %s11414_s18 }
 0x3a5   : > { %5853 = vrot.lane.b32.xlu0 %v4538_v55, %s11382_s29  ;;  %5037 = vrot.lane.b32.xlu1 %v4538_v55, %s11415_s28 }
 0x3a9   : > { %5935 = vrot.lane.b32.xlu0 %v4538_v55, %s11383_s13  ;;  %5119 = vrot.lane.b32.xlu1 %v4538_v55, %s11417_s20 }
 0x3ad   : > { %6017 = vrot.lane.b32.xlu0 %v4538_v55, %s11385_s14  ;;  %5201 = vrot.lane.b32.xlu1 %v4538_v55, %s11419_s1 }
 0x3b1   : > { %6099 = vrot.lane.b32.xlu0 %v4538_v55, %s11394_s9  ;;  %5363 = vrot.lane.b32.xlu1 %v11401_v0, %s11427_s0 }
 0x3b5   : > { %5445 = vrot.lane.b32.xlu1 %v11401_v0, %s11428_s26  ;;  %6188 = vrot.lane.b32.xlu0 %v11401_v0, %s11415_s28 }
 0x3b9   : > { %5527 = vrot.lane.b32.xlu1 %v11401_v0, %s11430_s30  ;;  %6267 = vrot.lane.b32.xlu0 %v11401_v0, %s11414_s18 }
 0x3bd   : > { %5609 = vrot.lane.b32.xlu1 %v11401_v0, %s11379_s11  ;;  %6348 = vrot.lane.b32.xlu0 %v11401_v0, %s11417_s20 }
 0x3c1   : > { %5691 = vrot.lane.b32.xlu1 %v11401_v0, %s11380_s10  ;;  %6430 = vrot.lane.b32.xlu0 %v11401_v0, %s11419_s1 }
 0x3c5   : > { %5773 = vrot.lane.b32.xlu1 %v11401_v0, %s11381_s12 }
 0x3c9   : > { %5855 = vrot.lane.b32.xlu1 %v11401_v0, %s11382_s29 }
 0x3cd   : > { %5937 = vrot.lane.b32.xlu1 %v11401_v0, %s11383_s13 }
 0x3d1   : > { %6019 = vrot.lane.b32.xlu1 %v11401_v0, %s11385_s14 }
 0x3d5   : > { %6101 = vrot.lane.b32.xlu1 %v11401_v0, %s11394_s9 }
 0x3ff   : > { %v4550_v47 = vpop.permute.xlu1 %4549  ;;  %v5362_v23 = vpop.permute.xlu0 %5361 }
 0x400   : > { %v4551_v33 = vsel %vm269_vm1, %v4548_v31, %v4550_v47  ;;  %v7197_v31 = vld [vmem:[%s11291_s3 + $0x78] sm:$0xff] }
 0x401   : > { %7972 = vmatpush3.msra.mxu0 %v4551_v33 }
 0x402   : > { %7974 = vmatmul.mubr.msk.f32.vlgmr.msra.gmra.mrb[12].mxu0 %vm269_vm1, %v7168_v62  ;;  %7976 = vmatprep.subr.mxu0 %v11401_v0 }
 0x403   : > { %v4629_v61 = vpop.permute.xlu1 %4628  ;;  %7978 = vmatprep.mubr.msk.f32.mxu0 %vm9433_vm0, %v11401_v0  ;;  %v5444_v20 = vpop.permute.xlu0 %5443 }
 0x404   : > { %v4630_v41 = vsel %vm1534_vm13, %v4627_v27, %v4629_v61  ;;  %v7199_v27 = vld [vmem:[%s11291_s3 + $0x80] sm:$0xff]  ;;  %vm11435_vm13 = vcmask 982016  }
 0x405   : > { %7977 = vmatpush3.msra.mxu0 %v4630_v41 }
 0x406   : > { %7981 = vmatprep.subr.mxu0 %v11401_v0 }
 0x407   : > { %v4710_v50 = vpop.permute.xlu1 %4709  ;;  %v5526_v48 = vpop.permute.xlu0 %5525 }
 0x408   : > { %v4711_v2 = vsel %vm1735_vm3, %v4708_v5, %v4710_v50  ;;  %vm11431_vm3 = vcmask 1031168   ;;  %v7201_v50 = vld [vmem:[%s11291_s3 + $0x88] sm:$0xff] }
 0x40a   : > { %7979 = vmatmul.mubr.msk.f32.vlgmr.msra.gmra.mrb[12].mxu0 %vm269_vm1, %v4540_v18 }
 0x40b   : > { %7982 = vmatpush3.msra.mxu0 %v4711_v2  ;;  %7983 = vmatprep.mubr.msk.f32.mxu0 %vm9433_vm0, %v11401_v0  ;;  %v4792_v34 = vpop.permute.xlu1 %4791  ;;  %v5608_v29 = vpop.permute.xlu0 %5607 }
 0x40c   : > { %7986 = vmatprep.subr.mxu0 %v11401_v0  ;;  %v4793_v45 = vsel %vm1836_vm5, %v4790_v10, %v4792_v34  ;;  %vm11433_vm5 = vcmask 1006592  }
 0x40f   : > { %v4874_v24 = vpop.permute.xlu1 %4873  ;;  %v5690_v13 = vpop.permute.xlu0 %5689 }
 0x410   : > { %v4875_v8 = vsel %vm1937_vm6, %v4872_v59, %v4874_v24  ;;  %vm11434_vm6 = vcmask 998400   ;;  %v7205_v24 = vld [vmem:[%s11291_s3 + $0x98] sm:$0xff] }
 0x412   : > { %7984 = vmatmul.mubr.msk.f32.vlgmr.msra.gmra.mrb[12].mxu0 %vm269_vm1, %v7171_v53  ;;  %v7203_v53 = vld [vmem:[%s11291_s3 + $0x90] sm:$0xff] }
 0x413   : > { %7987 = vmatpush3.msra.mxu0 %v4793_v45  ;;  %7988 = vmatprep.mubr.msk.f32.mxu0 %vm9433_vm0, %v11401_v0  ;;  %v4956_v21 = vpop.permute.xlu1 %4955 }
 0x414   : > { %7991 = vmatprep.subr.mxu0 %v11401_v0  ;;  %v4957_v14 = vsel %vm2038_vm7, %v4954_v7, %v4956_v21 }
 0x417   : > { %v5038_v42 = vpop.permute.xlu1 %5037 }
 0x418   : > { %v5039_v36 = vsel %vm2139_vm8, %v5036_v17, %v5038_v42  ;;  %v7207_v17 = vld [vmem:[%s11292_s4 + $0x8] sm:$0xff] }
 0x41a   : > { %7989 = vmatmul.mubr.msk.f32.vlgmr.msra.gmra.mrb[12].mxu0 %vm269_vm1, %v7173_v57  ;;  %v9475_v57 = vmov 0  }
 0x41b   : > { %7992 = vmatpush3.msra.mxu0 %v4875_v8  ;;  %7993 = vmatprep.mubr.msk.f32.mxu0 %vm9433_vm0, %v11401_v0  ;;  %v5120_v39 = vpop.permute.xlu1 %5119 }
 0x41c   : > { %7996 = vmatprep.subr.mxu0 %v11401_v0  ;;  %v5121_v1 = vsel %vm2240_vm9, %v5118_v4, %v5120_v39  ;;  %9367 = vset.pattern.permute.xlu0 %v9475_v57  ;;  %v6181_v4 = vld [vmem:[%s11292_s4] sm:$0xff] }
 0x41f   : > { %v5202_v63 = vpop.permute.xlu1 %5201 }
 0x420   : > { %v5203_v12 = vsel %vm2341_vm10, %v5200_v9, %v5202_v63  ;;  %v7210_v9 = vld [vmem:[%s11292_s4 + $0x10] sm:$0xff] }
 0x422   : > { %7994 = vmatmul.mubr.msk.f32.vlgmr.msra.gmra.mrb[12].mxu0 %vm269_vm1, %v7175_v38  ;;  %v375_v38 = vld [vmem:[%s11293_s5] sm:$0xff] }
 0x423   : > { %7997 = vmatpush3.msra.mxu0 %v4957_v14  ;;  %7998 = vmatprep.mubr.msk.f32.mxu0 %vm9433_vm0, %v11401_v0  ;;  %v5364_v46 = vpop.permute.xlu1 %5363 }
 0x424   : > { %8001 = vmatprep.subr.mxu0 %v11401_v0  ;;  %v5365_v43 = vsel %vm2534_vm11, %v5362_v23, %v5364_v46  ;;  %v7212_v46 = vld [vmem:[%s11292_s4 + $0x18] sm:$0xff] }
 0x427   : > { %v5446_v30 = vpop.permute.xlu1 %5445 }
 0x428   : > { %v5447_v54 = vsel %vm11431_vm3, %v5444_v20, %v5446_v30  ;;  %v7214_v30 = vld [vmem:[%s11292_s4 + $0x20] sm:$0xff] }
 0x42a   : > { %7999 = vmatmul.mubr.msk.f32.vlgmr.msra.gmra.mrb[12].mxu0 %vm269_vm1, %v7177_v56 }
 0x42b   : > { %8002 = vmatpush3.msra.mxu0 %v5039_v36  ;;  %8003 = vmatprep.mubr.msk.f32.mxu0 %vm9433_vm0, %v11401_v0  ;;  %v5528_v22 = vpop.permute.xlu1 %5527 }
 0x42c   : > { %8006 = vmatprep.subr.mxu0 %v11401_v0  ;;  %v5529_v26 = vsel %vm11432_vm4, %v5526_v48, %v5528_v22  ;;  %v7218_v48 = vld [vmem:[%s11292_s4 + $0x30] sm:$0xff] }
 0x42f   : > { %v5610_v51 = vpop.permute.xlu1 %5609 }
 0x430   : > { %v5611_v11 = vsel %vm2837_vm14, %v5608_v29, %v5610_v51  ;;  %v7220_v29 = vld [vmem:[%s11292_s4 + $0x38] sm:$0xff] }
 0x432   : > { %8004 = vmatmul.mubr.msk.f32.vlgmr.msra.gmra.mrb[12].mxu0 %vm269_vm1, %v7179_v40 }
 0x433   : > { %8007 = vmatpush3.msra.mxu0 %v5121_v1  ;;  %8008 = vmatprep.mubr.msk.f32.mxu0 %vm9433_vm0, %v11401_v0  ;;  %v5692_v60 = vpop.permute.xlu1 %5691 }
 0x434   : > { %8011 = vmatprep.subr.mxu0 %v11401_v0  ;;  %v5693_v44 = vsel %vm11433_vm5, %v5690_v13, %v5692_v60  ;;  %v7222_v13 = vld [vmem:[%s11292_s4 + $0x40] sm:$0xff] }
 0x437   : > { %v5774_v3 = vpop.permute.xlu1 %5773 }
 0x43a   : > { %8009 = vmatmul.mubr.msk.f32.vlgmr.msra.gmra.mrb[12].mxu0 %vm269_vm1, %v7181_v49 }
 0x43b   : > { %8012 = vmatpush3.msra.mxu0 %v5203_v12  ;;  %8013 = vmatprep.mubr.msk.f32.mxu0 %vm9433_vm0, %v11401_v0  ;;  %v5856_v55 = vpop.permute.xlu1 %5855 }
 0x43c   : > { %8016 = vmatprep.subr.mxu0 %v11401_v0 }
 0x43f   : > { %v5938_v33 = vpop.permute.xlu1 %5937 }
 0x442   : > { %8014 = vmatmul.mubr.msk.f32.vlgmr.msra.gmra.mrb[12].mxu0 %vm269_vm1, %v7183_v16 }
 0x443   : > { %8017 = vmatpush3.msk.msra.mxu0 %vm390_vm2, %v10924_v52  ;;  %8018 = vmatprep.mubr.msk.f32.mxu0 %vm9433_vm0, %v11401_v0  ;;  %v5772_v52 = vpop.permute.xlu0 %5771  ;;  %v6020_v5 = vpop.permute.xlu1 %6019 }
 0x444   : > { %8021 = vmatprep.subr.mxu0 %v11401_v0  ;;  %v5775_v35 = vsel %vm11434_vm6, %v5772_v52, %v5774_v3  ;;  %v7224_v3 = vld [vmem:[%s11292_s4 + $0x48] sm:$0xff] }
 0x447   : > { %v5854_v47 = vpop.permute.xlu0 %5853  ;;  %v6102_v34 = vpop.permute.xlu1 %6101 }
 0x448   : > { %v5857_v62 = vsel %vm3140_vm12, %v5854_v47, %v5856_v55  ;;  %vm11436_vm12 = vcmask 973824  }
 0x44a   : > { %8019 = vmatmul.mubr.msk.f32.vlgmr.msra.gmra.mrb[12].mxu0 %vm269_vm1, %v7185_v6 }
 0x44b   : > { %8022 = vmatpush3.msra.mxu0 %v5365_v43  ;;  %8023 = vmatprep.mubr.msk.f32.mxu0 %vm9433_vm0, %v11401_v0  ;;  %v5936_v61 = vpop.permute.xlu0 %5935 }
 0x44c   : > { %8026 = vmatprep.subr.mxu0 %v11401_v0  ;;  %v5939_v41 = vsel %vm11435_vm13, %v5936_v61, %v5938_v33 }
 0x44f   : > { %v6018_v18 = vpop.permute.xlu0 %6017 }
 0x450   : > { %v6021_v2 = vsel %vm11436_vm12, %v6018_v18, %v6020_v5 }
 0x452   : > { %8024 = vmatmul.mubr.msk.f32.vlgmr.msra.gmra.mrb[12].mxu0 %vm269_vm1, %v7187_v19 }
 0x453   : > { %8027 = vmatpush3.msra.mxu0 %v5447_v54  ;;  %8028 = vmatprep.mubr.msk.f32.mxu0 %vm9433_vm0, %v11401_v0  ;;  %v6100_v10 = vpop.permute.xlu0 %6099 }
 0x454   : > { %8031 = vmatprep.subr.mxu0 %v11401_v0  ;;  %v6103_v45 = vsel %vm11437_vm15, %v6100_v10, %v6102_v34 }
 0x457   : > { %v6189_v7 = vpop.permute.xlu0 %6188 }
 0x45a   : > { %8029 = vmatmul.mubr.msk.f32.vlgmr.msra.gmra.mrb[12].mxu0 %vm269_vm1, %v7189_v32 }
 0x45b   : > { %8032 = vmatpush3.msra.mxu0 %v5529_v26  ;;  %8033 = vmatprep.mubr.msk.f32.mxu0 %vm9433_vm0, %v11401_v0  ;;  %v6268_v14 = vpop.permute.xlu0 %6267 }
 0x45c   : > { %8036 = vmatprep.subr.mxu0 %v11401_v0 }
 0x45f   : > { %v6349_v42 = vpop.permute.xlu0 %6348 }
 0x462   : > { %8034 = vmatmul.mubr.msk.f32.vlgmr.msra.gmra.mrb[12].mxu0 %vm269_vm1, %v7191_v37 }
 0x463   : > { %8037 = vmatpush3.msra.mxu0 %v5611_v11  ;;  %8038 = vmatprep.mubr.msk.f32.mxu0 %vm9433_vm0, %v11401_v0  ;;  %v6431_v39 = vpop.permute.xlu0 %6430 }
 0x464   : > { %8041 = vmatprep.subr.mxu0 %v11401_v0 }
 0x46a   : > { %8039 = vmatmul.mubr.msk.f32.vlgmr.msra.gmra.mrb[12].mxu0 %vm269_vm1, %v7193_v28 }
 0x46b   : > { %8042 = vmatpush3.msra.mxu0 %v5693_v44  ;;  %8043 = vmatprep.mubr.msk.f32.mxu0 %vm9433_vm0, %v11401_v0 }
 0x46c   : > { %8046 = vmatprep.subr.mxu0 %v11401_v0 }
 0x472   : > { %8044 = vmatmul.mubr.msk.f32.vlgmr.msra.gmra.mrb[12].mxu0 %vm269_vm1, %v7195_v58 }
 0x473   : > { %8047 = vmatpush3.msra.mxu0 %v5775_v35  ;;  %8048 = vmatprep.mubr.msk.f32.mxu0 %vm9433_vm0, %v11401_v0 }
 0x474   : > { %8051 = vmatprep.subr.mxu0 %v11401_v0 }
 0x47a   : > { %8049 = vmatmul.mubr.msk.f32.vlgmr.msra.gmra.mrb[12].mxu0 %vm269_vm1, %v7197_v31 }
 0x47b   : > { %8052 = vmatpush3.msra.mxu0 %v5857_v62  ;;  %8053 = vmatprep.mubr.msk.f32.mxu0 %vm9433_vm0, %v11401_v0 }
 0x47c   : > { %8056 = vmatprep.subr.mxu0 %v11401_v0 }
 0x482   : > { %8054 = vmatmul.mubr.msk.f32.vlgmr.msra.gmra.mrb[12].mxu0 %vm269_vm1, %v7199_v27 }
 0x483   : > { %8057 = vmatpush3.msra.mxu0 %v5939_v41  ;;  %8058 = vmatprep.mubr.msk.f32.mxu0 %vm9433_vm0, %v11401_v0 }
 0x484   : > { %8061 = vmatprep.subr.mxu0 %v11401_v0 }
 0x48a   : > { %8059 = vmatmul.mubr.msk.f32.vlgmr.msra.gmra.mrb[12].mxu0 %vm269_vm1, %v7201_v50 }
 0x48b   : > { %8062 = vmatpush3.msra.mxu0 %v6021_v2  ;;  %8063 = vmatprep.mubr.msk.f32.mxu0 %vm9433_vm0, %v11401_v0 }
 0x48c   : > { %8066 = vmatprep.subr.mxu0 %v11401_v0 }
 0x492   : > { %8064 = vmatmul.mubr.msk.f32.vlgmr.msra.gmra.mrb[12].mxu0 %vm269_vm1, %v7203_v53 }
 0x493   : > { %8067 = vmatpush3.msra.mxu0 %v6103_v45  ;;  %8068 = vmatprep.mubr.msk.f32.mxu0 %vm9433_vm0, %v11401_v0 }
 0x494   : > { %8071 = vmatprep.subr.mxu0 %v11401_v0 }
 0x49a   : > { %8069 = vmatmul.mubr.msk.f32.vlgmr.msra.gmra.mrb[12].mxu0 %vm269_vm1, %v7205_v24 }
 0x49b   : > { %8073 = vmatprep.mubr.msk.f32.mxu0 %vm9433_vm0, %v11401_v0 }
 0x56d   : > { %v6174_v59 = vpop.f32.mrb[12].mxu0 }
 0x56e   : > { %v6179_v8 = vsel %vm390_vm2, %v6174_v59, 0.0  ;;  %v8070_v21 = vpop.f32.mrb[13].mxu0 }
 0x56f   : > { %6592 = vrot.lane.b32.xlu0 %v6179_v8, %s11427_s0  ;;  %6190 = vrot.lane.b32.xlu1 %v6179_v8, %s11415_s28 }
 0x573   : > { %6674 = vrot.lane.b32.xlu0 %v6179_v8, %s11428_s26  ;;  %6269 = vrot.lane.b32.xlu1 %v6179_v8, %s11414_s18  ;;  %s240_s18 = sand.u32 1, %s9422_s22  }
 0x574   : > { %s7004_s29 = scalar_lea.sflag [#allocation6], %s240_s18 }
 0x577   : > { %6756 = vrot.lane.b32.xlu0 %v6179_v8, %s11430_s30  ;;  %6350 = vrot.lane.b32.xlu1 %v6179_v8, %s11417_s20 }
 0x57b   : > { %6838 = vrot.lane.b32.xlu0 %v6179_v8, %s11379_s11  ;;  %6432 = vrot.lane.b32.xlu1 %v6179_v8, %s11419_s1 }
 0x57f   : > { %6920 = vrot.lane.b32.xlu0 %v6179_v8, %s11380_s10  ;;  %6594 = vrot.lane.b32.xlu1 %v11401_v0, %s11427_s0 }
 0x583   : > { %378 = vperm.xlu0 %9367, %v375_v38   ;;  %6676 = vrot.lane.b32.xlu1 %v11401_v0, %s11428_s26 }
 0x587   : > { %6758 = vrot.lane.b32.xlu1 %v11401_v0, %s11430_s30 }
 0x58b   : > { %6840 = vrot.lane.b32.xlu1 %v11401_v0, %s11379_s11  ;;  %s7227_s11 = sshll.u32 %s9533_s25, 7  ;;  %s9476_s25 = smov [#allocation5]  }
 0x58c   : > { %s11246_s30 = scalar_lea.hbm %s11294_s6, %s7227_s11  ;;  %s9372_s13 = sshll.u32 %s9476_s25, 4  ;;  %s9373_s13 = int_to_ptr.vmem [resolvable:$false] %s9372_s13 }
 0x58d   : > { %s9374_s14 = scalar_lea.vmem %s9373_s13, 256 }
 0x58f   : > { %6922 = vrot.lane.b32.xlu1 %v11401_v0, %s11380_s10  ;;  %s7080_s10 = sshll.u32 %s240_s18, 3 }
 0x590   : > { %s242_s28 = scalar_lea.vmem [#allocation5], %s7080_s10 }
 0x591   : > { %s7017_s20 = sshll.u32 %s242_s28, 4  ;;  %s11248_s20 = int_to_ptr.vmem [resolvable:$true] %s7017_s20 }
 0x592   : > { %s9368_s12 = scalar_lea.vmem %s11248_s20, 128  ;;  %p9375_p0 = scmp.lt.s32.totalorder %s11248_s20, %s9373_s13 }
 0x593   : > { %p9369_p11 = scmp.ne.s32.totalorder %s11248_s20, %s9368_s12  ;;  %p9376_p1 = scmp.lt.s32.totalorder %s9374_s14, %s9368_s12 }
 0x595   : > { %p9370_p12 = pnand %p9369_p11, %p9550_p5  ;;  %p9377_p2 = por %p9376_p1, %p9375_p0 }
 0x597   : > { %p9371_p13 = pneg %p9370_p12 }
 0x599   : > { %p9378_p3 = pnand %p9377_p2, %p9371_p13 }
 0x5e1   : > { %v6191_v56 = vpop.permute.xlu1 %6190  ;;  %v6593_v63 = vpop.permute.xlu0 %6592 }
 0x5e2   : > { %v6192_v36 = vsel %vm2139_vm8, %v6189_v7, %v6191_v56  ;;  %vm11439_vm8 = vmmov %vm11432_vm4 }
 0x5e3   : > { %8072 = vmatpush3.msra.mxu0 %v6192_v36 }
 0x5e4   : > { %8074 = vmatmul.mubr.msk.f32.vlgmr.msra.gmra.mrb[14].mxu0 %vm269_vm1, %v7207_v17  ;;  %8076 = vmatprep.subr.mxu0 %v11401_v0 }
 0x5e5   : > { %v6270_v40 = vpop.permute.xlu1 %6269  ;;  %8078 = vmatprep.mubr.msk.f32.mxu0 %vm9433_vm0, %v11401_v0  ;;  %v6675_v23 = vpop.permute.xlu0 %6674 }
 0x5e6   : > { %v6271_v1 = vsel %vm2038_vm7, %v6268_v14, %v6270_v40  ;;  %vm11438_vm7 = vmmov %vm11431_vm3 }
 0x5e7   : > { %8077 = vmatpush3.msra.mxu0 %v6271_v1 }
 0x5e8   : > { %8079 = vmatmul.mubr.msk.f32.vlgmr.msra.gmra.mrb[16].mxu0 %vm269_vm1, %v6181_v4  ;;  %8081 = vmatprep.subr.mxu0 %v11401_v0 }
 0x5e9   : > { %v6351_v49 = vpop.permute.xlu1 %6350  ;;  %8083 = vmatprep.mubr.msk.f32.mxu0 %vm9433_vm0, %v11401_v0  ;;  %v6757_v20 = vpop.permute.xlu0 %6756 }
 0x5ea   : > { %v6352_v12 = vsel %vm2240_vm9, %v6349_v42, %v6351_v49  ;;  %vm11440_vm9 = vmmov %vm11433_vm5 }
 0x5eb   : > { %8082 = vmatpush3.msra.mxu0 %v6352_v12 }
 0x5ec   : > { %8084 = vmatmul.mubr.msk.f32.vlgmr.msra.gmra.mrb[18].mxu0 %vm269_vm1, %v7210_v9  ;;  %8086 = vmatprep.subr.mxu0 %v11401_v0 }
 0x5ed   : > { %v6433_v16 = vpop.permute.xlu1 %6432  ;;  %8088 = vmatprep.mubr.msk.f32.mxu0 %vm9433_vm0, %v11401_v0  ;;  %v6839_v51 = vpop.permute.xlu0 %6838 }
 0x5ee   : > { %v6434_v6 = vsel %vm2341_vm10, %v6431_v39, %v6433_v16 }
 0x5ef   : > { %8087 = vmatpush3.msra.mxu0 %v6434_v6 }
 0x5f0   : > { %8089 = vmatmul.mubr.msk.f32.vlgmr.msra.gmra.mrb[20].mxu0 %vm269_vm1, %v7212_v46  ;;  %8091 = vmatprep.subr.mxu0 %v11401_v0 }
 0x5f1   : > { %8092 = vmatpush3.msk.msra.mxu0 %vm390_vm2, %v6174_v59  ;;  %v6595_v43 = vpop.permute.xlu1 %6594  ;;  %8093 = vmatprep.mubr.msk.f32.mxu0 %vm9433_vm0, %v11401_v0  ;;  %v6921_v60 = vpop.permute.xlu0 %6920 }
 0x5f2   : > { %v6596_v19 = vsel %vm2534_vm11, %v6593_v63, %v6595_v43  ;;  %8096 = vmatprep.subr.mxu0 %v11401_v0 }
 0x5f4   : > { %8094 = vmatmul.mubr.msk.f32.vlgmr.msra.gmra.mrb[22].mxu0 %vm269_vm1, %v7214_v30 }
 0x5f5   : > { %8097 = vmatpush3.msra.mxu0 %v6596_v19  ;;  %v6677_v54 = vpop.permute.xlu1 %6676  ;;  %8098 = vmatprep.mubr.msk.f32.mxu0 %vm9433_vm0, %v11401_v0 }
 0x5f6   : > { %v6678_v22 = vsel %vm11438_vm7, %v6675_v23, %v6677_v54  ;;  %8101 = vmatprep.subr.mxu0 %v11401_v0 }
 0x5f8   : > { %8099 = vmatmul.mubr.msk.f32.vlgmr.msra.gmra.mrb[24].mxu0 %vm269_vm1, %v7216_v25 }
 0x5f9   : > { %8102 = vmatpush3.msra.mxu0 %v6678_v22  ;;  %v6759_v32 = vpop.permute.xlu1 %6758  ;;  %8103 = vmatprep.mubr.msk.f32.mxu0 %vm9433_vm0, %v11401_v0 }
 0x5fa   : > { %v6760_v26 = vsel %vm11439_vm8, %v6757_v20, %v6759_v32  ;;  %8106 = vmatprep.subr.mxu0 %v11401_v0 }
 0x5fc   : > { %8104 = vmatmul.mubr.msk.f32.vlgmr.msra.gmra.mrb[26].mxu0 %vm269_vm1, %v7218_v48 }
 0x5fd   : > { %8107 = vmatpush3.msra.mxu0 %v6760_v26  ;;  %v6841_v37 = vpop.permute.xlu1 %6840  ;;  %8108 = vmatprep.mubr.msk.f32.mxu0 %vm9433_vm0, %v11401_v0 }
 0x5fe   : > { %v6842_v11 = vsel %vm2837_vm14, %v6839_v51, %v6841_v37  ;;  %8111 = vmatprep.subr.mxu0 %v11401_v0 }
 0x600   : > { %8109 = vmatmul.mubr.msk.f32.vlgmr.msra.gmra.mrb[28].mxu0 %vm269_vm1, %v7220_v29 }
 0x601   : > { %8112 = vmatpush3.msra.mxu0 %v6842_v11  ;;  %v6923_v28 = vpop.permute.xlu1 %6922  ;;  %8113 = vmatprep.mubr.msk.f32.mxu0 %vm9433_vm0, %v11401_v0 }
 0x602   : > { %v6924_v44 = vsel %vm11440_vm9, %v6921_v60, %v6923_v28  ;;  %8116 = vmatprep.subr.mxu0 %v11401_v0  ;;  %v379_v8 = vpop.permute.xlu0 %378 }
 0x603   : > { %v381_v38 = vadd.f32 %v379_v8, %v10769_v15 }
 0x604   : > { %8114 = vmatmul.mubr.msk.f32.vlgmr.msra.gmra.mrb[30].mxu0 %vm269_vm1, %v7222_v13 }
 0x605   : > { %8117 = vmatpush3.msra.mxu0 %v6924_v44  ;;  %8118 = vmatprep.mubr.msk.f32.mxu0 %vm9433_vm0, %v11401_v0  ;;  %v382_v56 = vmax.f32 %v381_v38, 0.0 }
 0x608   : > { %8119 = vmatmul.mubr.msk.f32.vlgmr.msra.gmra.mrb[32].mxu0 %vm269_vm1, %v7224_v3 }
 0x6b7   : > { %v6263_v58 = vpop.f32.mrb[14].mxu0 }
 0x6b8   : > { %v8075_v52 = vpop.f32.mrb[15].mxu0 }
 0x6bb   : > { %v6342_v35 = vpop.f32.mrb[16].mxu0 }
 0x6bc   : > { %v6343_v55 = vadd.f32 %v6342_v35, %v6263_v58  ;;  %v8080_v31 = vpop.f32.mrb[17].mxu0 }
 0x6bf   : > { %v6423_v47 = vpop.f32.mrb[18].mxu0 }
 0x6c0   : > { %v6427_v62 = vadd.f32 %v6423_v47, %v6343_v55  ;;  %v8085_v33 = vpop.f32.mrb[19].mxu0 }
 0x6c3   : > { %v6505_v27 = vpop.f32.mrb[20].mxu0 }
 0x6c4   : > { %v6509_v61 = vadd.f32 %v6505_v27, %v6427_v62  ;;  %v8090_v41 = vpop.f32.mrb[21].mxu0 }
 0x6c7   : > { %v6581_v5 = vpop.f32.mrb[22].mxu0 }
 0x6c8   : > { %v6585_v0 = vadd.f32 %v6581_v5, %v6509_v61  ;;  %v8095_v50 = vpop.f32.mrb[23].mxu0 }
 0x6cb   : > { %v6667_v18 = vpop.f32.mrb[24].mxu0 }
 0x6cc   : > { %v6671_v2 = vadd.f32 %v6667_v18, %v6585_v0  ;;  %v8100_v34 = vpop.f32.mrb[25].mxu0 }
 0x6cf   : > { %v6749_v53 = vpop.f32.mrb[26].mxu0 }
 0x6d0   : > { %v6753_v10 = vadd.f32 %v6749_v53, %v6671_v2  ;;  %v8105_v45 = vpop.f32.mrb[27].mxu0 }
 0x6d3   : > { %v6831_v24 = vpop.f32.mrb[28].mxu0 }
 0x6d4   : > { %v6835_v57 = vadd.f32 %v6831_v24, %v6753_v10  ;;  %v8110_v59 = vpop.f32.mrb[29].mxu0 }
 0x6d7   : > { %v6913_v21 = vpop.f32.mrb[30].mxu0 }
 0x6d8   : > { %v6917_v7 = vadd.f32 %v6913_v21, %v6835_v57  ;;  %v8115_v14 = vpop.f32.mrb[31].mxu0 }
 0x6db   : > { %v6995_v42 = vpop.f32.mrb[32].mxu0 }
 0x6dc   : > { %v6999_v17 = vadd.f32 %v6995_v42, %v6917_v7  ;;  %v8120_v36 = vpop.f32.mrb[33].mxu0 }
 0x6de   : > { %v7001_v39 = vadd.f32 %v6999_v17, %v382_v56 }
 0x6e0   : > { %7002 = vst [vmem:[%s242_s28] sm:$0xff] %v7001_v39 }
 0x6e1   : > { %9381 = shalt.err (!%p9378_p3)
}
 0x6e2   : > { %s9382_s9 = scalar_lea.hbm %s11246_s30, 128  ;;  %s9386_s23 = scalar_lea.hbm %s11294_s6, 256 }
 0x6e3   : > { %p9383_p4 = scmp.ne.s32.totalorder %s11246_s30, %s9382_s9  ;;  %p9387_p9 = scmp.lt.u32.totalorder %s11246_s30, %s11294_s6 }
 0x6e4   : > { %p9388_p10 = scmp.lt.u32.totalorder %s9386_s23, %s9382_s9  ;;  %p9390_p12 = scmp.lt.u32.totalorder %s9382_s9, %s11246_s30 }
 0x6e5   : > { %p9384_p7 = pnand %p9383_p4, %p9550_p5 }
 0x6e6   : > { %p9389_p11 = por %p9388_p10, %p9387_p9 }
 0x6e7   : > { %p9385_p8 = pneg %p9384_p7 }
 0x6e8   : > { %p9391_p13 = por %p9390_p12, %p9389_p11 }
 0x6ea   : > { %p9392_p0 = pnand %p9391_p13, %p9385_p8 }
 0x6ec   : > { %9395 = shalt.err (!%p9392_p0)
}
 0x6ed   : > { %8484 = dma.vmem_to_hbm [thread:$0]  (%p9550_p5), %s11248_s20, 128, %s11246_s30, %s7004_s29  }
 0x6ee PF: > { %p8490_p1 = scmp.ge.s32.totalorder %s9430_s24, 2  ;;  %s7029_s1 = sand.u32 1, %s9418_s21  }
 0x6ef   : > { %s7030_s18 = scalar_lea.sflag [#allocation6], %s7029_s1 }
 0x6f0   : > { %p8487_p2 = pnand %p8490_p1, %p9554_p6 }
 0x6f2   : > { %9413 = dma.done.wait (!%p8487_p2), %s7030_s18, 128  }
 0x6f3   : > { %9415 = vsyncadd (!%p8487_p2), %s7030_s18, 4294967168  ;;  %s11441_s10 = sld [smem:[#allocation8_spill]]  ;;  %s11442_s23 = sld [smem:[#allocation9_spill]] }
 0x6f4   : > { %p16_p3 = scmp.ge.s32.totalorder %s9537_s27, 4   ;;  %s11443_s21 = smov %s9422_s22 }
 0x6f5   : > { %s11445_s24 = smov %s9537_s27 }
 0x6f6   :  { %18 = sbr.rel (!%p16_p3) target bundleno = 6 (0x6), region = 147 }
 0x6f9   : > { %s11444_s22 = smov %s11441_s10 }
 0x6fd   :  { %7035 = vsyncpa [#allocation6], 1 }
 0x6fe   :  { %7037 = vsyncpa [#allocation6 + $0x1], 1 }

</bundles_post_ra>
